<compile_context>
chip_gen: v5e
topology: v5e:2x2
jax: 0.10.0
libtpu: 0.0.40
codegen_flags: <defaults>
</compile_context>

<pallas_src>
import functools

import jax
import jax.numpy as jnp
from jax.experimental import pallas as pl
from jax.experimental.pallas import tpu as pltpu

EPS = 1e-5
_INV_SQRT2 = 0.7071067811865476
_C = 32  # channels of both stem stages


def _cdiv(a, b):
    return -(-a // b)


def _round_up(x, m):
    return _cdiv(x, m) * m


# --------------------------------------------------------------------------
# Pass 1a: im2col-matmul conv + ReLU + global channel stats (stage 1).
# --------------------------------------------------------------------------
def _mm_relu_stats_kernel(p_ref, w_ref, y_ref, s_ref, ss_ref):
    @pl.when(pl.program_id(0) == 0)
    def _():
        s_ref[...] = jnp.zeros_like(s_ref)
        ss_ref[...] = jnp.zeros_like(ss_ref)

    y = jnp.dot(p_ref[...], w_ref[...], preferred_element_type=jnp.float32)
    y = jnp.maximum(y, 0.0)
    y_ref[...] = y
    # Global (over the whole grid) per-channel sums for BatchNorm batch stats.
    s_ref[...] += jnp.sum(y, axis=0, keepdims=True)
    ss_ref[...] += jnp.sum(y * y, axis=0, keepdims=True)


def _conv_mm_relu_stats(patches, w, tile_m):
    """patches: (Mp, P) bf16, w: (P, C) bf16 -> (y_raw f32, sum, sumsq)."""
    Mp, P = patches.shape
    C = w.shape[1]
    return pl.pallas_call(
        _mm_relu_stats_kernel,
        out_shape=(
            jax.ShapeDtypeStruct((Mp, C), jnp.float32),
            jax.ShapeDtypeStruct((1, C), jnp.float32),
            jax.ShapeDtypeStruct((1, C), jnp.float32),
        ),
        grid=(Mp // tile_m,),
        in_specs=[
            pl.BlockSpec((tile_m, P), lambda i: (i, 0)),
            pl.BlockSpec((P, C), lambda i: (0, 0)),
        ],
        out_specs=(
            pl.BlockSpec((tile_m, C), lambda i: (i, 0)),
            pl.BlockSpec((1, C), lambda i: (0, 0)),   # accumulator (resident)
            pl.BlockSpec((1, C), lambda i: (0, 0)),   # accumulator (resident)
        ),
        compiler_params=pltpu.CompilerParams(
            dimension_semantics=("arbitrary",)),      # accumulators => sequential
    )(patches, w)


# --------------------------------------------------------------------------
# Pass 1b: stage-2 3x3 conv with in-kernel im2col from halo'd slabs
#          + ReLU + global channel stats.
#
# The slab for one (batch, row-tile) is the spatially padded y1 rows
# [t*TILE_H, t*TILE_H + TILE_H + 3) flattened to (SLAB_H * Wp, C).  Because the
# slab keeps the padded width Wp = W1+2, the 3x3 tap (kh, kw) of output element
# m = r*Wp + w is simply the slab row m + kh*Wp + kw, so every tap is one
# contiguous (OUT_R, C) slice and one plain 2D matmul (9 total).  The two
# junk columns per row (w >= W1) and any padded rows are excluded from the
# BN statistics with a precomputed mask and sliced off in the wrapper.
# --------------------------------------------------------------------------
def _conv3x3_relu_stats_kernel(slab_ref, w_ref, mask_ref, y_ref, s_ref, ss_ref,
                               *, wp, out_r):
    @pl.when((pl.program_id(0) == 0) & (pl.program_id(1) == 0))
    def _():
        s_ref[...] = jnp.zeros_like(s_ref)
        ss_ref[...] = jnp.zeros_like(ss_ref)

    # 9 shifted matmuls, accumulated into the (VMEM-resident) output block.
    y_ref[...] = jnp.dot(slab_ref[pl.ds(0, out_r), :], w_ref[0],
                         preferred_element_type=jnp.float32)
    for k in range(1, 9):
        kh, kw = divmod(k, 3)
        off = kh * wp + kw
        y_ref[...] += jnp.dot(slab_ref[pl.ds(off, out_r), :], w_ref[k],
                              preferred_element_type=jnp.float32)

    y = jnp.maximum(y_ref[...], 0.0)
    y_ref[...] = y

    m = mask_ref[...]                      # (out_r, 1): 1 for real pixels
    ym = y * m
    s_ref[...] += jnp.sum(ym, axis=0, keepdims=True)
    ss_ref[...] += jnp.sum(ym * y, axis=0, keepdims=True)


def _conv3x3_relu_stats(slabs, w9, mask, *, wp, out_r):
    """slabs: (N, nH, SR, C) bf16, w9: (9, C, C) bf16, mask: (nH, out_r, 1)."""
    N, nH, SR, C = slabs.shape
    kern = functools.partial(_conv3x3_relu_stats_kernel, wp=wp, out_r=out_r)
    return pl.pallas_call(
        kern,
        out_shape=(
            jax.ShapeDtypeStruct((N, nH, out_r, C), jnp.float32),
            jax.ShapeDtypeStruct((1, C), jnp.float32),
            jax.ShapeDtypeStruct((1, C), jnp.float32),
        ),
        grid=(N, nH),
        in_specs=[
            pl.BlockSpec((None, None, SR, C), lambda n, t: (n, t, 0, 0)),
            pl.BlockSpec((9, C, C), lambda n, t: (0, 0, 0)),
            pl.BlockSpec((None, out_r, 1), lambda n, t: (t, 0, 0)),
        ],
        out_specs=(
            pl.BlockSpec((None, None, out_r, C), lambda n, t: (n, t, 0, 0)),
            pl.BlockSpec((1, C), lambda n, t: (0, 0)),  # accumulator
            pl.BlockSpec((1, C), lambda n, t: (0, 0)),  # accumulator
        ),
        compiler_params=pltpu.CompilerParams(
            dimension_semantics=("arbitrary", "arbitrary")),
    )(slabs, w9, mask)


# --------------------------------------------------------------------------
# Pass 2: BatchNorm affine (scale/shift from global stats) + exact GELU,
#         lane-dense (rows/4, 128) layout, parallel grid.
# --------------------------------------------------------------------------
def _bn_gelu_kernel(y_ref, a_ref, b_ref, o_ref):
    z = y_ref[...] * a_ref[...] + b_ref[...]
    o_ref[...] = z * 0.5 * (1.0 + jax.lax.erf(z * _INV_SQRT2))


def _bn_gelu(y2d, scale_c, shift_c):
    """y2d: (R, C) f32; scale_c/shift_c: (C,) f32 -> (R, C) f32."""
    R, C = y2d.shape
    lanes = 128
    assert lanes % C == 0
    group = lanes // C                       # 4 rows packed per 128-lane row

    tile = 512
    rl = _cdiv(R, group)
    if rl < tile:
        tile = _round_up(rl, 8)
    r_pad = _round_up(R, group * tile)

    y_pad = jnp.pad(y2d, ((0, r_pad - R), (0, 0)))
    yl = y_pad.reshape(r_pad // group, lanes)            # free row-major reinterp
    a = jnp.tile(scale_c, group).reshape(1, lanes)       # per-channel, 4x tiled
    b = jnp.tile(shift_c, group).reshape(1, lanes)

    out = pl.pallas_call(
        _bn_gelu_kernel,
        out_shape=jax.ShapeDtypeStruct(yl.shape, jnp.float32),
        grid=(yl.shape[0] // tile,),
        in_specs=[
            pl.BlockSpec((tile, lanes), lambda i: (i, 0)),
            pl.BlockSpec((1, lanes), lambda i: (0, 0)),
            pl.BlockSpec((1, lanes), lambda i: (0, 0)),
        ],
        out_specs=pl.BlockSpec((tile, lanes), lambda i: (i, 0)),
        compiler_params=pltpu.CompilerParams(
            dimension_semantics=("parallel",)),
    )(yl, a, b)
    return out.reshape(r_pad, C)[:R]


# --------------------------------------------------------------------------
# Wrapper helpers.
# --------------------------------------------------------------------------
def _im2col(x_nhwc, k, stride):
    """k x k patches with pad=(k-1)//2; cols ordered (kh, kw, c)."""
    N, H, W, C = x_nhwc.shape
    pad = (k - 1) // 2
    H_out = (H + 2 * pad - k) // stride + 1
    W_out = (W + 2 * pad - k) // stride + 1
    xp = jnp.pad(x_nhwc, ((0, 0), (pad, pad), (pad, pad), (0, 0)))
    cols = []
    for ki in range(k):
        for kj in range(k):
            cols.append(
                xp[:, ki:ki + stride * H_out:stride, kj:kj + stride * W_out:stride, :]
            )
    patches = jnp.concatenate(cols, axis=-1)
    return patches.reshape(N * H_out * W_out, k * k * C), (N, H_out, W_out)


def _prep_weight(w_oihw, pad_to=None):
    """PyTorch conv weight (C_out, C_in, kH, kW) -> (kH*kW*C_in, C_out)."""
    C_out, C_in, kH, kW = w_oihw.shape
    w = jnp.transpose(w_oihw, (2, 3, 1, 0)).reshape(kH * kW * C_in, C_out)
    if pad_to is not None and w.shape[0] < pad_to:
        w = jnp.pad(w, ((0, pad_to - w.shape[0]), (0, 0)))
    return w


def _bn_scale_shift(s, ss, count, gamma, beta):
    """Fold training-mode batch stats into an affine scale/shift (f32)."""
    mean = s[0] / count
    var = jnp.maximum(ss[0] / count - mean * mean, 0.0)
    inv = jax.lax.rsqrt(var + EPS)
    scale = gamma.reshape(-1) * inv
    shift = beta.reshape(-1) - mean * scale
    return scale, shift


@jax.jit
def stem_forward(x_nchw, params):
    """Stem forward. Input NCHW (like PyTorch), output NCHW."""
    x = jnp.transpose(x_nchw, (0, 2, 3, 1)).astype(jnp.float32)   # -> NHWC

    # ---------------- stage 1: conv(3->32, k3, s2) + relu + bn1 + gelu -----
    patches1, (N, H1, W1) = _im2col(x, k=3, stride=2)
    M1, P1 = patches1.shape
    P1p = 32                                     # pad contraction dim 27 -> 32
    tile_m = 512 if M1 >= 512 else _round_up(M1, 8)
    Mp = _round_up(M1, tile_m)
    patches1 = jnp.pad(patches1, ((0, Mp - M1), (0, P1p - P1))).astype(jnp.bfloat16)
    w1 = _prep_weight(params["conv1_w"], pad_to=P1p).astype(jnp.bfloat16)

    y1_raw, s1, ss1 = _conv_mm_relu_stats(patches1, w1, tile_m)
    scale1, shift1 = _bn_scale_shift(s1, ss1, float(M1),
                                     params["bn1_gamma"], params["bn1_beta"])
    y1 = _bn_gelu(y1_raw, scale1, shift1)[:M1].reshape(N, H1, W1, _C)

    # ---------------- stage 2: conv(32->32, k3, s1) + relu + bn2 + gelu ----
    Wp = W1 + 2
    tile_h = max(1, min(H1, max(1, 1024 // Wp)))   # ~1K output rows per tile
    nH = _cdiv(H1, tile_h)
    slab_h = tile_h + 3                            # 2-row halo + 1 overrun row
    out_r = tile_h * Wp
    pad_bottom = nH * tile_h + 2 - H1              # >= 2

    yp = jnp.pad(y1.astype(jnp.bfloat16),
                 ((0, 0), (1, pad_bottom), (1, 1), (0, 0)))
    slabs = jnp.stack(
        [yp[:, t * tile_h: t * tile_h + slab_h] for t in range(nH)], axis=1)
    slabs = slabs.reshape(N, nH, slab_h * Wp, _C)

    # BN-statistics validity mask (exclude padded rows / wrapped columns).
    t_idx = jnp.arange(nH).reshape(nH, 1, 1)
    r_idx = jnp.arange(tile_h).reshape(1, tile_h, 1)
    w_idx = jnp.arange(Wp).reshape(1, 1, Wp)
    valid = ((t_idx * tile_h + r_idx) < H1) & (w_idx < W1)
    mask = valid.astype(jnp.float32).reshape(nH, out_r, 1)

    w2 = jnp.transpose(params["conv2_w"], (2, 3, 1, 0)).reshape(9, _C, _C)
    w2 = w2.astype(jnp.bfloat16)

    y2_raw, s2, ss2 = _conv3x3_relu_stats(slabs, w2, mask, wp=Wp, out_r=out_r)
    scale2, shift2 = _bn_scale_shift(s2, ss2, float(N * H1 * W1),
                                     params["bn2_gamma"], params["bn2_beta"])
    y2 = _bn_gelu(y2_raw.reshape(N * nH * out_r, _C), scale2, shift2)
    y2 = y2.reshape(N, nH, tile_h, Wp, _C)[:, :, :, :W1, :]
    y2 = y2.reshape(N, nH * tile_h, W1, _C)[:, :H1]

    return jnp.transpose(y2, (0, 3, 1, 2))         # -> NCHW


# --------------------------------------------------------------------------
# Pure-JAX reference (same bf16 operand casts) for a numerical self-check.
# --------------------------------------------------------------------------
def _ref_stage(x_nhwc, w_oihw, gamma, beta, stride):
    xb = x_nhwc.astype(jnp.bfloat16).astype(jnp.float32)
    wb = w_oihw.astype(jnp.bfloat16).astype(jnp.float32)
    y = jax.lax.conv_general_dilated(
        xb, jnp.transpose(wb, (2, 3, 1, 0)),
        window_strides=(stride, stride), padding=((1, 1), (1, 1)),
        dimension_numbers=("NHWC", "HWIO", "NHWC"),
        precision=jax.lax.Precision.HIGHEST)
    y = jnp.maximum(y, 0.0)
    mean = jnp.mean(y, axis=(0, 1, 2))
    var = jnp.mean(y * y, axis=(0, 1, 2)) - mean * mean
    z = (y - mean) * jax.lax.rsqrt(var + EPS) * gamma.reshape(-1) + beta.reshape(-1)
    return z * 0.5 * (1.0 + jax.lax.erf(z * _INV_SQRT2))


def stem_reference(x_nchw, params):
    x = jnp.transpose(x_nchw, (0, 2, 3, 1)).astype(jnp.float32)
    y1 = _ref_stage(x, params["conv1_w"], params["bn1_gamma"], params["bn1_beta"], 2)
    y2 = _ref_stage(y1, params["conv2_w"], params["bn2_gamma"], params["bn2_beta"], 1)
    return jnp.transpose(y2, (0, 3, 1, 2))


def init_params(key):
    k1, k2 = jax.random.split(key, 2)
    conv1_w = jax.random.normal(k1, (32, 3, 3, 3), jnp.float32) * 0.1
    conv2_w = jax.random.normal(k2, (32, 32, 3, 3), jnp.float32) * 0.05
    return {
        "conv1_w": conv1_w,
        "conv2_w": conv2_w,
        "bn1_gamma": jnp.ones((1, 32), jnp.float32),
        "bn1_beta": jnp.zeros((1, 32), jnp.float32),
        "bn2_gamma": jnp.ones((1, 32), jnp.float32),
        "bn2_beta": jnp.zeros((1, 32), jnp.float32),
    }


if __name__ == "__main__":
    key = jax.random.PRNGKey(0)
    pkey, xkey = jax.random.split(key)
    params = init_params(pkey)

    # Small deterministic input, NCHW like the PyTorch module (C_in must be 3).
    x = jax.random.normal(xkey, (2, 3, 16, 16), jnp.float32)

    out = stem_forward(x, params)
    out = jax.block_until_ready(out)

    assert out.shape == (2, 32, 8, 8), out.shape
    assert bool(jnp.all(jnp.isfinite(out)))

    ref = jax.block_until_ready(stem_reference(x, params))
    max_err = float(jnp.max(jnp.abs(out - ref)))
    assert max_err < 1e-2, f"max abs error vs reference: {max_err}"

    print("KERNEL_OK")
</pallas_src>

<mosaic_0001>
module attributes {stable_mosaic.version = 11 : i64} {
  func.func @_mm_relu_stats_kernel(%arg0: i32, %arg1: memref<128x32xbf16, #tpu.memory_space<vmem>>, %arg2: memref<32x32xbf16, #tpu.memory_space<vmem>>, %arg3: memref<128x32xf32, #tpu.memory_space<vmem>>, %arg4: memref<1x32xf32, #tpu.memory_space<vmem>>, %arg5: memref<1x32xf32, #tpu.memory_space<vmem>>) attributes {dimension_semantics = [#tpu.dimension_semantics<arbitrary>], iteration_bounds = array<i64: 1>, scalar_prefetch = 0 : i64, scratch_operands = 0 : i64, tpu.core_type = #tpu.core_type<tc>, window_params = [{transform_indices = @transform_0, window_bounds = array<i64: 128, 32>}, {pipeline_mode = #tpu.pipeline_mode<synchronous>, transform_indices = @transform_1, window_bounds = array<i64: 32, 32>}, {transform_indices = @transform_2, window_bounds = array<i64: 128, 32>}, {pipeline_mode = #tpu.pipeline_mode<synchronous>, transform_indices = @transform_3, window_bounds = array<i64: 1, 32>}, {pipeline_mode = #tpu.pipeline_mode<synchronous>, transform_indices = @transform_4, window_bounds = array<i64: 1, 32>}]} {
    %c0_i32 = arith.constant 0 : i32
    %0 = arith.cmpi eq, %arg0, %c0_i32 : i32
    %1 = arith.extui %0 : i1 to i32
    %c0_i32_0 = arith.constant 0 : i32
    %2 = arith.cmpi ne, %1, %c0_i32_0 : i32
    scf.if %2 {
      %cst_17 = arith.constant 0.000000e+00 : f32
      %20 = vector.broadcast %cst_17 : f32 to vector<1x32xf32>
      %c0_18 = arith.constant 0 : index
      %c0_19 = arith.constant 0 : index
      %21 = vector.load %arg4[%c0_18, %c0_19] : memref<1x32xf32, #tpu.memory_space<vmem>>, vector<1x32xf32>
      tpu.vector_store %arg4[%c0_18, %c0_19], %20 {strides = array<i32>} : memref<1x32xf32, #tpu.memory_space<vmem>>, vector<1x32xf32>,
      %cst_20 = arith.constant 0.000000e+00 : f32
      %22 = vector.broadcast %cst_20 : f32 to vector<1x32xf32>
      %c0_21 = arith.constant 0 : index
      %c0_22 = arith.constant 0 : index
      %23 = vector.load %arg5[%c0_21, %c0_22] : memref<1x32xf32, #tpu.memory_space<vmem>>, vector<1x32xf32>
      tpu.vector_store %arg5[%c0_21, %c0_22], %22 {strides = array<i32>} : memref<1x32xf32, #tpu.memory_space<vmem>>, vector<1x32xf32>,
    } else {
    }
    %c0 = arith.constant 0 : index
    %c0_1 = arith.constant 0 : index
    %3 = vector.load %arg1[%c0, %c0_1] : memref<128x32xbf16, #tpu.memory_space<vmem>>, vector<128x32xbf16>
    %c0_2 = arith.constant 0 : index
    %c0_3 = arith.constant 0 : index
    %4 = vector.load %arg2[%c0_2, %c0_3] : memref<32x32xbf16, #tpu.memory_space<vmem>>, vector<32x32xbf16>
    %cst = arith.constant dense<0.000000e+00> : vector<128x32xf32>
    %5 = tpu.matmul %3, %4, %cst {dimension_numbers = #tpu.dot_dimension_numbers<[1], [0], [0], [1], [0, 0, 1, 1], [], []>} : vector<128x32xbf16>, vector<32x32xbf16>, vector<128x32xf32> -> vector<128x32xf32>
    %cst_4 = arith.constant 0.000000e+00 : f32
    %6 = vector.broadcast %cst_4 : f32 to vector<128x32xf32>
    %7 = arith.maximumf %5, %6 : vector<128x32xf32>
    %c0_5 = arith.constant 0 : index
    %c0_6 = arith.constant 0 : index
    %8 = vector.load %arg3[%c0_5, %c0_6] : memref<128x32xf32, #tpu.memory_space<vmem>>, vector<128x32xf32>
    tpu.vector_store %arg3[%c0_5, %c0_6], %7 {strides = array<i32>} : memref<128x32xf32, #tpu.memory_space<vmem>>, vector<128x32xf32>,
    %c0_7 = arith.constant 0 : index
    %c0_8 = arith.constant 0 : index
    %9 = vector.load %arg4[%c0_7, %c0_8] : memref<1x32xf32, #tpu.memory_space<vmem>>, vector<1x32xf32>
    %cst_9 = arith.constant dense<0.000000e+00> : vector<32xf32>
    %10 = vector.multi_reduction <add>, %7, %cst_9 [0] : vector<128x32xf32> to vector<32xf32>
    %11 = vector.shape_cast %10 : vector<32xf32> to vector<1x32xf32>
    %12 = arith.addf %9, %11 : vector<1x32xf32>
    %c0_10 = arith.constant 0 : index
    %c0_11 = arith.constant 0 : index
    %13 = vector.load %arg4[%c0_10, %c0_11] : memref<1x32xf32, #tpu.memory_space<vmem>>, vector<1x32xf32>
    tpu.vector_store %arg4[%c0_10, %c0_11], %12 {strides = array<i32>} : memref<1x32xf32, #tpu.memory_space<vmem>>, vector<1x32xf32>,
    %c0_12 = arith.constant 0 : index
    %c0_13 = arith.constant 0 : index
    %14 = vector.load %arg5[%c0_12, %c0_13] : memref<1x32xf32, #tpu.memory_space<vmem>>, vector<1x32xf32>
    %15 = arith.mulf %7, %7 : vector<128x32xf32>
    %cst_14 = arith.constant dense<0.000000e+00> : vector<32xf32>
    %16 = vector.multi_reduction <add>, %15, %cst_14 [0] : vector<128x32xf32> to vector<32xf32>
    %17 = vector.shape_cast %16 : vector<32xf32> to vector<1x32xf32>
    %18 = arith.addf %14, %17 : vector<1x32xf32>
    %c0_15 = arith.constant 0 : index
    %c0_16 = arith.constant 0 : index
    %19 = vector.load %arg5[%c0_15, %c0_16] : memref<1x32xf32, #tpu.memory_space<vmem>>, vector<1x32xf32>
    tpu.vector_store %arg5[%c0_15, %c0_16], %18 {strides = array<i32>} : memref<1x32xf32, #tpu.memory_space<vmem>>, vector<1x32xf32>,
    return
  }
  func.func @transform_0(%arg0: i32) -> (i32, i32) {
    %c0_i32 = arith.constant 0 : i32
    %c0_i32_0 = arith.constant 0 : i32
    return %arg0, %c0_i32 : i32, i32
  }
  func.func @transform_1(%arg0: i32) -> (i32, i32) {
    %c0_i32 = arith.constant 0 : i32
    %c0_i32_0 = arith.constant 0 : i32
    %c0_i32_1 = arith.constant 0 : i32
    return %c0_i32, %c0_i32_0 : i32, i32
  }
  func.func @transform_2(%arg0: i32) -> (i32, i32) {
    %c0_i32 = arith.constant 0 : i32
    %c0_i32_0 = arith.constant 0 : i32
    return %arg0, %c0_i32 : i32, i32
  }
  func.func @transform_3(%arg0: i32) -> (i32, i32) {
    %c0_i32 = arith.constant 0 : i32
    %c0_i32_0 = arith.constant 0 : i32
    %c0_i32_1 = arith.constant 0 : i32
    return %c0_i32, %c0_i32_0 : i32, i32
  }
  func.func @transform_4(%arg0: i32) -> (i32, i32) {
    %c0_i32 = arith.constant 0 : i32
    %c0_i32_0 = arith.constant 0 : i32
    %c0_i32_1 = arith.constant 0 : i32
    return %c0_i32, %c0_i32_0 : i32, i32
  }
}

module attributes {stable_mosaic.version = 11 : i64} {
  func.func @_bn_gelu_kernel(%arg0: i32, %arg1: memref<32x128xf32, #tpu.memory_space<vmem>>, %arg2: memref<1x128xf32, #tpu.memory_space<vmem>>, %arg3: memref<1x128xf32, #tpu.memory_space<vmem>>, %arg4: memref<32x128xf32, #tpu.memory_space<vmem>>) attributes {dimension_semantics = [#tpu.dimension_semantics<parallel>], iteration_bounds = array<i64: 1>, scalar_prefetch = 0 : i64, scratch_operands = 0 : i64, tpu.core_type = #tpu.core_type<tc>, window_params = [{transform_indices = @transform_0, window_bounds = array<i64: 32, 128>}, {pipeline_mode = #tpu.pipeline_mode<synchronous>, transform_indices = @transform_1, window_bounds = array<i64: 1, 128>}, {pipeline_mode = #tpu.pipeline_mode<synchronous>, transform_indices = @transform_2, window_bounds = array<i64: 1, 128>}, {transform_indices = @transform_3, window_bounds = array<i64: 32, 128>}]} {
    %c0 = arith.constant 0 : index
    %c0_0 = arith.constant 0 : index
    %0 = vector.load %arg1[%c0, %c0_0] : memref<32x128xf32, #tpu.memory_space<vmem>>, vector<32x128xf32>
    %c0_1 = arith.constant 0 : index
    %c0_2 = arith.constant 0 : index
    %1 = vector.load %arg2[%c0_1, %c0_2] : memref<1x128xf32, #tpu.memory_space<vmem>>, vector<1x128xf32>
    %2 = vector.broadcast %1 : vector<1x128xf32> to vector<32x128xf32>
    %3 = arith.mulf %0, %2 : vector<32x128xf32>
    %c0_3 = arith.constant 0 : index
    %c0_4 = arith.constant 0 : index
    %4 = vector.load %arg3[%c0_3, %c0_4] : memref<1x128xf32, #tpu.memory_space<vmem>>, vector<1x128xf32>
    %5 = vector.broadcast %4 : vector<1x128xf32> to vector<32x128xf32>
    %6 = arith.addf %3, %5 : vector<32x128xf32>
    %cst = arith.constant 5.000000e-01 : f32
    %7 = vector.broadcast %cst : f32 to vector<32x128xf32>
    %8 = arith.mulf %6, %7 : vector<32x128xf32>
    %cst_5 = arith.constant 0.707106769 : f32
    %9 = vector.broadcast %cst_5 : f32 to vector<32x128xf32>
    %10 = arith.mulf %6, %9 : vector<32x128xf32>
    %11 = math.erf %10 : vector<32x128xf32>
    %cst_6 = arith.constant 1.000000e+00 : f32
    %12 = vector.broadcast %cst_6 : f32 to vector<32x128xf32>
    %13 = arith.addf %12, %11 : vector<32x128xf32>
    %14 = arith.mulf %8, %13 : vector<32x128xf32>
    %c0_7 = arith.constant 0 : index
    %c0_8 = arith.constant 0 : index
    %15 = vector.load %arg4[%c0_7, %c0_8] : memref<32x128xf32, #tpu.memory_space<vmem>>, vector<32x128xf32>
    tpu.vector_store %arg4[%c0_7, %c0_8], %14 {strides = array<i32>} : memref<32x128xf32, #tpu.memory_space<vmem>>, vector<32x128xf32>,
    return
  }
  func.func @transform_0(%arg0: i32) -> (i32, i32) {
    %c0_i32 = arith.constant 0 : i32
    %c0_i32_0 = arith.constant 0 : i32
    return %arg0, %c0_i32 : i32, i32
  }
  func.func @transform_1(%arg0: i32) -> (i32, i32) {
    %c0_i32 = arith.constant 0 : i32
    %c0_i32_0 = arith.constant 0 : i32
    %c0_i32_1 = arith.constant 0 : i32
    return %c0_i32, %c0_i32_0 : i32, i32
  }
  func.func @transform_2(%arg0: i32) -> (i32, i32) {
    %c0_i32 = arith.constant 0 : i32
    %c0_i32_0 = arith.constant 0 : i32
    %c0_i32_1 = arith.constant 0 : i32
    return %c0_i32, %c0_i32_0 : i32, i32
  }
  func.func @transform_3(%arg0: i32) -> (i32, i32) {
    %c0_i32 = arith.constant 0 : i32
    %c0_i32_0 = arith.constant 0 : i32
    return %arg0, %c0_i32 : i32, i32
  }
}

module attributes {stable_mosaic.version = 11 : i64} {
  func.func @_conv3x3_relu_stats_kernel(%arg0: i32, %arg1: i32, %arg2: memref<1x1x110x32xbf16, #tpu.memory_space<vmem>>, %arg3: memref<9x32x32xbf16, #tpu.memory_space<vmem>>, %arg4: memref<1x80x1xf32, #tpu.memory_space<vmem>>, %arg5: memref<1x1x80x32xf32, #tpu.memory_space<vmem>>, %arg6: memref<1x32xf32, #tpu.memory_space<vmem>>, %arg7: memref<1x32xf32, #tpu.memory_space<vmem>>) attributes {dimension_semantics = [#tpu.dimension_semantics<arbitrary>, #tpu.dimension_semantics<arbitrary>], iteration_bounds = array<i64: 2, 1>, scalar_prefetch = 0 : i64, scratch_operands = 0 : i64, tpu.core_type = #tpu.core_type<tc>, window_params = [{transform_indices = @transform_0, window_bounds = array<i64: 1, 1, 110, 32>}, {pipeline_mode = #tpu.pipeline_mode<synchronous>, transform_indices = @transform_1, window_bounds = array<i64: 9, 32, 32>}, {transform_indices = @transform_2, window_bounds = array<i64: 1, 80, 1>}, {transform_indices = @transform_3, window_bounds = array<i64: 1, 1, 80, 32>}, {pipeline_mode = #tpu.pipeline_mode<synchronous>, transform_indices = @transform_4, window_bounds = array<i64: 1, 32>}, {pipeline_mode = #tpu.pipeline_mode<synchronous>, transform_indices = @transform_5, window_bounds = array<i64: 1, 32>}]} {
    %c0_i32 = arith.constant 0 : i32
    %0 = arith.cmpi eq, %arg0, %c0_i32 : i32
    %c0_i32_0 = arith.constant 0 : i32
    %1 = arith.cmpi eq, %arg1, %c0_i32_0 : i32
    %2 = arith.andi %0, %1 : i1
    %3 = arith.extui %2 : i1 to i32
    %c0_i32_1 = arith.constant 0 : i32
    %4 = arith.cmpi ne, %3, %c0_i32_1 : i32
    scf.if %4 {
      %cst_148 = arith.constant 0.000000e+00 : f32
      %123 = vector.broadcast %cst_148 : f32 to vector<1x32xf32>
      %c0_149 = arith.constant 0 : index
      %c0_150 = arith.constant 0 : index
      %124 = vector.load %arg6[%c0_149, %c0_150] : memref<1x32xf32, #tpu.memory_space<vmem>>, vector<1x32xf32>
      tpu.vector_store %arg6[%c0_149, %c0_150], %123 {strides = array<i32>} : memref<1x32xf32, #tpu.memory_space<vmem>>, vector<1x32xf32>,
      %cst_151 = arith.constant 0.000000e+00 : f32
      %125 = vector.broadcast %cst_151 : f32 to vector<1x32xf32>
      %c0_152 = arith.constant 0 : index
      %c0_153 = arith.constant 0 : index
      %126 = vector.load %arg7[%c0_152, %c0_153] : memref<1x32xf32, #tpu.memory_space<vmem>>, vector<1x32xf32>
      tpu.vector_store %arg7[%c0_152, %c0_153], %125 {strides = array<i32>} : memref<1x32xf32, #tpu.memory_space<vmem>>, vector<1x32xf32>,
    } else {
    }
    %c0 = arith.constant 0 : index
    %c0_2 = arith.constant 0 : index
    %c0_3 = arith.constant 0 : index
    %c0_4 = arith.constant 0 : index
    %5 = vector.load %arg2[%c0, %c0_2, %c0_3, %c0_4] : memref<1x1x110x32xbf16, #tpu.memory_space<vmem>>, vector<1x1x80x32xbf16>
    %6 = vector.shape_cast %5 : vector<1x1x80x32xbf16> to vector<80x32xbf16>
    %c0_5 = arith.constant 0 : index
    %c0_6 = arith.constant 0 : index
    %c0_7 = arith.constant 0 : index
    %7 = vector.load %arg3[%c0_5, %c0_6, %c0_7] : memref<9x32x32xbf16, #tpu.memory_space<vmem>>, vector<1x32x32xbf16>
    %8 = vector.shape_cast %7 : vector<1x32x32xbf16> to vector<32x32xbf16>
    %cst = arith.constant dense<0.000000e+00> : vector<80x32xf32>
    %9 = tpu.matmul %6, %8, %cst {dimension_numbers = #tpu.dot_dimension_numbers<[1], [0], [0], [1], [0, 0, 1, 1], [], []>} : vector<80x32xbf16>, vector<32x32xbf16>, vector<80x32xf32> -> vector<80x32xf32>
    %c0_8 = arith.constant 0 : index
    %c0_9 = arith.constant 0 : index
    %c0_10 = arith.constant 0 : index
    %c0_11 = arith.constant 0 : index
    %10 = vector.load %arg5[%c0_8, %c0_9, %c0_10, %c0_11] : memref<1x1x80x32xf32, #tpu.memory_space<vmem>>, vector<1x1x80x32xf32>
    %11 = vector.shape_cast %10 : vector<1x1x80x32xf32> to vector<80x32xf32>
    %12 = vector.shape_cast %9 : vector<80x32xf32> to vector<1x1x80x32xf32>
    tpu.vector_store %arg5[%c0_8, %c0_9, %c0_10, %c0_11], %12 {strides = array<i32>} : memref<1x1x80x32xf32, #tpu.memory_space<vmem>>, vector<1x1x80x32xf32>,
    %c0_12 = arith.constant 0 : index
    %c0_13 = arith.constant 0 : index
    %c0_14 = arith.constant 0 : index
    %c0_15 = arith.constant 0 : index
    %13 = vector.load %arg5[%c0_12, %c0_13, %c0_14, %c0_15] : memref<1x1x80x32xf32, #tpu.memory_space<vmem>>, vector<1x1x80x32xf32>
    %14 = vector.shape_cast %13 : vector<1x1x80x32xf32> to vector<80x32xf32>
    %c0_16 = arith.constant 0 : index
    %c0_17 = arith.constant 0 : index
    %c1 = arith.constant 1 : index
    %c0_18 = arith.constant 0 : index
    %15 = vector.load %arg2[%c0_16, %c0_17, %c1, %c0_18] : memref<1x1x110x32xbf16, #tpu.memory_space<vmem>>, vector<1x1x80x32xbf16>
    %16 = vector.shape_cast %15 : vector<1x1x80x32xbf16> to vector<80x32xbf16>
    %c1_19 = arith.constant 1 : index
    %c0_20 = arith.constant 0 : index
    %c0_21 = arith.constant 0 : index
    %17 = vector.load %arg3[%c1_19, %c0_20, %c0_21] : memref<9x32x32xbf16, #tpu.memory_space<vmem>>, vector<1x32x32xbf16>
    %18 = vector.shape_cast %17 : vector<1x32x32xbf16> to vector<32x32xbf16>
    %cst_22 = arith.constant dense<0.000000e+00> : vector<80x32xf32>
    %19 = tpu.matmul %16, %18, %cst_22 {dimension_numbers = #tpu.dot_dimension_numbers<[1], [0], [0], [1], [0, 0, 1, 1], [], []>} : vector<80x32xbf16>, vector<32x32xbf16>, vector<80x32xf32> -> vector<80x32xf32>
    %20 = arith.addf %14, %19 : vector<80x32xf32>
    %c0_23 = arith.constant 0 : index
    %c0_24 = arith.constant 0 : index
    %c0_25 = arith.constant 0 : index
    %c0_26 = arith.constant 0 : index
    %21 = vector.load %arg5[%c0_23, %c0_24, %c0_25, %c0_26] : memref<1x1x80x32xf32, #tpu.memory_space<vmem>>, vector<1x1x80x32xf32>
    %22 = vector.shape_cast %21 : vector<1x1x80x32xf32> to vector<80x32xf32>
    %23 = vector.shape_cast %20 : vector<80x32xf32> to vector<1x1x80x32xf32>
    tpu.vector_store %arg5[%c0_23, %c0_24, %c0_25, %c0_26], %23 {strides = array<i32>} : memref<1x1x80x32xf32, #tpu.memory_space<vmem>>, vector<1x1x80x32xf32>,
    %c0_27 = arith.constant 0 : index
    %c0_28 = arith.constant 0 : index
    %c0_29 = arith.constant 0 : index
    %c0_30 = arith.constant 0 : index
    %24 = vector.load %arg5[%c0_27, %c0_28, %c0_29, %c0_30] : memref<1x1x80x32xf32, #tpu.memory_space<vmem>>, vector<1x1x80x32xf32>
    %25 = vector.shape_cast %24 : vector<1x1x80x32xf32> to vector<80x32xf32>
    %c0_31 = arith.constant 0 : index
    %c0_32 = arith.constant 0 : index
    %c2 = arith.constant 2 : index
    %c0_33 = arith.constant 0 : index
    %26 = vector.load %arg2[%c0_31, %c0_32, %c2, %c0_33] : memref<1x1x110x32xbf16, #tpu.memory_space<vmem>>, vector<1x1x80x32xbf16>
    %27 = vector.shape_cast %26 : vector<1x1x80x32xbf16> to vector<80x32xbf16>
    %c2_34 = arith.constant 2 : index
    %c0_35 = arith.constant 0 : index
    %c0_36 = arith.constant 0 : index
    %28 = vector.load %arg3[%c2_34, %c0_35, %c0_36] : memref<9x32x32xbf16, #tpu.memory_space<vmem>>, vector<1x32x32xbf16>
    %29 = vector.shape_cast %28 : vector<1x32x32xbf16> to vector<32x32xbf16>
    %cst_37 = arith.constant dense<0.000000e+00> : vector<80x32xf32>
    %30 = tpu.matmul %27, %29, %cst_37 {dimension_numbers = #tpu.dot_dimension_numbers<[1], [0], [0], [1], [0, 0, 1, 1], [], []>} : vector<80x32xbf16>, vector<32x32xbf16>, vector<80x32xf32> -> vector<80x32xf32>
    %31 = arith.addf %25, %30 : vector<80x32xf32>
    %c0_38 = arith.constant 0 : index
    %c0_39 = arith.constant 0 : index
    %c0_40 = arith.constant 0 : index
    %c0_41 = arith.constant 0 : index
    %32 = vector.load %arg5[%c0_38, %c0_39, %c0_40, %c0_41] : memref<1x1x80x32xf32, #tpu.memory_space<vmem>>, vector<1x1x80x32xf32>
    %33 = vector.shape_cast %32 : vector<1x1x80x32xf32> to vector<80x32xf32>
    %34 = vector.shape_cast %31 : vector<80x32xf32> to vector<1x1x80x32xf32>
    tpu.vector_store %arg5[%c0_38, %c0_39, %c0_40, %c0_41], %34 {strides = array<i32>} : memref<1x1x80x32xf32, #tpu.memory_space<vmem>>, vector<1x1x80x32xf32>,
    %c0_42 = arith.constant 0 : index
    %c0_43 = arith.constant 0 : index
    %c0_44 = arith.constant 0 : index
    %c0_45 = arith.constant 0 : index
    %35 = vector.load %arg5[%c0_42, %c0_43, %c0_44, %c0_45] : memref<1x1x80x32xf32, #tpu.memory_space<vmem>>, vector<1x1x80x32xf32>
    %36 = vector.shape_cast %35 : vector<1x1x80x32xf32> to vector<80x32xf32>
    %c0_46 = arith.constant 0 : index
    %c0_47 = arith.constant 0 : index
    %c10 = arith.constant 10 : index
    %c0_48 = arith.constant 0 : index
    %37 = vector.load %arg2[%c0_46, %c0_47, %c10, %c0_48] : memref<1x1x110x32xbf16, #tpu.memory_space<vmem>>, vector<1x1x80x32xbf16>
    %38 = vector.shape_cast %37 : vector<1x1x80x32xbf16> to vector<80x32xbf16>
    %c3 = arith.constant 3 : index
    %c0_49 = arith.constant 0 : index
    %c0_50 = arith.constant 0 : index
    %39 = vector.load %arg3[%c3, %c0_49, %c0_50] : memref<9x32x32xbf16, #tpu.memory_space<vmem>>, vector<1x32x32xbf16>
    %40 = vector.shape_cast %39 : vector<1x32x32xbf16> to vector<32x32xbf16>
    %cst_51 = arith.constant dense<0.000000e+00> : vector<80x32xf32>
    %41 = tpu.matmul %38, %40, %cst_51 {dimension_numbers = #tpu.dot_dimension_numbers<[1], [0], [0], [1], [0, 0, 1, 1], [], []>} : vector<80x32xbf16>, vector<32x32xbf16>, vector<80x32xf32> -> vector<80x32xf32>
    %42 = arith.addf %36, %41 : vector<80x32xf32>
    %c0_52 = arith.constant 0 : index
    %c0_53 = arith.constant 0 : index
    %c0_54 = arith.constant 0 : index
    %c0_55 = arith.constant 0 : index
    %43 = vector.load %arg5[%c0_52, %c0_53, %c0_54, %c0_55] : memref<1x1x80x32xf32, #tpu.memory_space<vmem>>, vector<1x1x80x32xf32>
    %44 = vector.shape_cast %43 : vector<1x1x80x32xf32> to vector<80x32xf32>
    %45 = vector.shape_cast %42 : vector<80x32xf32> to vector<1x1x80x32xf32>
    tpu.vector_store %arg5[%c0_52, %c0_53, %c0_54, %c0_55], %45 {strides = array<i32>} : memref<1x1x80x32xf32, #tpu.memory_space<vmem>>, vector<1x1x80x32xf32>,
    %c0_56 = arith.constant 0 : index
    %c0_57 = arith.constant 0 : index
    %c0_58 = arith.constant 0 : index
    %c0_59 = arith.constant 0 : index
    %46 = vector.load %arg5[%c0_56, %c0_57, %c0_58, %c0_59] : memref<1x1x80x32xf32, #tpu.memory_space<vmem>>, vector<1x1x80x32xf32>
    %47 = vector.shape_cast %46 : vector<1x1x80x32xf32> to vector<80x32xf32>
    %c0_60 = arith.constant 0 : index
    %c0_61 = arith.constant 0 : index
    %c11 = arith.constant 11 : index
    %c0_62 = arith.constant 0 : index
    %48 = vector.load %arg2[%c0_60, %c0_61, %c11, %c0_62] : memref<1x1x110x32xbf16, #tpu.memory_space<vmem>>, vector<1x1x80x32xbf16>
    %49 = vector.shape_cast %48 : vector<1x1x80x32xbf16> to vector<80x32xbf16>
    %c4 = arith.constant 4 : index
    %c0_63 = arith.constant 0 : index
    %c0_64 = arith.constant 0 : index
    %50 = vector.load %arg3[%c4, %c0_63, %c0_64] : memref<9x32x32xbf16, #tpu.memory_space<vmem>>, vector<1x32x32xbf16>
    %51 = vector.shape_cast %50 : vector<1x32x32xbf16> to vector<32x32xbf16>
    %cst_65 = arith.constant dense<0.000000e+00> : vector<80x32xf32>
    %52 = tpu.matmul %49, %51, %cst_65 {dimension_numbers = #tpu.dot_dimension_numbers<[1], [0], [0], [1], [0, 0, 1, 1], [], []>} : vector<80x32xbf16>, vector<32x32xbf16>, vector<80x32xf32> -> vector<80x32xf32>
    %53 = arith.addf %47, %52 : vector<80x32xf32>
    %c0_66 = arith.constant 0 : index
    %c0_67 = arith.constant 0 : index
    %c0_68 = arith.constant 0 : index
    %c0_69 = arith.constant 0 : index
    %54 = vector.load %arg5[%c0_66, %c0_67, %c0_68, %c0_69] : memref<1x1x80x32xf32, #tpu.memory_space<vmem>>, vector<1x1x80x32xf32>
    %55 = vector.shape_cast %54 : vector<1x1x80x32xf32> to vector<80x32xf32>
    %56 = vector.shape_cast %53 : vector<80x32xf32> to vector<1x1x80x32xf32>
    tpu.vector_store %arg5[%c0_66, %c0_67, %c0_68, %c0_69], %56 {strides = array<i32>} : memref<1x1x80x32xf32, #tpu.memory_space<vmem>>, vector<1x1x80x32xf32>,
    %c0_70 = arith.constant 0 : index
    %c0_71 = arith.constant 0 : index
    %c0_72 = arith.constant 0 : index
    %c0_73 = arith.constant 0 : index
    %57 = vector.load %arg5[%c0_70, %c0_71, %c0_72, %c0_73] : memref<1x1x80x32xf32, #tpu.memory_space<vmem>>, vector<1x1x80x32xf32>
    %58 = vector.shape_cast %57 : vector<1x1x80x32xf32> to vector<80x32xf32>
    %c0_74 = arith.constant 0 : index
    %c0_75 = arith.constant 0 : index
    %c12 = arith.constant 12 : index
    %c0_76 = arith.constant 0 : index
    %59 = vector.load %arg2[%c0_74, %c0_75, %c12, %c0_76] : memref<1x1x110x32xbf16, #tpu.memory_space<vmem>>, vector<1x1x80x32xbf16>
    %60 = vector.shape_cast %59 : vector<1x1x80x32xbf16> to vector<80x32xbf16>
    %c5 = arith.constant 5 : index
    %c0_77 = arith.constant 0 : index
    %c0_78 = arith.constant 0 : index
    %61 = vector.load %arg3[%c5, %c0_77, %c0_78] : memref<9x32x32xbf16, #tpu.memory_space<vmem>>, vector<1x32x32xbf16>
    %62 = vector.shape_cast %61 : vector<1x32x32xbf16> to vector<32x32xbf16>
    %cst_79 = arith.constant dense<0.000000e+00> : vector<80x32xf32>
    %63 = tpu.matmul %60, %62, %cst_79 {dimension_numbers = #tpu.dot_dimension_numbers<[1], [0], [0], [1], [0, 0, 1, 1], [], []>} : vector<80x32xbf16>, vector<32x32xbf16>, vector<80x32xf32> -> vector<80x32xf32>
    %64 = arith.addf %58, %63 : vector<80x32xf32>
    %c0_80 = arith.constant 0 : index
    %c0_81 = arith.constant 0 : index
    %c0_82 = arith.constant 0 : index
    %c0_83 = arith.constant 0 : index
    %65 = vector.load %arg5[%c0_80, %c0_81, %c0_82, %c0_83] : memref<1x1x80x32xf32, #tpu.memory_space<vmem>>, vector<1x1x80x32xf32>
    %66 = vector.shape_cast %65 : vector<1x1x80x32xf32> to vector<80x32xf32>
    %67 = vector.shape_cast %64 : vector<80x32xf32> to vector<1x1x80x32xf32>
    tpu.vector_store %arg5[%c0_80, %c0_81, %c0_82, %c0_83], %67 {strides = array<i32>} : memref<1x1x80x32xf32, #tpu.memory_space<vmem>>, vector<1x1x80x32xf32>,
    %c0_84 = arith.constant 0 : index
    %c0_85 = arith.constant 0 : index
    %c0_86 = arith.constant 0 : index
    %c0_87 = arith.constant 0 : index
    %68 = vector.load %arg5[%c0_84, %c0_85, %c0_86, %c0_87] : memref<1x1x80x32xf32, #tpu.memory_space<vmem>>, vector<1x1x80x32xf32>
    %69 = vector.shape_cast %68 : vector<1x1x80x32xf32> to vector<80x32xf32>
    %c0_88 = arith.constant 0 : index
    %c0_89 = arith.constant 0 : index
    %c20 = arith.constant 20 : index
    %c0_90 = arith.constant 0 : index
    %70 = vector.load %arg2[%c0_88, %c0_89, %c20, %c0_90] : memref<1x1x110x32xbf16, #tpu.memory_space<vmem>>, vector<1x1x80x32xbf16>
    %71 = vector.shape_cast %70 : vector<1x1x80x32xbf16> to vector<80x32xbf16>
    %c6 = arith.constant 6 : index
    %c0_91 = arith.constant 0 : index
    %c0_92 = arith.constant 0 : index
    %72 = vector.load %arg3[%c6, %c0_91, %c0_92] : memref<9x32x32xbf16, #tpu.memory_space<vmem>>, vector<1x32x32xbf16>
    %73 = vector.shape_cast %72 : vector<1x32x32xbf16> to vector<32x32xbf16>
    %cst_93 = arith.constant dense<0.000000e+00> : vector<80x32xf32>
    %74 = tpu.matmul %71, %73, %cst_93 {dimension_numbers = #tpu.dot_dimension_numbers<[1], [0], [0], [1], [0, 0, 1, 1], [], []>} : vector<80x32xbf16>, vector<32x32xbf16>, vector<80x32xf32> -> vector<80x32xf32>
    %75 = arith.addf %69, %74 : vector<80x32xf32>
    %c0_94 = arith.constant 0 : index
    %c0_95 = arith.constant 0 : index
    %c0_96 = arith.constant 0 : index
    %c0_97 = arith.constant 0 : index
    %76 = vector.load %arg5[%c0_94, %c0_95, %c0_96, %c0_97] : memref<1x1x80x32xf32, #tpu.memory_space<vmem>>, vector<1x1x80x32xf32>
    %77 = vector.shape_cast %76 : vector<1x1x80x32xf32> to vector<80x32xf32>
    %78 = vector.shape_cast %75 : vector<80x32xf32> to vector<1x1x80x32xf32>
    tpu.vector_store %arg5[%c0_94, %c0_95, %c0_96, %c0_97], %78 {strides = array<i32>} : memref<1x1x80x32xf32, #tpu.memory_space<vmem>>, vector<1x1x80x32xf32>,
    %c0_98 = arith.constant 0 : index
    %c0_99 = arith.constant 0 : index
    %c0_100 = arith.constant 0 : index
    %c0_101 = arith.constant 0 : index
    %79 = vector.load %arg5[%c0_98, %c0_99, %c0_100, %c0_101] : memref<1x1x80x32xf32, #tpu.memory_space<vmem>>, vector<1x1x80x32xf32>
    %80 = vector.shape_cast %79 : vector<1x1x80x32xf32> to vector<80x32xf32>
    %c0_102 = arith.constant 0 : index
    %c0_103 = arith.constant 0 : index
    %c21 = arith.constant 21 : index
    %c0_104 = arith.constant 0 : index
    %81 = vector.load %arg2[%c0_102, %c0_103, %c21, %c0_104] : memref<1x1x110x32xbf16, #tpu.memory_space<vmem>>, vector<1x1x80x32xbf16>
    %82 = vector.shape_cast %81 : vector<1x1x80x32xbf16> to vector<80x32xbf16>
    %c7 = arith.constant 7 : index
    %c0_105 = arith.constant 0 : index
    %c0_106 = arith.constant 0 : index
    %83 = vector.load %arg3[%c7, %c0_105, %c0_106] : memref<9x32x32xbf16, #tpu.memory_space<vmem>>, vector<1x32x32xbf16>
    %84 = vector.shape_cast %83 : vector<1x32x32xbf16> to vector<32x32xbf16>
    %cst_107 = arith.constant dense<0.000000e+00> : vector<80x32xf32>
    %85 = tpu.matmul %82, %84, %cst_107 {dimension_numbers = #tpu.dot_dimension_numbers<[1], [0], [0], [1], [0, 0, 1, 1], [], []>} : vector<80x32xbf16>, vector<32x32xbf16>, vector<80x32xf32> -> vector<80x32xf32>
    %86 = arith.addf %80, %85 : vector<80x32xf32>
    %c0_108 = arith.constant 0 : index
    %c0_109 = arith.constant 0 : index
    %c0_110 = arith.constant 0 : index
    %c0_111 = arith.constant 0 : index
    %87 = vector.load %arg5[%c0_108, %c0_109, %c0_110, %c0_111] : memref<1x1x80x32xf32, #tpu.memory_space<vmem>>, vector<1x1x80x32xf32>
    %88 = vector.shape_cast %87 : vector<1x1x80x32xf32> to vector<80x32xf32>
    %89 = vector.shape_cast %86 : vector<80x32xf32> to vector<1x1x80x32xf32>
    tpu.vector_store %arg5[%c0_108, %c0_109, %c0_110, %c0_111], %89 {strides = array<i32>} : memref<1x1x80x32xf32, #tpu.memory_space<vmem>>, vector<1x1x80x32xf32>,
    %c0_112 = arith.constant 0 : index
    %c0_113 = arith.constant 0 : index
    %c0_114 = arith.constant 0 : index
    %c0_115 = arith.constant 0 : index
    %90 = vector.load %arg5[%c0_112, %c0_113, %c0_114, %c0_115] : memref<1x1x80x32xf32, #tpu.memory_space<vmem>>, vector<1x1x80x32xf32>
    %91 = vector.shape_cast %90 : vector<1x1x80x32xf32> to vector<80x32xf32>
    %c0_116 = arith.constant 0 : index
    %c0_117 = arith.constant 0 : index
    %c22 = arith.constant 22 : index
    %c0_118 = arith.constant 0 : index
    %92 = vector.load %arg2[%c0_116, %c0_117, %c22, %c0_118] : memref<1x1x110x32xbf16, #tpu.memory_space<vmem>>, vector<1x1x80x32xbf16>
    %93 = vector.shape_cast %92 : vector<1x1x80x32xbf16> to vector<80x32xbf16>
    %c8 = arith.constant 8 : index
    %c0_119 = arith.constant 0 : index
    %c0_120 = arith.constant 0 : index
    %94 = vector.load %arg3[%c8, %c0_119, %c0_120] : memref<9x32x32xbf16, #tpu.memory_space<vmem>>, vector<1x32x32xbf16>
    %95 = vector.shape_cast %94 : vector<1x32x32xbf16> to vector<32x32xbf16>
    %cst_121 = arith.constant dense<0.000000e+00> : vector<80x32xf32>
    %96 = tpu.matmul %93, %95, %cst_121 {dimension_numbers = #tpu.dot_dimension_numbers<[1], [0], [0], [1], [0, 0, 1, 1], [], []>} : vector<80x32xbf16>, vector<32x32xbf16>, vector<80x32xf32> -> vector<80x32xf32>
    %97 = arith.addf %91, %96 : vector<80x32xf32>
    %c0_122 = arith.constant 0 : index
    %c0_123 = arith.constant 0 : index
    %c0_124 = arith.constant 0 : index
    %c0_125 = arith.constant 0 : index
    %98 = vector.load %arg5[%c0_122, %c0_123, %c0_124, %c0_125] : memref<1x1x80x32xf32, #tpu.memory_space<vmem>>, vector<1x1x80x32xf32>
    %99 = vector.shape_cast %98 : vector<1x1x80x32xf32> to vector<80x32xf32>
    %100 = vector.shape_cast %97 : vector<80x32xf32> to vector<1x1x80x32xf32>
    tpu.vector_store %arg5[%c0_122, %c0_123, %c0_124, %c0_125], %100 {strides = array<i32>} : memref<1x1x80x32xf32, #tpu.memory_space<vmem>>, vector<1x1x80x32xf32>,
    %c0_126 = arith.constant 0 : index
    %c0_127 = arith.constant 0 : index
    %c0_128 = arith.constant 0 : index
    %c0_129 = arith.constant 0 : index
    %101 = vector.load %arg5[%c0_126, %c0_127, %c0_128, %c0_129] : memref<1x1x80x32xf32, #tpu.memory_space<vmem>>, vector<1x1x80x32xf32>
    %102 = vector.shape_cast %101 : vector<1x1x80x32xf32> to vector<80x32xf32>
    %cst_130 = arith.constant 0.000000e+00 : f32
    %103 = vector.broadcast %cst_130 : f32 to vector<80x32xf32>
    %104 = arith.maximumf %102, %103 : vector<80x32xf32>
    %c0_131 = arith.constant 0 : index
    %c0_132 = arith.constant 0 : index
    %c0_133 = arith.constant 0 : index
    %c0_134 = arith.constant 0 : index
    %105 = vector.load %arg5[%c0_131, %c0_132, %c0_133, %c0_134] : memref<1x1x80x32xf32, #tpu.memory_space<vmem>>, vector<1x1x80x32xf32>
    %106 = vector.shape_cast %105 : vector<1x1x80x32xf32> to vector<80x32xf32>
    %107 = vector.shape_cast %104 : vector<80x32xf32> to vector<1x1x80x32xf32>
    tpu.vector_store %arg5[%c0_131, %c0_132, %c0_133, %c0_134], %107 {strides = array<i32>} : memref<1x1x80x32xf32, #tpu.memory_space<vmem>>, vector<1x1x80x32xf32>,
    %c0_135 = arith.constant 0 : index
    %c0_136 = arith.constant 0 : index
    %c0_137 = arith.constant 0 : index
    %108 = vector.load %arg4[%c0_135, %c0_136, %c0_137] : memref<1x80x1xf32, #tpu.memory_space<vmem>>, vector<1x80x1xf32>
    %109 = vector.shape_cast %108 : vector<1x80x1xf32> to vector<80x1xf32>
    %110 = vector.broadcast %109 : vector<80x1xf32> to vector<80x32xf32>
    %111 = arith.mulf %104, %110 : vector<80x32xf32>
    %c0_138 = arith.constant 0 : index
    %c0_139 = arith.constant 0 : index
    %112 = vector.load %arg6[%c0_138, %c0_139] : memref<1x32xf32, #tpu.memory_space<vmem>>, vector<1x32xf32>
    %cst_140 = arith.constant dense<0.000000e+00> : vector<32xf32>
    %113 = vector.multi_reduction <add>, %111, %cst_140 [0] : vector<80x32xf32> to vector<32xf32>
    %114 = vector.shape_cast %113 : vector<32xf32> to vector<1x32xf32>
    %115 = arith.addf %112, %114 : vector<1x32xf32>
    %c0_141 = arith.constant 0 : index
    %c0_142 = arith.constant 0 : index
    %116 = vector.load %arg6[%c0_141, %c0_142] : memref<1x32xf32, #tpu.memory_space<vmem>>, vector<1x32xf32>
    tpu.vector_store %arg6[%c0_141, %c0_142], %115 {strides = array<i32>} : memref<1x32xf32, #tpu.memory_space<vmem>>, vector<1x32xf32>,
    %c0_143 = arith.constant 0 : index
    %c0_144 = arith.constant 0 : index
    %117 = vector.load %arg7[%c0_143, %c0_144] : memref<1x32xf32, #tpu.memory_space<vmem>>, vector<1x32xf32>
    %118 = arith.mulf %111, %104 : vector<80x32xf32>
    %cst_145 = arith.constant dense<0.000000e+00> : vector<32xf32>
    %119 = vector.multi_reduction <add>, %118, %cst_145 [0] : vector<80x32xf32> to vector<32xf32>
    %120 = vector.shape_cast %119 : vector<32xf32> to vector<1x32xf32>
    %121 = arith.addf %117, %120 : vector<1x32xf32>
    %c0_146 = arith.constant 0 : index
    %c0_147 = arith.constant 0 : index
    %122 = vector.load %arg7[%c0_146, %c0_147] : memref<1x32xf32, #tpu.memory_space<vmem>>, vector<1x32xf32>
    tpu.vector_store %arg7[%c0_146, %c0_147], %121 {strides = array<i32>} : memref<1x32xf32, #tpu.memory_space<vmem>>, vector<1x32xf32>,
    return
  }
  func.func @transform_0(%arg0: i32, %arg1: i32) -> (i32, i32, i32, i32) {
    %c0_i32 = arith.constant 0 : i32
    %c0_i32_0 = arith.constant 0 : i32
    %c0_i32_1 = arith.constant 0 : i32
    return %arg0, %arg1, %c0_i32, %c0_i32_0 : i32, i32, i32, i32
  }
  func.func @transform_1(%arg0: i32, %arg1: i32) -> (i32, i32, i32) {
    %c0_i32 = arith.constant 0 : i32
    %c0_i32_0 = arith.constant 0 : i32
    %c0_i32_1 = arith.constant 0 : i32
    %c0_i32_2 = arith.constant 0 : i32
    return %c0_i32, %c0_i32_0, %c0_i32_1 : i32, i32, i32
  }
  func.func @transform_2(%arg0: i32, %arg1: i32) -> (i32, i32, i32) {
    %c0_i32 = arith.constant 0 : i32
    %c0_i32_0 = arith.constant 0 : i32
    %c0_i32_1 = arith.constant 0 : i32
    return %arg1, %c0_i32, %c0_i32_0 : i32, i32, i32
  }
  func.func @transform_3(%arg0: i32, %arg1: i32) -> (i32, i32, i32, i32) {
    %c0_i32 = arith.constant 0 : i32
    %c0_i32_0 = arith.constant 0 : i32
    %c0_i32_1 = arith.constant 0 : i32
    return %arg0, %arg1, %c0_i32, %c0_i32_0 : i32, i32, i32, i32
  }
  func.func @transform_4(%arg0: i32, %arg1: i32) -> (i32, i32) {
    %c0_i32 = arith.constant 0 : i32
    %c0_i32_0 = arith.constant 0 : i32
    %c0_i32_1 = arith.constant 0 : i32
    return %c0_i32, %c0_i32_0 : i32, i32
  }
  func.func @transform_5(%arg0: i32, %arg1: i32) -> (i32, i32) {
    %c0_i32 = arith.constant 0 : i32
    %c0_i32_0 = arith.constant 0 : i32
    %c0_i32_1 = arith.constant 0 : i32
    return %c0_i32, %c0_i32_0 : i32, i32
  }
}

module attributes {stable_mosaic.version = 11 : i64} {
  func.func @_bn_gelu_kernel(%arg0: i32, %arg1: memref<40x128xf32, #tpu.memory_space<vmem>>, %arg2: memref<1x128xf32, #tpu.memory_space<vmem>>, %arg3: memref<1x128xf32, #tpu.memory_space<vmem>>, %arg4: memref<40x128xf32, #tpu.memory_space<vmem>>) attributes {dimension_semantics = [#tpu.dimension_semantics<parallel>], iteration_bounds = array<i64: 1>, scalar_prefetch = 0 : i64, scratch_operands = 0 : i64, tpu.core_type = #tpu.core_type<tc>, window_params = [{transform_indices = @transform_0, window_bounds = array<i64: 40, 128>}, {pipeline_mode = #tpu.pipeline_mode<synchronous>, transform_indices = @transform_1, window_bounds = array<i64: 1, 128>}, {pipeline_mode = #tpu.pipeline_mode<synchronous>, transform_indices = @transform_2, window_bounds = array<i64: 1, 128>}, {transform_indices = @transform_3, window_bounds = array<i64: 40, 128>}]} {
    %c0 = arith.constant 0 : index
    %c0_0 = arith.constant 0 : index
    %0 = vector.load %arg1[%c0, %c0_0] : memref<40x128xf32, #tpu.memory_space<vmem>>, vector<40x128xf32>
    %c0_1 = arith.constant 0 : index
    %c0_2 = arith.constant 0 : index
    %1 = vector.load %arg2[%c0_1, %c0_2] : memref<1x128xf32, #tpu.memory_space<vmem>>, vector<1x128xf32>
    %2 = vector.broadcast %1 : vector<1x128xf32> to vector<40x128xf32>
    %3 = arith.mulf %0, %2 : vector<40x128xf32>
    %c0_3 = arith.constant 0 : index
    %c0_4 = arith.constant 0 : index
    %4 = vector.load %arg3[%c0_3, %c0_4] : memref<1x128xf32, #tpu.memory_space<vmem>>, vector<1x128xf32>
    %5 = vector.broadcast %4 : vector<1x128xf32> to vector<40x128xf32>
    %6 = arith.addf %3, %5 : vector<40x128xf32>
    %cst = arith.constant 5.000000e-01 : f32
    %7 = vector.broadcast %cst : f32 to vector<40x128xf32>
    %8 = arith.mulf %6, %7 : vector<40x128xf32>
    %cst_5 = arith.constant 0.707106769 : f32
    %9 = vector.broadcast %cst_5 : f32 to vector<40x128xf32>
    %10 = arith.mulf %6, %9 : vector<40x128xf32>
    %11 = math.erf %10 : vector<40x128xf32>
    %cst_6 = arith.constant 1.000000e+00 : f32
    %12 = vector.broadcast %cst_6 : f32 to vector<40x128xf32>
    %13 = arith.addf %12, %11 : vector<40x128xf32>
    %14 = arith.mulf %8, %13 : vector<40x128xf32>
    %c0_7 = arith.constant 0 : index
    %c0_8 = arith.constant 0 : index
    %15 = vector.load %arg4[%c0_7, %c0_8] : memref<40x128xf32, #tpu.memory_space<vmem>>, vector<40x128xf32>
    tpu.vector_store %arg4[%c0_7, %c0_8], %14 {strides = array<i32>} : memref<40x128xf32, #tpu.memory_space<vmem>>, vector<40x128xf32>,
    return
  }
  func.func @transform_0(%arg0: i32) -> (i32, i32) {
    %c0_i32 = arith.constant 0 : i32
    %c0_i32_0 = arith.constant 0 : i32
    return %arg0, %c0_i32 : i32, i32
  }
  func.func @transform_1(%arg0: i32) -> (i32, i32) {
    %c0_i32 = arith.constant 0 : i32
    %c0_i32_0 = arith.constant 0 : i32
    %c0_i32_1 = arith.constant 0 : i32
    return %c0_i32, %c0_i32_0 : i32, i32
  }
  func.func @transform_2(%arg0: i32) -> (i32, i32) {
    %c0_i32 = arith.constant 0 : i32
    %c0_i32_0 = arith.constant 0 : i32
    %c0_i32_1 = arith.constant 0 : i32
    return %c0_i32, %c0_i32_0 : i32, i32
  }
  func.func @transform_3(%arg0: i32) -> (i32, i32) {
    %c0_i32 = arith.constant 0 : i32
    %c0_i32_0 = arith.constant 0 : i32
    return %arg0, %c0_i32 : i32, i32
  }
}

</mosaic_0001>

<bundles_post_ra>
// kernel: tile.23
= control target key start
LH: loop header
LB: loop body
LE: loop exit
PB: predicated region body
PF: predicated region fallthrough
CT: control target
= control target key end

     0   :  { %s22_s0 = inlined_call_operand.vmem [shape: f32[32], index: 0, kind: input, shape index: {}]   ;;  %s23_s1 = inlined_call_operand.vmem [shape: f32[4,32], index: 1, kind: output, shape index: {}]  }
   0x1   :  { %v4_v0 = vld [vmem:[%s22_s0] ss:$0 sm:$0xff] }
   0x2   :  { %5 = vst [vmem:[%s23_s1] sm:$0xf] %v4_v0 }

// kernel: tile.24
= control target key start
LH: loop header
LB: loop body
LE: loop exit
PB: predicated region body
PF: predicated region fallthrough
CT: control target
= control target key end

     0   :  { %s37_s8 = smov 32   ;;  %s38_s9 = smov 64   ;;  %vm7_vm0 = vcmask 261120   ;;  %vm13_vm1 = vcmask 1048320   ;;  %vm19_vm2 = vcmask 785920   ;;  %vm25_vm3 = vcmask 523520   ;;  %s55_s0 = inlined_call_operand.vmem [shape: f32[4,32], index: 0, kind: input, shape index: {}]   ;;  %s56_s1 = inlined_call_operand.vmem [shape: f32[1,128], index: 1, kind: output, shape index: {}]  }
   0x1   :  { %v4_v0 = vld [vmem:[%s55_s0] sm:$0xf]  ;;  %s36_s0 = smov 96  }
   0x2   :  { %5 = vst [vmem:[#allocation1] sm:$0xf] %v4_v0 }
   0x9   :  { %v10_v1 = vld [vmem:[#allocation1 + $0x3] sm:$0x1]   ;;  %v22_v2 = vld [vmem:[#allocation1 + $0x1] sm:$0x1]   ;;  %v16_v3 = vld [vmem:[#allocation1 + $0x2] sm:$0x1]  }
   0xa   :  { %11 = vrot.lane.b32.xlu0 %v10_v1, %s36_s0  ;;  %23 = vrot.lane.b32.xlu1 %v22_v2, %s37_s8  ;;  %v6_v4 = vld [vmem:[#allocation1] sm:$0x1]  }
   0xb   :  { %8 = vst.msk [vmem:[#allocation0] sm:$0x1] %vm7_vm0, %v6_v4  }
  0x12   :  { %17 = vrot.lane.b32.xlu0 %v16_v3, %s38_s9 }
  0x7c   :  { %v12_v5 = vpop.permute.xlu0 %11   ;;  %v24_v6 = vpop.permute.xlu1 %23  }
  0x7d   :  { %14 = vst.msk [vmem:[#allocation0] sm:$0x1] %vm13_vm1, %v12_v5  }
  0x84   :  { %v18_v7 = vpop.permute.xlu0 %17  }
  0x85   :  { %20 = vst.msk [vmem:[#allocation0] sm:$0x1] %vm19_vm2, %v18_v7  }
  0x86   :  { %26 = vst.msk [vmem:[#allocation0] sm:$0x1] %vm25_vm3, %v24_v6  }
  0x8d   :  { %v29_v8 = vld [vmem:[#allocation0] sm:$0x1] }
  0x8e   :  { %32 = vst [vmem:[%s56_s1] sm:$0x1] %v29_v8 }

// kernel: stem_forward.5
= control target key start
LH: loop header
LB: loop body
LE: loop exit
PB: predicated region body
PF: predicated region fallthrough
CT: control target
= control target key end

     0   :  { %s391_s0 = inlined_call_operand.vmem [shape: f32[32,128], index: 0, kind: input, shape index: {}]   ;;  %s392_s1 = inlined_call_operand.vmem [shape: f32[1,128], index: 1, kind: input, shape index: {}]   ;;  %s393_s2 = inlined_call_operand.vmem [shape: f32[1,128], index: 2, kind: input, shape index: {}]   ;;  %s394_s3 = inlined_call_operand.vmem [shape: f32[32,128], index: 3, kind: output, shape index: {}]  }
   0x1   :  { %v14_v0 = vld [vmem:[%s391_s0] sm:$0xff]  ;;  %v15_v3 = vld [vmem:[%s391_s0 + $0x8] sm:$0xff]  ;;  %v16_v6 = vld [vmem:[%s391_s0 + $0x10] sm:$0xff] }
   0x2   :  { %v222_v1 = vld [vmem:[%s392_s1] ss:$0 sm:$0xff]  ;;  %v17_v7 = vld [vmem:[%s391_s0 + $0x18] sm:$0xff] }
   0x3   :  { %v223_v2 = vld [vmem:[%s393_s2] ss:$0 sm:$0xff]  ;;  %v22_v4 = vmul.f32 %v222_v1, %v14_v0  ;;  %v23_v5 = vmul.f32 %v222_v1, %v15_v3  ;;  %v24_v8 = vmul.f32 %v222_v1, %v16_v6  ;;  %v25_v9 = vmul.f32 %v222_v1, %v17_v7 }
   0x5   :  { %v270_v10 = vadd.f32 %v223_v2, %v22_v4  ;;  %v272_v11 = vadd.f32 %v223_v2, %v23_v5  ;;  %v274_v12 = vadd.f32 %v223_v2, %v24_v8  ;;  %v276_v13 = vadd.f32 %v223_v2, %v25_v9 }
   0x7   :  { %v279_v14 = vmul.f32 0.70710677, %v270_v10  ;;  %v282_v15 = vmul.f32 0.70710677, %v272_v11  ;;  %v285_v16 = vmul.f32 0.70710677, %v274_v12 }
   0x8   :  { %v288_v17 = vmul.f32 0.70710677, %v276_v13 }
   0x9   :  { %v42_v18 = vmul.f32 %v279_v14, %v279_v14  ;;  %v82_v19 = vmul.f32 %v282_v15, %v282_v15  ;;  %v122_v20 = vmul.f32 %v285_v16, %v285_v16 }
   0xa   :  { %v162_v21 = vmul.f32 %v288_v17, %v288_v17 }
   0xb   :  { %v298_v22 = vmin.f32 %v42_v18, 16.0  ;;  %v300_v23 = vmin.f32 %v82_v19, 16.0  ;;  %v302_v24 = vmin.f32 %v122_v20, 16.0 }
   0xc   :  { %v304_v25 = vmin.f32 %v162_v21, 16.0 }
   0xd   :  { %v44_v26 = vmul.f32 2.1237322e-06, %v298_v22  ;;  %v55_v27 = vmul.f32 3.8918573e-05, %v298_v22  ;;  %v84_v28 = vmul.f32 2.1237322e-06, %v300_v23 }
   0xe   :  { %v95_v29 = vmul.f32 3.8918573e-05, %v300_v23  ;;  %v124_v30 = vmul.f32 2.1237322e-06, %v302_v24  ;;  %v135_v31 = vmul.f32 3.8918573e-05, %v302_v24 }
   0xf   :  { %v45_v32 = vadd.f32 0.00028619796, %v44_v26  ;;  %v56_v33 = vadd.f32 0.001143296, %v55_v27  ;;  %v85_v34 = vadd.f32 0.00028619796, %v84_v28 }
  0x10   :  { %v96_v35 = vadd.f32 0.001143296, %v95_v29  ;;  %v125_v36 = vadd.f32 0.00028619796, %v124_v30  ;;  %v136_v37 = vadd.f32 0.001143296, %v135_v31 }
  0x11   :  { %v46_v38 = vmul.f32 %v45_v32, %v298_v22  ;;  %v57_v39 = vmul.f32 %v56_v33, %v298_v22  ;;  %v86_v40 = vmul.f32 %v85_v34, %v300_v23  ;;  %v164_v41 = vmul.f32 2.1237322e-06, %v304_v25 }
  0x12   :  { %v97_v42 = vmul.f32 %v96_v35, %v300_v23  ;;  %v126_v43 = vmul.f32 %v125_v36, %v302_v24  ;;  %v137_v44 = vmul.f32 %v136_v37, %v302_v24  ;;  %v175_v58 = vmul.f32 3.8918573e-05, %v304_v25 }
  0x13   :  { %v47_v45 = vadd.f32 0.0036580483, %v46_v38  ;;  %v58_v46 = vadd.f32 0.014752088, %v57_v39  ;;  %v87_v47 = vadd.f32 0.0036580483, %v86_v40 }
  0x14   :  { %v98_v48 = vadd.f32 0.014752088, %v97_v42  ;;  %v127_v49 = vadd.f32 0.0036580483, %v126_v43  ;;  %v138_v50 = vadd.f32 0.014752088, %v137_v44 }
  0x15   :  { %v48_v51 = vmul.f32 %v47_v45, %v298_v22  ;;  %v59_v52 = vmul.f32 %v58_v46, %v298_v22  ;;  %v88_v53 = vmul.f32 %v87_v47, %v300_v23  ;;  %v165_v54 = vadd.f32 0.00028619796, %v164_v41 }
  0x16   :  { %v99_v55 = vmul.f32 %v98_v48, %v300_v23  ;;  %v128_v56 = vmul.f32 %v127_v49, %v302_v24  ;;  %v139_v57 = vmul.f32 %v138_v50, %v302_v24  ;;  %v176_v6 = vadd.f32 0.001143296, %v175_v58 }
  0x17   :  { %v49_v59 = vadd.f32 0.05243302, %v48_v51  ;;  %v60_v60 = vadd.f32 0.112945676, %v59_v52  ;;  %v89_v61 = vadd.f32 0.05243302, %v88_v53  ;;  %v166_v62 = vmul.f32 %v165_v54, %v304_v25 }
  0x18   :  { %v100_v63 = vadd.f32 0.112945676, %v99_v55  ;;  %v129_v0 = vadd.f32 0.05243302, %v128_v56  ;;  %v140_v3 = vadd.f32 0.112945676, %v139_v57  ;;  %v177_v29 = vmul.f32 %v176_v6, %v304_v25 }
  0x19   :  { %v50_v1 = vmul.f32 %v49_v59, %v298_v22  ;;  %v61_v2 = vmul.f32 %v60_v60, %v298_v22  ;;  %v90_v4 = vmul.f32 %v89_v61, %v300_v23  ;;  %v167_v18 = vadd.f32 0.0036580483, %v166_v62 }
  0x1a   :  { %v101_v5 = vmul.f32 %v100_v63, %v300_v23  ;;  %v130_v8 = vmul.f32 %v129_v0, %v302_v24  ;;  %v141_v9 = vmul.f32 %v140_v3, %v302_v24  ;;  %v178_v35 = vadd.f32 0.014752088, %v177_v29 }
  0x1b   :  { %v62_v7 = vadd.f32 0.4994258, %v61_v2  ;;  %v51_v20 = vadd.f32 0.18741608, %v50_v1  ;;  %v91_v27 = vadd.f32 0.18741608, %v90_v4  ;;  %v168_v32 = vmul.f32 %v167_v18, %v304_v25 }
  0x1c   :  { %v102_v19 = vadd.f32 0.4994258, %v101_v5  ;;  %v142_v26 = vadd.f32 0.4994258, %v141_v9  ;;  %v131_v31 = vadd.f32 0.18741608, %v130_v8  ;;  %v179_v41 = vmul.f32 %v178_v35, %v304_v25 }
  0x1d   :  { %v63_v21 = vmul.f32 %v62_v7, %v298_v22  ;;  %v52_v36 = vmul.f32 %v51_v20, %v298_v22  ;;  %v92_v37 = vmul.f32 %v91_v27, %v300_v23  ;;  %v169_v39 = vadd.f32 0.05243302, %v168_v32 }
  0x1e   :  { %v103_v28 = vmul.f32 %v102_v19, %v300_v23  ;;  %v143_v34 = vmul.f32 %v142_v26, %v302_v24  ;;  %v132_v38 = vmul.f32 %v131_v31, %v302_v24  ;;  %v180_v47 = vadd.f32 0.112945676, %v179_v41 }
  0x1f   :  { %v64_v30 = vadd.f32 1.0, %v63_v21  ;;  %v53_v42 = vadd.f32 1.1283791, %v52_v36  ;;  %v93_v43 = vadd.f32 1.1283791, %v92_v37  ;;  %v170_v46 = vmul.f32 %v169_v39, %v304_v25 }
  0x20   :  { %v104_v33 = vadd.f32 1.0, %v103_v28  ;;  %v144_v40 = vadd.f32 1.0, %v143_v34  ;;  %v133_v45 = vadd.f32 1.1283791, %v132_v38  ;;  %v181_v53 = vmul.f32 %v180_v47, %v304_v25 }
  0x21   :  { %224 = vrcp.f32 %v64_v30  ;;  %v74_v49 = vand.u32 2147483647, %v64_v30  ;;  %v76_v50 = vand.u32 2147483648, %v64_v30  ;;  %v54_v51 = vmul.f32 %v53_v42, %v279_v14 }
  0x22   :  { %226 = vrcp.f32 %v104_v33  ;;  %v114_v23 = vand.u32 2147483647, %v104_v33  ;;  %v116_v52 = vand.u32 2147483648, %v104_v33  ;;  %vm70_vm0 = vweird.f32 %v64_v30 }
  0x23   :  { %228 = vrcp.f32 %v144_v40  ;;  %v94_v55 = vmul.f32 %v93_v43, %v282_v15  ;;  %vm110_vm2 = vweird.f32 %v104_v33  ;;  %v182_v57 = vadd.f32 0.4994258, %v181_v53 }
  0x24   :  { %vm346_vm4 = vcmp.eq.f32.partialorder %v74_v49, 8.507059e+37  ;;  %v77_v14 = vor.u32 1.1754944e-38, %v76_v50  ;;  %vm350_vm5 = vcmp.eq.f32.partialorder %v114_v23, 8.507059e+37  ;;  %v117_v63 = vor.u32 1.1754944e-38, %v116_v52 }
  0x25   :  { %v183_v1 = vmul.f32 %v182_v57, %v304_v25  ;;  %vm150_vm8 = vweird.f32 %v144_v40  ;;  %v154_v4 = vand.u32 2147483647, %v144_v40  ;;  %v156_v5 = vand.u32 2147483648, %v144_v40 }
  0x26   :  { %v171_v18 = vadd.f32 0.18741608, %v170_v46  ;;  %v34_v32 = vmul.f32 0.5, %v270_v10  ;;  %v35_v34 = vmul.f32 0.5, %v272_v11  ;;  %v37_v53 = vmul.f32 0.5, %v276_v13 }
  0x27   :  { %v225_v44 = vpop.eup %224  ;;  %v184_v8 = vadd.f32 1.0, %v183_v1  ;;  %v157_v28 = vor.u32 1.1754944e-38, %v156_v5  ;;  %vm155_vm11 = vcmp.eq.f32.partialorder %v154_v4, 8.507059e+37 }
  0x28   :  { %v227_v48 = vpop.eup %226  ;;  %v66_v22 = vmul.f32 %v225_v44, %v64_v30  ;;  %vm71_vm1 = vweird.f32 %v225_v44  ;;  %v134_v30 = vmul.f32 %v133_v45, %v285_v16  ;;  %v172_v37 = vmul.f32 %v171_v18, %v304_v25 }
  0x29   :  { %v106_v24 = vmul.f32 %v227_v48, %v104_v33  ;;  %vm111_vm3 = vweird.f32 %v227_v48  ;;  %v229_v58 = vpop.eup %228  ;;  %vm354_vm6 = vmor %vm70_vm0, %vm71_vm1  ;;  %230 = vrcp.f32 %v184_v8  ;;  %v196_v10 = vand.u32 2147483648, %v184_v8 }
  0x2a   :  { %v67_v54 = vsub.f32 1.0, %v66_v22  ;;  %v146_v0 = vmul.f32 %v229_v58, %v144_v40  ;;  %vm359_vm7 = vmor %vm110_vm2, %vm111_vm3  ;;  %vm151_vm9 = vweird.f32 %v229_v58  ;;  %v173_v47 = vadd.f32 1.1283791, %v172_v37 }
  0x2b   :  { %v107_v56 = vsub.f32 1.0, %v106_v24  ;;  %vm152_vm10 = vmor %vm150_vm8, %vm151_vm9  ;;  %vm190_vm12 = vweird.f32 %v184_v8  ;;  %v194_v25 = vand.u32 2147483647, %v184_v8  ;;  %v197_v49 = vor.u32 1.1754944e-38, %v196_v10 }
  0x2c   :  { %v68_v59 = vmul.f32 %v225_v44, %v67_v54  ;;  %v147_v7 = vsub.f32 1.0, %v146_v0  ;;  %v174_v50 = vmul.f32 %v173_v47, %v288_v17 }
  0x2d   :  { %v108_v15 = vmul.f32 %v227_v48, %v107_v56  ;;  %vm195_vm15 = vcmp.eq.f32.partialorder %v194_v25, 8.507059e+37 }
  0x2e   :  { %v69_v2 = vadd.f32 %v225_v44, %v68_v59  ;;  %v148_v21 = vmul.f32 %v229_v58, %v147_v7 }
  0x2f   :  { %v109_v6 = vadd.f32 %v227_v48, %v108_v15  ;;  %v231_v41 = vpop.eup %230 }
  0x30   :  { %v73_v9 = vsel %vm354_vm6, %v225_v44, %v69_v2  ;;  %v149_v31 = vadd.f32 %v229_v58, %v148_v21  ;;  %v36_v44 = vmul.f32 0.5, %v274_v12  ;;  %v186_v16 = vmul.f32 %v231_v41, %v184_v8 }
  0x31   :  { %v78_v19 = vsel %vm346_vm4, %v77_v14, %v73_v9  ;;  %v113_v20 = vsel %vm359_vm7, %v227_v48, %v109_v6  ;;  %vm191_vm13 = vweird.f32 %v231_v41 }
  0x32   :  { %v79_v26 = vmul.f32 %v78_v19, %v54_v51  ;;  %v118_v27 = vsel %vm350_vm5, %v117_v63, %v113_v20  ;;  %v153_v36 = vsel %vm152_vm10, %v229_v58, %v149_v31  ;;  %v187_v11 = vsub.f32 1.0, %v186_v16  ;;  %vm192_vm14 = vmor %vm190_vm12, %vm191_vm13 }
  0x33   :  { %v119_v29 = vmul.f32 %v118_v27, %v94_v55  ;;  %v158_v39 = vsel %vm155_vm11, %v157_v28, %v153_v36 }
  0x34   :  { %v218_v33 = vclamps-f32 %v79_v26, 1.0  ;;  %v159_v42 = vmul.f32 %v158_v39, %v134_v30  ;;  %v188_v22 = vmul.f32 %v231_v41, %v187_v11 }
  0x35   :  { %v219_v35 = vclamps-f32 %v119_v29, 1.0 }
  0x36   :  { %v202_v38 = vadd.f32 1.0, %v218_v33  ;;  %v220_v46 = vclamps-f32 %v159_v42, 1.0  ;;  %v189_v23 = vadd.f32 %v231_v41, %v188_v22 }
  0x37   :  { %v203_v40 = vadd.f32 1.0, %v219_v35 }
  0x38   :  { %v206_v43 = vmul.f32 %v202_v38, %v34_v32  ;;  %v204_v48 = vadd.f32 1.0, %v220_v46  ;;  %v193_v51 = vsel %vm192_vm14, %v231_v41, %v189_v23 }
  0x39   :  { %v207_v45 = vmul.f32 %v203_v40, %v35_v34  ;;  %v198_v24 = vsel %vm195_vm15, %v197_v49, %v193_v51 }
  0x3a   :  { %210 = vst [vmem:[%s394_s3] sm:$0xff] %v206_v43  ;;  %v208_v12 = vmul.f32 %v204_v48, %v36_v44  ;;  %v199_v52 = vmul.f32 %v198_v24, %v174_v50 }
  0x3b   :  { %211 = vst [vmem:[%s394_s3 + $0x8] sm:$0xff] %v207_v45 }
  0x3c   :  { %212 = vst [vmem:[%s394_s3 + $0x10] sm:$0xff] %v208_v12  ;;  %v221_v54 = vclamps-f32 %v199_v52, 1.0 }
  0x3e   :  { %v205_v55 = vadd.f32 1.0, %v221_v54 }
  0x40   :  { %v209_v56 = vmul.f32 %v205_v55, %v37_v53 }
  0x42   :  { %213 = vst [vmem:[%s394_s3 + $0x18] sm:$0xff] %v209_v56 }

// kernel: stem_forward.4
= control target key start
LH: loop header
LB: loop body
LE: loop exit
PB: predicated region body
PF: predicated region fallthrough
CT: control target
= control target key end

     0   :  { %vm94_vm0 = vcmask 261120   ;;  %vm19_vm1 = vcmask 253952   ;;  %v374_v34 = vmov 0.0   ;;  %s586_s1 = inlined_call_operand.vmem [shape: bf16[32,32], index: 1, kind: input, shape index: {}]   ;;  %s587_s0 = inlined_call_operand.vmem [shape: bf16[128,32], index: 0, kind: input, shape index: {}]   ;;  %s588_s2 = inlined_call_operand.vmem [shape: f32[128,32], index: 2, kind: output, shape index: {0}]   ;;  %s589_s3 = inlined_call_operand.vmem [shape: f32[1,32], index: 3, kind: output, shape index: {1}]   ;;  %s590_s4 = inlined_call_operand.vmem [shape: f32[1,32], index: 4, kind: output, shape index: {2}]  }
   0x1   :  { %v366_v0 = vld [vmem:[%s586_s1 + $0x8] sm:$0xff]  ;;  %v365_v1 = vld [vmem:[%s586_s1] sm:$0xff]  ;;  %v359_v3 = vld [vmem:[%s587_s0 + $0x10] sm:$0xff]  ;;  %20 = vst.msk [vmem:[%s589_s3] sm:$0x1] %vm19_vm1, %v374_v34 }
   0x2   :  { %125 = vmatpush.bf16.msra.mxu0 %v366_v0  ;;  %367 = vmatpush.bf16.msra.mxu1 %v366_v0  ;;  %v357_v2 = vld [vmem:[%s587_s0] sm:$0xff]  ;;  %v363_v5 = vld [vmem:[%s587_s0 + $0x30] sm:$0xff]  ;;  %v358_v6 = vld [vmem:[%s587_s0 + $0x8] sm:$0xff]  ;;  %21 = vst.msk [vmem:[%s590_s4] sm:$0x1] %vm19_vm1, %v374_v34 }
   0x3   :  { %368 = vmatpush.bf16.msra.mxu2 %v366_v0  ;;  %369 = vmatpush.bf16.msra.mxu3 %v366_v0  ;;  %v361_v4 = vld [vmem:[%s587_s0 + $0x20] sm:$0xff]  ;;  %v360_v7 = vld [vmem:[%s587_s0 + $0x18] sm:$0xff]  ;;  %v362_v8 = vld [vmem:[%s587_s0 + $0x28] sm:$0xff] }
   0x4   :  { %v364_v9 = vld [vmem:[%s587_s0 + $0x38] sm:$0xff] }
   0x6   :  { %126 = vmatpush.bf16.msra.mxu0 %v365_v1  ;;  %370 = vmatpush.bf16.msra.mxu1 %v365_v1 }
   0x7   :  { %371 = vmatpush.bf16.msra.mxu2 %v365_v1  ;;  %372 = vmatpush.bf16.msra.mxu3 %v365_v1 }
   0x9   :  { %349 = vmatmul.msk.bf16.vlgmr.msra.gmra.mxu0 %vm94_vm0, %v357_v2  ;;  %351 = vmatmul.msk.bf16.vlgmr.msra.gmra.mxu1 %vm94_vm0, %v359_v3 }
   0xa   :  { %353 = vmatmul.msk.bf16.vlgmr.msra.gmra.mxu2 %vm94_vm0, %v361_v4  ;;  %355 = vmatmul.msk.bf16.vlgmr.msra.gmra.mxu3 %vm94_vm0, %v363_v5 }
  0x19   :  { %350 = vmatmul.msk.bf16.gmra.mxu0 %vm94_vm0, %v358_v6  ;;  %352 = vmatmul.msk.bf16.gmra.mxu1 %vm94_vm0, %v360_v7 }
  0x1a   :  { %354 = vmatmul.msk.bf16.gmra.mxu2 %vm94_vm0, %v362_v8  ;;  %356 = vmatmul.msk.bf16.gmra.mxu3 %vm94_vm0, %v364_v9 }
  0x86   :  { %v128_v10 = vpop.f32.mrf.mxu0  ;;  %v138_v11 = vpop.f32.mrf.mxu1 }
  0x87   :  { %v168_v12 = vmax.f32 %v128_v10, 0.0  ;;  %v172_v13 = vmax.f32 %v138_v11, 0.0 }
  0x89   :  { %184 = vst.msk [vmem:[%s588_s2] sm:$0xff] %vm94_vm0, %v168_v12  ;;  %v242_v31 = vmul.f32 %v168_v12, %v168_v12  ;;  %v201_v35 = vsel %vm94_vm0, %v168_v12, 0.0  ;;  %v246_v51 = vmul.f32 %v172_v13, %v172_v13  ;;  %v208_v56 = vsel %vm94_vm0, %v172_v13, 0.0 }
  0x8a   :  { %188 = vst.msk [vmem:[%s588_s2 + $0x20] sm:$0xff] %vm94_vm0, %v172_v13 }
  0x8b   :  { %v258_v40 = vsel %vm94_vm0, %v242_v31, 0.0  ;;  %v265_v61 = vsel %vm94_vm0, %v246_v51, 0.0 }
  0x8d   :  { %v148_v14 = vpop.f32.mrf.mxu2  ;;  %v158_v15 = vpop.f32.mrf.mxu3 }
  0x8e   :  { %v130_v16 = vpop.f32.mrf.mxu0  ;;  %v140_v17 = vpop.f32.mrf.mxu1  ;;  %v446_v18 = vmax.f32 %v148_v14, 0.0  ;;  %v448_v21 = vmax.f32 %v158_v15, 0.0 }
  0x8f   :  { %v169_v19 = vmax.f32 %v130_v16, 0.0  ;;  %v173_v20 = vmax.f32 %v140_v17, 0.0 }
  0x90   :  { %192 = vst.msk [vmem:[%s588_s2 + $0x40] sm:$0xff] %vm94_vm0, %v446_v18  ;;  %v250_v11 = vmul.f32 %v446_v18, %v446_v18  ;;  %v216_v16 = vsel %vm94_vm0, %v446_v18, 0.0  ;;  %v254_v34 = vmul.f32 %v448_v21, %v448_v21 }
  0x91   :  { %185 = vst.msk [vmem:[%s588_s2 + $0x8] sm:$0xff] %vm94_vm0, %v169_v19  ;;  %v243_v30 = vmul.f32 %v169_v19, %v169_v19  ;;  %v202_v32 = vsel %vm94_vm0, %v169_v19, 0.0  ;;  %v247_v57 = vmul.f32 %v173_v20, %v173_v20  ;;  %v210_v62 = vsel %vm94_vm0, %v173_v20, 0.0 }
  0x92   :  { %189 = vst.msk [vmem:[%s588_s2 + $0x28] sm:$0xff] %vm94_vm0, %v173_v20  ;;  %v203_v41 = vadd.f32 %v202_v32, %v201_v35 }
  0x93   :  { %196 = vst.msk [vmem:[%s588_s2 + $0x60] sm:$0xff] %vm94_vm0, %v448_v21  ;;  %v259_v36 = vsel %vm94_vm0, %v243_v30, 0.0  ;;  %v267_v6 = vsel %vm94_vm0, %v247_v57, 0.0 }
  0x94   :  { %v260_v49 = vadd.f32 %v259_v36, %v258_v40 }
  0x95   :  { %v150_v22 = vpop.f32.mrf.mxu2  ;;  %v160_v23 = vpop.f32.mrf.mxu3 }
  0x96   :  { %v133_v24 = vpop.f32.mrf.mxu0  ;;  %v143_v25 = vpop.f32.mrf.mxu1  ;;  %v468_v26 = vmax.f32 %v150_v22, 0.0  ;;  %v470_v29 = vmax.f32 %v160_v23, 0.0  ;;  %v273_v23 = vsel %vm94_vm0, %v250_v11, 0.0 }
  0x97   :  { %v170_v27 = vmax.f32 %v133_v24, 0.0  ;;  %v174_v28 = vmax.f32 %v143_v25, 0.0 }
  0x98   :  { %193 = vst.msk [vmem:[%s588_s2 + $0x48] sm:$0xff] %vm94_vm0, %v468_v26  ;;  %v251_v17 = vmul.f32 %v468_v26, %v468_v26  ;;  %v218_v24 = vsel %vm94_vm0, %v468_v26, 0.0  ;;  %v224_v26 = vsel %vm94_vm0, %v448_v21, 0.0 }
  0x99   :  { %186 = vst.msk [vmem:[%s588_s2 + $0x10] sm:$0xff] %vm94_vm0, %v170_v27  ;;  %v244_v33 = vmul.f32 %v170_v27, %v170_v27  ;;  %v204_v37 = vsel %vm94_vm0, %v170_v27, 0.0  ;;  %v248_v63 = vmul.f32 %v174_v28, %v174_v28  ;;  %v212_v7 = vsel %vm94_vm0, %v174_v28, 0.0 }
  0x9a   :  { %190 = vst.msk [vmem:[%s588_s2 + $0x30] sm:$0xff] %vm94_vm0, %v174_v28  ;;  %v205_v50 = vadd.f32 %v204_v37, %v203_v41  ;;  %v275_v30 = vsel %vm94_vm0, %v251_v17, 0.0 }
  0x9b   :  { %197 = vst.msk [vmem:[%s588_s2 + $0x68] sm:$0xff] %vm94_vm0, %v470_v29  ;;  %v261_v45 = vsel %vm94_vm0, %v244_v33, 0.0  ;;  %v269_v12 = vsel %vm94_vm0, %v248_v63, 0.0 }
  0x9c   :  { %v262_v54 = vadd.f32 %v261_v45, %v260_v49 }
  0x9d   :  { %v153_v38 = vpop.f32.mrf.mxu2  ;;  %v163_v39 = vpop.f32.mrf.mxu3 }
  0x9e   :  { %v135_v42 = vpop.f32.mrf.mxu0  ;;  %v145_v43 = vpop.f32.mrf.mxu1  ;;  %v178_v44 = vmax.f32 %v153_v38, 0.0  ;;  %v504_v48 = vmax.f32 %v163_v39, 0.0  ;;  %v255_v39 = vmul.f32 %v470_v29, %v470_v29 }
  0x9f   :  { %v171_v46 = vmax.f32 %v135_v42, 0.0  ;;  %v175_v47 = vmax.f32 %v145_v43, 0.0  ;;  %v281_v43 = vsel %vm94_vm0, %v254_v34, 0.0 }
  0xa0   :  { %194 = vst.msk [vmem:[%s588_s2 + $0x50] sm:$0xff] %vm94_vm0, %v178_v44  ;;  %v252_v25 = vmul.f32 %v178_v44, %v178_v44  ;;  %v220_v31 = vsel %vm94_vm0, %v178_v44, 0.0  ;;  %v226_v44 = vsel %vm94_vm0, %v470_v29, 0.0  ;;  %v256_v45 = vmul.f32 %v504_v48, %v504_v48 }
  0xa1   :  { %187 = vst.msk [vmem:[%s588_s2 + $0x18] sm:$0xff] %vm94_vm0, %v171_v46  ;;  %v206_v52 = vsel %vm94_vm0, %v171_v46, 0.0  ;;  %v245_v53 = vmul.f32 %v171_v46, %v171_v46  ;;  %v249_v8 = vmul.f32 %v175_v47, %v175_v47  ;;  %v214_v13 = vsel %vm94_vm0, %v175_v47, 0.0 }
  0xa2   :  { %v207_v55 = vadd.f32 %v206_v52, %v205_v50  ;;  %191 = vst.msk [vmem:[%s588_s2 + $0x38] sm:$0xff] %vm94_vm0, %v175_v47  ;;  %v277_v35 = vsel %vm94_vm0, %v252_v25, 0.0  ;;  %v283_v49 = vsel %vm94_vm0, %v255_v39, 0.0  ;;  %v228_v21 = vsel %vm94_vm0, %v504_v48, 0.0 }
  0xa3   :  { %v263_v58 = vsel %vm94_vm0, %v245_v53, 0.0  ;;  %198 = vst.msk [vmem:[%s588_s2 + $0x70] sm:$0xff] %vm94_vm0, %v504_v48  ;;  %v271_v19 = vsel %vm94_vm0, %v249_v8, 0.0  ;;  %v285_v53 = vsel %vm94_vm0, %v256_v45, 0.0 }
  0xa4   :  { %v209_v59 = vadd.f32 %v208_v56, %v207_v55  ;;  %v264_v60 = vadd.f32 %v263_v58, %v262_v54 }
  0xa5   :  { %v155_v0 = vpop.f32.mrf.mxu2  ;;  %v165_v1 = vpop.f32.mrf.mxu3 }
  0xa6   :  { %v266_v2 = vadd.f32 %v265_v61, %v264_v60  ;;  %v211_v3 = vadd.f32 %v210_v62, %v209_v59  ;;  %v179_v4 = vmax.f32 %v155_v0, 0.0  ;;  %v183_v5 = vmax.f32 %v165_v1, 0.0 }
  0xa8   :  { %v213_v9 = vadd.f32 %v212_v7, %v211_v3  ;;  %v268_v10 = vadd.f32 %v267_v6, %v266_v2  ;;  %195 = vst.msk [vmem:[%s588_s2 + $0x58] sm:$0xff] %vm94_vm0, %v179_v4  ;;  %v253_v18 = vmul.f32 %v179_v4, %v179_v4  ;;  %v222_v36 = vsel %vm94_vm0, %v179_v4, 0.0  ;;  %v200_v2 = vld [vmem:[%s589_s3] sm:$0x1] }
  0xa9   :  { %199 = vst.msk [vmem:[%s588_s2 + $0x78] sm:$0xff] %vm94_vm0, %v183_v5  ;;  %v257_v50 = vmul.f32 %v183_v5, %v183_v5  ;;  %v230_v54 = vsel %vm94_vm0, %v183_v5, 0.0  ;;  %v241_v5 = vld [vmem:[%s590_s4] sm:$0x1] }
  0xaa   :  { %v215_v14 = vadd.f32 %v214_v13, %v213_v9  ;;  %v270_v15 = vadd.f32 %v269_v12, %v268_v10  ;;  %v279_v40 = vsel %vm94_vm0, %v253_v18, 0.0 }
  0xab   :  { %v287_v29 = vsel %vm94_vm0, %v257_v50, 0.0 }
  0xac   :  { %v217_v20 = vadd.f32 %v216_v16, %v215_v14  ;;  %v272_v22 = vadd.f32 %v271_v19, %v270_v15 }
  0xae   :  { %v274_v27 = vadd.f32 %v273_v23, %v272_v22  ;;  %v219_v28 = vadd.f32 %v218_v24, %v217_v20 }
  0xb0   :  { %v221_v32 = vadd.f32 %v220_v31, %v219_v28  ;;  %v276_v33 = vadd.f32 %v275_v30, %v274_v27 }
  0xb2   :  { %v278_v37 = vadd.f32 %v277_v35, %v276_v33  ;;  %v223_v38 = vadd.f32 %v222_v36, %v221_v32 }
  0xb4   :  { %v225_v41 = vadd.f32 %v224_v26, %v223_v38  ;;  %v280_v42 = vadd.f32 %v279_v40, %v278_v37 }
  0xb6   :  { %v282_v46 = vadd.f32 %v281_v43, %v280_v42  ;;  %v227_v47 = vadd.f32 %v226_v44, %v225_v41 }
  0xb8   :  { %v229_v51 = vadd.f32 %v228_v21, %v227_v47  ;;  %v284_v52 = vadd.f32 %v283_v49, %v282_v46 }
  0xba   :  { %v286_v55 = vadd.f32 %v285_v53, %v284_v52  ;;  %v231_v56 = vadd.f32 %v230_v54, %v229_v51 }
  0xbc   :  { %v232_v57 = vrot.slane %v231_v56, 4  ;;  %v288_v58 = vadd.f32 %v287_v29, %v286_v55 }
  0xbe   :  { %v233_v59 = vadd.f32 %v232_v57, %v231_v56  ;;  %v289_v60 = vrot.slane %v288_v58, 4 }
  0xc0   :  { %v234_v61 = vrot.slane %v233_v59, 2  ;;  %v290_v62 = vadd.f32 %v289_v60, %v288_v58 }
  0xc2   :  { %v235_v63 = vadd.f32 %v234_v61, %v233_v59  ;;  %v291_v0 = vrot.slane %v290_v62, 2 }
  0xc4   :  { %v236_v48 = vrot.slane %v235_v63, 1  ;;  %v292_v1 = vadd.f32 %v291_v0, %v290_v62 }
  0xc6   :  { %v237_v3 = vadd.f32 %v236_v48, %v235_v63  ;;  %v293_v4 = vrot.slane %v292_v1, 1 }
  0xc8   :  { %v238_v6 = vadd.f32 %v237_v3, %v200_v2  ;;  %v294_v7 = vadd.f32 %v293_v4, %v292_v1 }
  0xca   :  { %240 = vst.msk [vmem:[%s589_s3] sm:$0x1] %vm19_vm1, %v238_v6  ;;  %v295_v8 = vadd.f32 %v294_v7, %v241_v5 }
  0xcc   :  { %296 = vst.msk [vmem:[%s590_s4] sm:$0x1] %vm19_vm1, %v295_v8 }

// kernel: stem_forward.7
= control target key start
LH: loop header
LB: loop body
LE: loop exit
PB: predicated region body
PF: predicated region fallthrough
CT: control target
= control target key end

     0   :  { %s480_s0 = inlined_call_operand.vmem [shape: f32[40,128], index: 0, kind: input, shape index: {}]   ;;  %s481_s1 = inlined_call_operand.vmem [shape: f32[1,128], index: 1, kind: input, shape index: {}]   ;;  %s482_s2 = inlined_call_operand.vmem [shape: f32[1,128], index: 2, kind: input, shape index: {}]   ;;  %s483_s3 = inlined_call_operand.vmem [shape: f32[40,128], index: 3, kind: output, shape index: {}]  }
   0x1   :  { %v14_v0 = vld [vmem:[%s480_s0] sm:$0xff]  ;;  %v15_v3 = vld [vmem:[%s480_s0 + $0x8] sm:$0xff]  ;;  %v16_v6 = vld [vmem:[%s480_s0 + $0x10] sm:$0xff] }
   0x2   :  { %v271_v1 = vld [vmem:[%s481_s1] ss:$0 sm:$0xff]  ;;  %v17_v7 = vld [vmem:[%s480_s0 + $0x18] sm:$0xff] }
   0x3   :  { %v272_v2 = vld [vmem:[%s482_s2] ss:$0 sm:$0xff]  ;;  %v23_v4 = vmul.f32 %v271_v1, %v14_v0  ;;  %v24_v5 = vmul.f32 %v271_v1, %v15_v3  ;;  %v25_v8 = vmul.f32 %v271_v1, %v16_v6  ;;  %v26_v9 = vmul.f32 %v271_v1, %v17_v7 }
   0x4   :  { %v18_v26 = vld [vmem:[%s480_s0 + $0x20] sm:$0xff] }
   0x5   :  { %v321_v10 = vadd.f32 %v272_v2, %v23_v4  ;;  %v323_v11 = vadd.f32 %v272_v2, %v24_v5  ;;  %v325_v12 = vadd.f32 %v272_v2, %v25_v8  ;;  %v327_v13 = vadd.f32 %v272_v2, %v26_v9 }
   0x6   :  { %v27_v39 = vmul.f32 %v271_v1, %v18_v26 }
   0x7   :  { %v330_v14 = vmul.f32 0.70710677, %v321_v10  ;;  %v333_v15 = vmul.f32 0.70710677, %v323_v11  ;;  %v336_v16 = vmul.f32 0.70710677, %v325_v12 }
   0x8   :  { %v339_v17 = vmul.f32 0.70710677, %v327_v13  ;;  %v373_v53 = vadd.f32 %v272_v2, %v27_v39 }
   0x9   :  { %v47_v18 = vmul.f32 %v330_v14, %v330_v14  ;;  %v87_v19 = vmul.f32 %v333_v15, %v333_v15  ;;  %v127_v20 = vmul.f32 %v336_v16, %v336_v16 }
   0xa   :  { %v167_v21 = vmul.f32 %v339_v17, %v339_v17  ;;  %v384_v4 = vmul.f32 0.70710677, %v373_v53 }
   0xb   :  { %v349_v22 = vmin.f32 %v47_v18, 16.0  ;;  %v351_v23 = vmin.f32 %v87_v19, 16.0  ;;  %v353_v24 = vmin.f32 %v127_v20, 16.0 }
   0xc   :  { %v355_v25 = vmin.f32 %v167_v21, 16.0 }
   0xd   :  { %v49_v27 = vmul.f32 2.1237322e-06, %v349_v22  ;;  %v60_v28 = vmul.f32 3.8918573e-05, %v349_v22  ;;  %v89_v29 = vmul.f32 2.1237322e-06, %v351_v23 }
   0xe   :  { %v100_v30 = vmul.f32 3.8918573e-05, %v351_v23  ;;  %v129_v31 = vmul.f32 2.1237322e-06, %v353_v24  ;;  %v140_v32 = vmul.f32 3.8918573e-05, %v353_v24 }
   0xf   :  { %v50_v33 = vadd.f32 0.00028619796, %v49_v27  ;;  %v61_v34 = vadd.f32 0.001143296, %v60_v28  ;;  %v90_v35 = vadd.f32 0.00028619796, %v89_v29 }
  0x10   :  { %v101_v36 = vadd.f32 0.001143296, %v100_v30  ;;  %v130_v37 = vadd.f32 0.00028619796, %v129_v31  ;;  %v141_v38 = vadd.f32 0.001143296, %v140_v32 }
  0x11   :  { %v51_v40 = vmul.f32 %v50_v33, %v349_v22  ;;  %v62_v41 = vmul.f32 %v61_v34, %v349_v22  ;;  %v91_v42 = vmul.f32 %v90_v35, %v351_v23  ;;  %v169_v43 = vmul.f32 2.1237322e-06, %v355_v25 }
  0x12   :  { %v102_v44 = vmul.f32 %v101_v36, %v351_v23  ;;  %v131_v45 = vmul.f32 %v130_v37, %v353_v24  ;;  %v142_v46 = vmul.f32 %v141_v38, %v353_v24  ;;  %v180_v61 = vmul.f32 3.8918573e-05, %v355_v25 }
  0x13   :  { %v52_v47 = vadd.f32 0.0036580483, %v51_v40  ;;  %v63_v48 = vadd.f32 0.014752088, %v62_v41  ;;  %v92_v49 = vadd.f32 0.0036580483, %v91_v42  ;;  %v207_v37 = vmul.f32 %v384_v4, %v384_v4 }
  0x14   :  { %v103_v50 = vadd.f32 0.014752088, %v102_v44  ;;  %v132_v51 = vadd.f32 0.0036580483, %v131_v45  ;;  %v143_v52 = vadd.f32 0.014752088, %v142_v46 }
  0x15   :  { %v53_v54 = vmul.f32 %v52_v47, %v349_v22  ;;  %v64_v55 = vmul.f32 %v63_v48, %v349_v22  ;;  %v93_v56 = vmul.f32 %v92_v49, %v351_v23  ;;  %v170_v57 = vadd.f32 0.00028619796, %v169_v43 }
  0x16   :  { %v104_v58 = vmul.f32 %v103_v50, %v351_v23  ;;  %v133_v59 = vmul.f32 %v132_v51, %v353_v24  ;;  %v144_v60 = vmul.f32 %v143_v52, %v353_v24  ;;  %v181_v20 = vadd.f32 0.001143296, %v180_v61 }
  0x17   :  { %v54_v62 = vadd.f32 0.05243302, %v53_v54  ;;  %v65_v63 = vadd.f32 0.112945676, %v64_v55  ;;  %v94_v0 = vadd.f32 0.05243302, %v93_v56  ;;  %v171_v1 = vmul.f32 %v170_v57, %v355_v25 }
  0x18   :  { %v105_v2 = vadd.f32 0.112945676, %v104_v58  ;;  %v134_v3 = vadd.f32 0.05243302, %v133_v59  ;;  %v145_v8 = vadd.f32 0.112945676, %v144_v60  ;;  %v182_v36 = vmul.f32 %v181_v20, %v355_v25 }
  0x19   :  { %v55_v5 = vmul.f32 %v54_v62, %v349_v22  ;;  %v66_v6 = vmul.f32 %v65_v63, %v349_v22  ;;  %v95_v7 = vmul.f32 %v94_v0, %v351_v23  ;;  %v172_v19 = vadd.f32 0.0036580483, %v171_v1 }
  0x1a   :  { %v106_v9 = vmul.f32 %v105_v2, %v351_v23  ;;  %v135_v18 = vmul.f32 %v134_v3, %v353_v24  ;;  %v146_v28 = vmul.f32 %v145_v8, %v353_v24  ;;  %v183_v42 = vadd.f32 0.014752088, %v182_v36 }
  0x1b   :  { %v56_v21 = vadd.f32 0.18741608, %v55_v5  ;;  %v67_v26 = vadd.f32 0.4994258, %v66_v6  ;;  %v96_v27 = vadd.f32 0.18741608, %v95_v7  ;;  %v173_v33 = vmul.f32 %v172_v19, %v355_v25 }
  0x1c   :  { %v107_v29 = vadd.f32 0.4994258, %v106_v9  ;;  %v136_v31 = vadd.f32 0.18741608, %v135_v18  ;;  %v147_v32 = vadd.f32 0.4994258, %v146_v28  ;;  %v184_v49 = vmul.f32 %v183_v42, %v355_v25 }
  0x1d   :  { %v68_v30 = vmul.f32 %v67_v26, %v349_v22  ;;  %v57_v34 = vmul.f32 %v56_v21, %v349_v22  ;;  %v97_v39 = vmul.f32 %v96_v27, %v351_v23  ;;  %v174_v44 = vadd.f32 0.05243302, %v173_v33 }
  0x1e   :  { %v108_v35 = vmul.f32 %v107_v29, %v351_v23  ;;  %v148_v41 = vmul.f32 %v147_v32, %v353_v24  ;;  %v137_v43 = vmul.f32 %v136_v31, %v353_v24  ;;  %v402_v22 = vmin.f32 %v207_v37, 16.0 }
  0x1f   :  { %v69_v38 = vadd.f32 1.0, %v68_v30  ;;  %v58_v45 = vadd.f32 1.1283791, %v57_v34  ;;  %v98_v46 = vadd.f32 1.1283791, %v97_v39  ;;  %v175_v51 = vmul.f32 %v174_v44, %v355_v25 }
  0x20   :  { %v109_v40 = vadd.f32 1.0, %v108_v35  ;;  %v404_v48 = vadd.f32 1.0, %v148_v41  ;;  %v138_v23 = vadd.f32 1.1283791, %v137_v43  ;;  %v209_v52 = vmul.f32 2.1237322e-06, %v402_v22 }
  0x21   :  { %273 = vrcp.f32 %v69_v38  ;;  %v79_v47 = vand.u32 2147483647, %v69_v38  ;;  %v81_v50 = vand.u32 2147483648, %v69_v38  ;;  %v59_v54 = vmul.f32 %v58_v45, %v330_v14 }
  0x22   :  { %275 = vrcp.f32 %v109_v40  ;;  %vm75_vm0 = vweird.f32 %v69_v38  ;;  %v220_v24 = vmul.f32 3.8918573e-05, %v402_v22  ;;  %v99_v56 = vmul.f32 %v98_v46, %v333_v15 }
  0x23   :  { %277 = vrcp.f32 %v404_v48  ;;  %v119_v57 = vand.u32 2147483647, %v109_v40  ;;  %v185_v58 = vadd.f32 0.112945676, %v184_v49  ;;  %v210_v59 = vadd.f32 0.00028619796, %v209_v52 }
  0x24   :  { %vm413_vm1 = vcmp.eq.f32.partialorder %v79_v47, 8.507059e+37  ;;  %vm115_vm2 = vweird.f32 %v109_v40  ;;  %v121_v63 = vand.u32 2147483648, %v109_v40  ;;  %v82_v14 = vor.u32 1.1754944e-38, %v81_v50 }
  0x25   :  { %v176_v1 = vadd.f32 0.18741608, %v175_v51  ;;  %v186_v2 = vmul.f32 %v185_v58, %v355_v25  ;;  %v211_v15 = vmul.f32 %v210_v59, %v402_v22  ;;  %v221_v5 = vadd.f32 0.001143296, %v220_v24 }
  0x26   :  { %vm419_vm5 = vcmp.eq.f32.partialorder %v119_v57, 8.507059e+37  ;;  %v122_v19 = vor.u32 1.1754944e-38, %v121_v63  ;;  %vm155_vm6 = vweird.f32 %v404_v48  ;;  %v159_v28 = vand.u32 2147483647, %v404_v48 }
  0x27   :  { %v274_v55 = vpop.eup %273  ;;  %v187_v8 = vadd.f32 0.4994258, %v186_v2  ;;  %v222_v20 = vmul.f32 %v221_v5, %v402_v22  ;;  %v161_v32 = vand.u32 2147483648, %v404_v48  ;;  %v212_v33 = vadd.f32 0.0036580483, %v211_v15 }
  0x28   :  { %v276_v60 = vpop.eup %275  ;;  %v71_v61 = vmul.f32 %v274_v55, %v69_v38  ;;  %vm76_vm3 = vweird.f32 %v274_v55  ;;  %v139_v39 = vmul.f32 %v138_v23, %v336_v16  ;;  %vm160_vm11 = vcmp.eq.f32.partialorder %v159_v28, 8.507059e+37 }
  0x29   :  { %v111_v0 = vmul.f32 %v276_v60, %v109_v40  ;;  %vm116_vm4 = vweird.f32 %v276_v60  ;;  %v278_v9 = vpop.eup %277  ;;  %vm426_vm7 = vmor %vm75_vm0, %vm76_vm3  ;;  %v188_v29 = vmul.f32 %v187_v8, %v355_v25  ;;  %v223_v34 = vadd.f32 0.014752088, %v222_v20 }
  0x2a   :  { %v72_v3 = vsub.f32 1.0, %v71_v61  ;;  %v151_v27 = vmul.f32 %v278_v9, %v404_v48  ;;  %vm434_vm8 = vmor %vm115_vm2, %vm116_vm4  ;;  %vm156_vm9 = vweird.f32 %v278_v9  ;;  %v162_v46 = vor.u32 1.1754944e-38, %v161_v32 }
  0x2b   :  { %v112_v6 = vsub.f32 1.0, %v111_v0  ;;  %v189_v37 = vadd.f32 1.0, %v188_v29  ;;  %v224_v41 = vmul.f32 %v223_v34, %v402_v22  ;;  %vm157_vm10 = vmor %vm155_vm6, %vm156_vm9  ;;  %v213_v16 = vmul.f32 %v212_v33, %v402_v22 }
  0x2c   :  { %v73_v18 = vmul.f32 %v274_v55, %v72_v3  ;;  %v152_v36 = vsub.f32 1.0, %v151_v27  ;;  %v177_v50 = vmul.f32 %v176_v1, %v355_v25  ;;  %v37_v23 = vmul.f32 0.5, %v321_v10 }
  0x2d   :  { %v113_v26 = vmul.f32 %v276_v60, %v112_v6  ;;  %279 = vrcp.f32 %v189_v37  ;;  %v225_v52 = vadd.f32 0.112945676, %v224_v41  ;;  %v214_v48 = vadd.f32 0.05243302, %v213_v16 }
  0x2e   :  { %v74_v30 = vadd.f32 %v274_v55, %v73_v18  ;;  %v153_v43 = vmul.f32 %v278_v9, %v152_v36  ;;  %v178_v63 = vadd.f32 1.1283791, %v177_v50  ;;  %vm195_vm12 = vweird.f32 %v189_v37 }
  0x2f   :  { %v114_v35 = vadd.f32 %v276_v60, %v113_v26  ;;  %v226_v59 = vmul.f32 %v225_v52, %v402_v22  ;;  %v201_v2 = vand.u32 2147483648, %v189_v37  ;;  %v215_v15 = vmul.f32 %v214_v48, %v402_v22 }
  0x30   :  { %v78_v38 = vsel %vm426_vm7, %v274_v55, %v74_v30  ;;  %v154_v49 = vadd.f32 %v278_v9, %v153_v43  ;;  %v40_v30 = vmul.f32 0.5, %v327_v13  ;;  %v41_v43 = vmul.f32 0.5, %v373_v53 }
  0x31   :  { %v83_v40 = vsel %vm413_vm1, %v82_v14, %v78_v38  ;;  %v118_v42 = vsel %vm434_vm8, %v276_v60, %v114_v35  ;;  %v227_v10 = vadd.f32 0.4994258, %v226_v59  ;;  %v202_v18 = vor.u32 1.1754944e-38, %v201_v2 }
  0x32   :  { %v84_v44 = vmul.f32 %v83_v40, %v59_v54  ;;  %v123_v45 = vsel %vm419_vm5, %v122_v19, %v118_v42  ;;  %v38_v54 = vmul.f32 0.5, %v323_v11  ;;  %v158_v55 = vsel %vm157_vm10, %v278_v9, %v154_v49 }
  0x33   :  { %v124_v47 = vmul.f32 %v123_v45, %v99_v56  ;;  %v163_v58 = vsel %vm160_vm11, %v162_v46, %v158_v55  ;;  %v280_v60 = vpop.eup %279  ;;  %v39_v56 = vmul.f32 0.5, %v325_v12  ;;  %v199_v11 = vand.u32 2147483647, %v189_v37 }
  0x34   :  { %v266_v51 = vclamps-f32 %v84_v44, 1.0  ;;  %v164_v62 = vmul.f32 %v163_v58, %v139_v39  ;;  %v191_v14 = vmul.f32 %v280_v60, %v189_v37  ;;  %vm196_vm13 = vweird.f32 %v280_v60 }
  0x35   :  { %v267_v24 = vclamps-f32 %v124_v47, 1.0  ;;  %v228_v12 = vmul.f32 %v227_v10, %v402_v22  ;;  %v179_v9 = vmul.f32 %v178_v63, %v339_v17  ;;  %vm197_vm14 = vmor %vm195_vm12, %vm196_vm13  ;;  %vm200_vm15 = vcmp.eq.f32.partialorder %v199_v11, 8.507059e+37 }
  0x36   :  { %v247_v57 = vadd.f32 1.0, %v266_v51  ;;  %v268_v1 = vclamps-f32 %v164_v62, 1.0  ;;  %v192_v3 = vsub.f32 1.0, %v191_v14  ;;  %v216_v20 = vadd.f32 0.18741608, %v215_v15 }
  0x37   :  { %v248_v61 = vadd.f32 1.0, %v267_v24  ;;  %v229_v7 = vadd.f32 1.0, %v228_v12 }
  0x38   :  { %v252_v25 = vmul.f32 %v247_v57, %v37_v23  ;;  %v249_v5 = vadd.f32 1.0, %v268_v1  ;;  %v193_v6 = vmul.f32 %v280_v60, %v192_v3  ;;  %v217_v28 = vmul.f32 %v216_v20, %v402_v22 }
  0x39   :  { %v253_v0 = vmul.f32 %v248_v61, %v38_v54  ;;  %281 = vrcp.f32 %v229_v7  ;;  %v241_v34 = vand.u32 2147483648, %v229_v7  ;;  %vm235_vm0 = vweird.f32 %v229_v7 }
  0x3a   :  { %257 = vst [vmem:[%s483_s3] sm:$0xff] %v252_v25  ;;  %v254_v8 = vmul.f32 %v249_v5, %v39_v56  ;;  %v194_v19 = vadd.f32 %v280_v60, %v193_v6  ;;  %v218_v33 = vadd.f32 1.1283791, %v217_v28  ;;  %v239_v36 = vand.u32 2147483647, %v229_v7 }
  0x3b   :  { %258 = vst [vmem:[%s483_s3 + $0x8] sm:$0xff] %v253_v0  ;;  %v242_v22 = vor.u32 1.1754944e-38, %v241_v34 }
  0x3c   :  { %259 = vst [vmem:[%s483_s3 + $0x10] sm:$0xff] %v254_v8  ;;  %v198_v21 = vsel %vm197_vm14, %v280_v60, %v194_v19  ;;  %v219_v39 = vmul.f32 %v218_v33, %v384_v4  ;;  %vm240_vm3 = vcmp.eq.f32.partialorder %v239_v36, 8.507059e+37 }
  0x3d   :  { %v203_v26 = vsel %vm200_vm15, %v202_v18, %v198_v21 }
  0x3e   :  { %v204_v27 = vmul.f32 %v203_v26, %v179_v9 }
  0x3f   :  { %v282_v29 = vpop.eup %281 }
  0x40   :  { %v269_v17 = vclamps-f32 %v204_v27, 1.0  ;;  %v231_v31 = vmul.f32 %v282_v29, %v229_v7  ;;  %vm236_vm1 = vweird.f32 %v282_v29 }
  0x41   :  { %vm237_vm2 = vmor %vm235_vm0, %vm236_vm1 }
  0x42   :  { %v250_v32 = vadd.f32 1.0, %v269_v17  ;;  %v232_v35 = vsub.f32 1.0, %v231_v31 }
  0x44   :  { %v255_v37 = vmul.f32 %v250_v32, %v40_v30  ;;  %v233_v38 = vmul.f32 %v282_v29, %v232_v35 }
  0x46   :  { %260 = vst [vmem:[%s483_s3 + $0x18] sm:$0xff] %v255_v37  ;;  %v234_v13 = vadd.f32 %v282_v29, %v233_v38 }
  0x48   :  { %v238_v41 = vsel %vm237_vm2, %v282_v29, %v234_v13 }
  0x49   :  { %v243_v40 = vsel %vm240_vm3, %v242_v22, %v238_v41 }
  0x4a   :  { %v244_v42 = vmul.f32 %v243_v40, %v219_v39 }
  0x4c   :  { %v270_v44 = vclamps-f32 %v244_v42, 1.0 }
  0x4e   :  { %v251_v45 = vadd.f32 1.0, %v270_v44 }
  0x50   :  { %v256_v46 = vmul.f32 %v251_v45, %v41_v43 }
  0x52   :  { %261 = vst [vmem:[%s483_s3 + $0x20] sm:$0xff] %v256_v46 }

// kernel: stem_forward.6
= control target key start
LH: loop header
LB: loop body
LE: loop exit
PB: predicated region body
PF: predicated region fallthrough
CT: control target
= control target key end

     0   :  { %s2472_s18 = smov 0   ;;  %s2474_s19 = smov 0   ;;  %s3115_s0 = inlined_call_operand.vmem [shape: bf16[2,1,110,32], index: 0, kind: input, shape index: {}]   ;;  %s3116_s1 = inlined_call_operand.vmem [shape: bf16[9,32,32], index: 1, kind: input, shape index: {}]   ;;  %s3117_s2 = inlined_call_operand.vmem [shape: f32[1,80,1], index: 2, kind: input, shape index: {}]   ;;  %s3118_s3 = inlined_call_operand.vmem [shape: f32[2,1,80,32], index: 3, kind: output, shape index: {0}]   ;;  %s3119_s4 = inlined_call_operand.vmem [shape: f32[1,32], index: 4, kind: output, shape index: {1}]   ;;  %s3120_s5 = inlined_call_operand.vmem [shape: f32[1,32], index: 5, kind: output, shape index: {2}]  }
   0x1   :  { %s2476_s20 = smov 0  }
   0x2 LB: > { %s28_s21 = sadd.s32 1, %s2434_s19  ;;  %p1980_p0 = scmp.ge.s32.totalorder %s2438_s20, 1  ;;  %s2438_s20 = sphi %s2476_s20, %s16_s20   ;;  %s2434_s19 = sphi %s2474_s19, %s3122_s19   ;;  %s2430_s18 = sphi %s2472_s18, %s3121_s18  }
   0x3   : > { %p30_p1 = scmp.ge.s32.totalorder %s28_s21, 2  ;;  %p212_p2 = scmp.lt.s32.totalorder %s2438_s20, 3 }
   0x5   : > { %s3124_s21 = smov (%p30_p1, %s28_s21), 0  ;;  %p213_p3 = pnand %p1980_p0, %p212_p2 }
   0x6   : > { %p253_p4 = scmp.lt.s32.totalorder (!%p213_p3), %s2430_s18, 1  ;;  %p277_p5 = scmp.eq.s32.totalorder (!%p213_p3), %s2430_s18, 0 }
   0x7   : > { %216 = sbr.rel (%p213_p3) target bundleno = 395 (0x18b), region = 32 }
   0xc   : > { %s3126_s18 = smov (!%p253_p4, %s2430_s18), 1  ;;  %282 = sbr.rel (!%p277_p5) target bundleno = 17 (0x11), region = 36  ;;  %vm283_vm0 = vcmask (%p277_p5), 253952   ;;  %v2440_v0 = vmov (%p277_p5), 0.0  }
   0xd   : > { %s2385_s22 = smul.u32 56, %s3126_s18  ;;  %284 = vst.msk [vmem:[%s3119_s4] sm:$0x1] (%p277_p5), %vm283_vm0, %v2440_v0 }
   0xe   : > { %s2386_s23 = smul.u32 80, %s3126_s18  ;;  %285 = vst.msk [vmem:[%s3120_s5] sm:$0x1] (%p277_p5), %vm283_vm0, %v2440_v0 }
   0xf   : > { %s2493_s26 = scalar_lea.vmem %s3115_s0, %s2385_s22 }
  0x10   : > { %s2498_s29 = scalar_lea.vmem %s3118_s3, %s2386_s23 }
  0x11 PF: > { %v2322_v1 = vld [vmem:[%s3116_s1 + $0x8] sm:$0xff]  ;;  %v2321_v2 = vld [vmem:[%s3116_s1] sm:$0xff]  ;;  %v2329_v4 = vld [vmem:[%s3116_s1 + $0x18] sm:$0xff]  ;;  %vm337_vm1 = vcmask 261120   ;;  %vm451_vm2 = vsmask.f32 7424 }
  0x12   : > { %2379 = vmatpush.bf16.msra.mxu1 %v2322_v1  ;;  %2380 = vmatpush.bf16.msra.mxu2 %v2322_v1  ;;  %v2336_v3 = vld [vmem:[%s3116_s1 + $0x28] sm:$0xff]  ;;  %v2318_v6 = vld [vmem:[%s2493_s26 + $0x10] sm:$0xff]  ;;  %v2316_v7 = vld [vmem:[%s2493_s26] sm:$0xff]  ;;  %vm631_vm3 = vcmask 1046528   ;;  %vm924_vm4 = vsmask.f32 6400 }
  0x13   : > { %359 = vmatpush.bf16.msra.mxu0 %v2322_v1  ;;  %2381 = vmatpush.bf16.msra.mxu3 %v2322_v1  ;;  %v2317_v5 = vld [vmem:[%s2493_s26 + $0x8] sm:$0xff]  ;;  %v2323_v8 = vld [vmem:[%s2493_s26] sm:$0xff]  ;;  %v2343_v9 = vld [vmem:[%s3116_s1 + $0x38] sm:$0xff]  ;;  %vm1113_vm5 = vcmask 1045504   ;;  %vm1406_vm6 = vsmask.f32 5376 }
  0x14   : > { %v2335_v10 = vld [vmem:[%s3116_s1 + $0x20] sm:$0xff]  ;;  %v2328_v12 = vld [vmem:[%s3116_s1 + $0x10] sm:$0xff]  ;;  %v2357_v13 = vld [vmem:[%s3116_s1 + $0x58] sm:$0xff]  ;;  %v455_v17 = vshll.u32 %v2323_v8, 16  ;;  %v453_v23 = vshrl.u32 %v2323_v8, 16  ;;  %vm1595_vm7 = vcmask 1044480  }
  0x15   : > { %v2320_v11 = vld [vmem:[%s2493_s26 + $0x20] sm:$0xff]  ;;  %v2364_v14 = vld [vmem:[%s3116_s1 + $0x68] sm:$0xff]  ;;  %v2342_v18 = vld [vmem:[%s3116_s1 + $0x30] sm:$0xff]  ;;  %vm1815_vm8 = vcmask 253952  }
  0x16   : > { %2382 = vmatpush.bf16.msra.mxu1 %v2321_v2  ;;  %2383 = vmatpush.bf16.msra.mxu2 %v2321_v2  ;;  %v2350_v15 = vld [vmem:[%s3116_s1 + $0x48] sm:$0xff]  ;;  %v2371_v19 = vld [vmem:[%s3116_s1 + $0x78] sm:$0xff]  ;;  %v2097_v20 = vld [vmem:[%s2493_s26 + $0x4] sm:$0xe]  ;;  %v457_v24 = vrot.slane %v455_v17, 1 }
  0x17   : > { %360 = vmatpush.bf16.msra.mxu0 %v2321_v2  ;;  %2384 = vmatpush.bf16.msra.mxu3 %v2321_v2  ;;  %v2324_v16 = vld [vmem:[%s2493_s26 + $0x8] sm:$0xff]  ;;  %v2349_v22 = vld [vmem:[%s3116_s1 + $0x40] sm:$0xff]  ;;  %v2319_v40 = vld [vmem:[%s2493_s26 + $0x18] sm:$0xff] }
  0x18   : > { %v2337_v21 = vld [vmem:[%s2493_s26 + $0x4] sm:$0xf0]  ;;  %v460_v25 = vshll.u32 %v2324_v16, 16  ;;  %v2338_v26 = vld [vmem:[%s2493_s26 + $0xc] sm:$0xff]  ;;  %v2134_v28 = vld [vmem:[%s2493_s26 + $0x4] sm:$0xe]  ;;  %v458_v30 = vor.u32 %v457_v24, %v453_v23 }
  0x19   : > { %2013 = vmatmul.msk.bf16.vlgmr.msra.gmra.mxu1 %vm337_vm1, %v2317_v5  ;;  %2014 = vmatmul.msk.bf16.vlgmr.msra.gmra.mxu2 %vm337_vm1, %v2318_v6  ;;  %v2098_v27 = vor.u32 %v2337_v21, %v2097_v20  ;;  %v2344_v29 = vld [vmem:[%s2493_s26 + $0x4] sm:$0xf0]  ;;  %v2345_v32 = vld [vmem:[%s2493_s26 + $0xc] sm:$0xff]  ;;  %v779_v35 = vrot.slane %v2338_v26, 1  ;;  %v2060_v51 = vld [vmem:[%s2493_s26] sm:$0xe] }
  0x1a   : > { %676 = vmatpush.bf16.msrb.mxu2 %v2336_v3  ;;  %529 = vmatpush.bf16.msrb.mxu1 %v2329_v4  ;;  %v462_v31 = vrot.slane %v460_v25, 1  ;;  %v2135_v33 = vor.u32 %v2344_v29, %v2134_v28  ;;  %v934_v38 = vshrl.u32 %v2345_v32, 16  ;;  %v937_v39 = vshll.u32 %v2345_v32, 16  ;;  %v2378_v49 = vld [vmem:[%s3116_s1 + $0x88] sm:$0xff]  ;;  %v2325_v50 = vld [vmem:[%s2493_s26 + $0x10] sm:$0xff]  ;;  %v2347_v20 = vld [vmem:[%s2493_s26 + $0x1c] sm:$0xff] }
  0x1b   : > { %2012 = vmatmul.msk.bf16.vlgmr.msra.gmra.mxu0 %vm337_vm1, %v2316_v7  ;;  %822 = vmatpush.bf16.msrb.mxu3 %v2343_v9  ;;  %v778_v34 = vrot.slane %v2098_v27, 1  ;;  %v2330_v52 = vld [vmem:[%s2493_s26] sm:$0xf0]  ;;  %v464_v54 = vshrl.u32 %v2324_v16, 16  ;;  %v468_v55 = vshll.u32 %v2325_v50, 16  ;;  %v2331_v56 = vld [vmem:[%s2493_s26 + $0x8] sm:$0xff] }
  0x1c   : > { %2016 = vmatmul.msk.bf16.vlgmr.msra.gmra.mxu3 %vm337_vm1, %v2320_v11  ;;  %1011 = vmatpush.bf16.msrb.mxu0 %v2350_v15  ;;  %v926_v36 = vshrl.u32 %v2135_v33, 16  ;;  %v929_v37 = vshll.u32 %v2135_v33, 16  ;;  %v463_v41 = vsel %vm451_vm2, %v458_v30, %v462_v31  ;;  %v936_v44 = vrot.slane %v934_v38, 1  ;;  %v2339_v58 = vld [vmem:[%s2493_s26 + $0x14] sm:$0xff]  ;;  %v2340_v16 = vld [vmem:[%s2493_s26 + $0x1c] sm:$0xff] }
  0x1d   : > { %v939_v45 = vrot.slane %v937_v39, 2  ;;  %v780_v46 = vsel %vm631_vm3, %v778_v34, %v779_v35  ;;  %v2061_v57 = vor.u32 %v2330_v52, %v2060_v51  ;;  %v466_v59 = vor.u32 %v464_v54, %v462_v31  ;;  %v2346_v63 = vld [vmem:[%s2493_s26 + $0x14] sm:$0xff]  ;;  %v2327_v31 = vld [vmem:[%s2493_s26 + $0x20] sm:$0xff]  ;;  %v744_v51 = vld [vmem:[%s2493_s26 + $0x2c] sm:$0x1] }
  0x1e   : > { %677 = vmatpush.bf16.msrb.mxu2 %v2335_v10  ;;  %530 = vmatpush.bf16.msrb.mxu1 %v2328_v12  ;;  %v928_v42 = vrot.slane %v926_v36, 1  ;;  %v931_v43 = vrot.slane %v929_v37, 2  ;;  %v470_v60 = vrot.slane %v468_v55, 1  ;;  %v633_v62 = vrot.slane %v2331_v56, 1  ;;  %v2356_v9 = vld [vmem:[%s3116_s1 + $0x50] sm:$0xff]  ;;  %v2363_v10 = vld [vmem:[%s3116_s1 + $0x60] sm:$0xff] }
  0x1f   : > { %823 = vmatpush.bf16.msrb.mxu3 %v2342_v18  ;;  %v940_v48 = vor.u32 %v939_v45, %v936_v44  ;;  %v632_v61 = vrot.slane %v2061_v57, 1  ;;  %v781_v0 = vrot.slane %v2339_v58, 1  ;;  %v943_v1 = vshrl.u32 %v2346_v63, 16  ;;  %v2326_v11 = vld [vmem:[%s2493_s26 + $0x18] sm:$0xff]  ;;  %v2332_v15 = vld [vmem:[%s2493_s26 + $0x10] sm:$0xff]  ;;  %v2341_v36 = vld [vmem:[%s2493_s26 + $0x24] sm:$0xff] }
  0x20   : > { %1012 = vmatpush.bf16.msrb.mxu0 %v2349_v22  ;;  %v932_v47 = vor.u32 %v931_v43, %v928_v42  ;;  %v946_v2 = vshll.u32 %v2346_v63, 16  ;;  %v471_v3 = vsel %vm451_vm2, %v466_v59, %v470_v60  ;;  %v783_v21 = vrot.slane %v2340_v16, 1  ;;  %v2370_v30 = vld [vmem:[%s3116_s1 + $0x70] sm:$0xff]  ;;  %v2334_v59 = vld [vmem:[%s2493_s26 + $0x20] sm:$0xff] }
  0x21   : > { %v634_v4 = vsel %vm631_vm3, %v632_v61, %v633_v62  ;;  %v945_v5 = vrot.slane %v943_v1, 1  ;;  %v782_v7 = vsel %vm631_vm3, %v779_v35, %v781_v0  ;;  %v952_v22 = vshrl.u32 %v2347_v20, 16  ;;  %v2333_v35 = vld [vmem:[%s2493_s26 + $0x18] sm:$0xff] }
  0x22   : > { %1304 = vmatpush.bf16.msra.mxu2 %v2364_v14  ;;  %1158 = vmatpush.bf16.msra.mxu1 %v2357_v13  ;;  %v941_v53 = vsel %vm924_vm4, %v932_v47, %v940_v48  ;;  %v948_v6 = vrot.slane %v946_v2, 2  ;;  %v472_v13 = vshrl.u32 %v2325_v50, 16  ;;  %v476_v14 = vshll.u32 %v2326_v11, 16 }
  0x23   : > { %1493 = vmatpush.bf16.msra.mxu3 %v2371_v19  ;;  %v635_v19 = vrot.slane %v2332_v15, 1  ;;  %v955_v23 = vshll.u32 %v2347_v20, 16  ;;  %v954_v26 = vrot.slane %v952_v22, 1  ;;  %v784_v28 = vsel %vm631_vm3, %v781_v0, %v783_v21  ;;  %v2366_v15 = vld [vmem:[%s2493_s26 + $0x10] sm:$0xff]  ;;  %v2351_v20 = vld [vmem:[%s2493_s26 + $0x4] sm:$0xf0] }
  0x24   : > { %1640 = vmatpush.bf16.msra.mxu0 %v2378_v49  ;;  %v949_v8 = vor.u32 %v948_v6, %v945_v5  ;;  %v474_v17 = vor.u32 %v472_v13, %v470_v60  ;;  %v478_v18 = vrot.slane %v476_v14, 1  ;;  %v480_v33 = vshrl.u32 %v2326_v11, 16  ;;  %v890_v60 = vld [vmem:[%s2493_s26 + $0x2c] sm:$0x3]  ;;  %v2245_v6 = vld [vmem:[%s2493_s26 + $0x8] sm:$0xc] }
  0x25   : > { %v636_v25 = vsel %vm631_vm3, %v633_v62, %v635_v19  ;;  %v957_v27 = vrot.slane %v955_v23, 2  ;;  %v484_v34 = vshll.u32 %v2327_v31, 16  ;;  %v637_v39 = vrot.slane %v2333_v35, 1 }
  0x26   : > { %v950_v12 = vsel %vm924_vm4, %v940_v48, %v949_v8  ;;  %1159 = vmatpush.bf16.msra.mxu1 %v2356_v9  ;;  %1305 = vmatpush.bf16.msra.mxu2 %v2363_v10  ;;  %v479_v24 = vsel %vm451_vm2, %v474_v17, %v478_v18  ;;  %v482_v37 = vor.u32 %v480_v33, %v478_v18  ;;  %v785_v42 = vrot.slane %v2341_v36, 1 }
  0x27   : > { %v958_v29 = vor.u32 %v957_v27, %v954_v26  ;;  %1494 = vmatpush.bf16.msra.mxu3 %v2370_v30  ;;  %v486_v38 = vrot.slane %v484_v34, 1  ;;  %v771_v56 = vunpack.c.l.b16 %v744_v51  ;;  %v488_v57 = vshrl.u32 %v2327_v31, 16  ;;  %v2352_v26 = vld [vmem:[%s2493_s26 + $0xc] sm:$0xff] }
  0x28   : > { %v786_v50 = vsel %vm631_vm3, %v783_v21, %v785_v42  ;;  %v917_v62 = vunpack.c.l.b16 %v890_v60  ;;  %v639_v1 = vrot.slane %v2334_v59, 1  ;;  %v1416_v23 = vshrl.u32 %v2366_v15, 16 }
  0x29   : > { %2015 = vmatmul.msk.bf16.gmra.mxu2 %vm337_vm1, %v2319_v40  ;;  %2049 = vmatmul.msk.bf16.vlgmr.msrb.gmra.mxu1 %vm337_vm1, %v463_v41  ;;  %v959_v32 = vsel %vm924_vm4, %v949_v8, %v958_v29  ;;  %v2348_v40 = vld [vmem:[%s2493_s26 + $0x24] sm:$0xff]  ;;  %v487_v45 = vsel %vm451_vm2, %v482_v37, %v486_v38  ;;  %v777_v61 = vpack.c.b16 %v771_v56, %v771_v56  ;;  %v1115_v34 = vrot.slane %v2352_v26, 2 }
  0x2a   : > { %v417_v41 = vld [vmem:[%s2493_s26 + $0x28] sm:$0x1]  ;;  %v961_v43 = vshrl.u32 %v2348_v40, 16  ;;  %v964_v44 = vshll.u32 %v2348_v40, 16  ;;  %v490_v63 = vor.u32 %v488_v57, %v486_v38  ;;  %v923_v2 = vpack.c.b16 %v917_v62, %v917_v62  ;;  %v2282_v37 = vld [vmem:[%s2493_s26 + $0x8] sm:$0x8] }
  0x2b   : > { %2160 = vmatmul.msk.bf16.vlgmr.msrb.gmra.mxu0 %vm337_vm1, %v941_v53  ;;  %v444_v47 = vunpack.c.l.b16 %v417_v41  ;;  %v2377_v53 = vld [vmem:[%s3116_s1 + $0x80] sm:$0xff]  ;;  %v640_v9 = vsel %vm631_vm3, %v637_v39, %v639_v1  ;;  %v1418_v30 = vrot.slane %v1416_v23, 2  ;;  %v2372_v38 = vld [vmem:[%s2493_s26 + $0x8] sm:$0xf0]  ;;  %v2373_v41 = vld [vmem:[%s2493_s26 + $0x10] sm:$0xff] }
  0x2c   : > { %2123 = vmatmul.msk.bf16.vlgmr.msrb.gmra.mxu3 %vm337_vm1, %v780_v46  ;;  %v638_v46 = vsel %vm631_vm3, %v635_v19, %v637_v39  ;;  %v963_v48 = vrot.slane %v961_v43, 1  ;;  %v966_v49 = vrot.slane %v964_v44, 2  ;;  %1641 = vmatpush.bf16.msra.mxu0 %v2377_v53  ;;  %v973_v5 = vshll.u32 %v923_v2, 16  ;;  %v2171_v19 = vld [vmem:[%s2493_s26 + $0x4] sm:$0xc]  ;;  %v2367_v44 = vld [vmem:[%s2493_s26 + $0x18] sm:$0xff] }
  0x2d   : > { %v450_v54 = vpack.c.b16 %v444_v47, %v444_v47  ;;  %v2172_v27 = vor.u32 %v2351_v20, %v2171_v19  ;;  %v2208_v47 = vld [vmem:[%s2493_s26 + $0x8] sm:$0xc]  ;;  %v1428_v51 = vshll.u32 %v2367_v44, 16  ;;  %v2359_v53 = vld [vmem:[%s2493_s26 + $0x10] sm:$0xff]  ;;  %v1718_v20 = vld [vmem:[%s3117_s2] sm:$0xff] }
  0x2e   : > { %v967_v52 = vor.u32 %v966_v49, %v963_v48  ;;  %v975_v11 = vrot.slane %v973_v5, 2  ;;  %v2358_v48 = vld [vmem:[%s2493_s26 + $0x8] sm:$0xf0]  ;;  %v1261_v59 = vrot.slane %v2359_v53, 2 }
  0x2f   : > { %v492_v58 = vshll.u32 %v450_v54, 16  ;;  %v1114_v33 = vrot.slane %v2172_v27, 2  ;;  %v2209_v54 = vor.u32 %v2358_v48, %v2208_v47  ;;  %v1430_v56 = vrot.slane %v1428_v51, 3  ;;  %v2369_v19 = vld [vmem:[%s2493_s26 + $0x28] sm:$0xff] }
  0x30   : > { %v968_v55 = vsel %vm924_vm4, %v958_v29, %v967_v52  ;;  %v1446_v26 = vshll.u32 %v2369_v19, 16  ;;  %v1079_v47 = vld [vmem:[%s2493_s26 + $0x2c] sm:$0x3] }
  0x31   : > { %v494_v0 = vrot.slane %v492_v58, 1  ;;  %v1116_v40 = vsel %vm1113_vm5, %v1114_v33, %v1115_v34  ;;  %v1260_v58 = vrot.slane %v2209_v54, 2  ;;  %v2376_v48 = vld [vmem:[%s2493_s26 + $0x28] sm:$0xff]  ;;  %v1106_v53 = vunpack.c.l.b16 %v1079_v47  ;;  %v1720_v54 = vld [vmem:[%s3117_s2 + $0x10] sm:$0xff] }
  0x32   : > { %v1448_v33 = vrot.slane %v1446_v26, 3 }
  0x33   : > { %v495_v8 = vsel %vm451_vm2, %v490_v63, %v494_v0  ;;  %v1262_v62 = vsel %vm1113_vm5, %v1260_v58, %v1261_v59  ;;  %v2374_v63 = vld [vmem:[%s2493_s26 + $0x18] sm:$0xff] }
  0x39   : > { %2050 = vmatmul.msk.bf16.gmra.mxu1 %vm337_vm1, %v471_v3  ;;  %2086 = vmatmul.msk.bf16.vlgmr.msrb.gmra.mxu2 %vm337_vm1, %v634_v4  ;;  %v787_v3 = vrot.slane %v777_v61, 1  ;;  %v970_v4 = vshrl.u32 %v923_v2, 16  ;;  %v1599_v2 = vrot.slane %v2374_v63, 3 }
  0x3b   : > { %2161 = vmatmul.msk.bf16.gmra.mxu0 %vm337_vm1, %v950_v12  ;;  %v972_v10 = vrot.slane %v970_v4, 1  ;;  %v597_v12 = vld [vmem:[%s2493_s26 + $0x28] sm:$0x1]  ;;  %v788_v13 = vsel %vm631_vm3, %v785_v42, %v787_v3  ;;  %v2283_v42 = vor.u32 %v2372_v38, %v2282_v37 }
  0x3c   : > { %2124 = vmatmul.msk.bf16.gmra.mxu3 %vm337_vm1, %v782_v7  ;;  %v2365_v7 = vld [vmem:[%s2493_s26 + $0x8] sm:$0xf0]  ;;  %v624_v17 = vunpack.c.l.b16 %v597_v12 }
  0x3d   : > { %v976_v14 = vor.u32 %v975_v11, %v972_v10  ;;  %v2246_v16 = vor.u32 %v2365_v7, %v2245_v6  ;;  %v2354_v6 = vld [vmem:[%s2493_s26 + $0x1c] sm:$0xff] }
  0x3e   : > { %v2360_v7 = vld [vmem:[%s2493_s26 + $0x18] sm:$0xff]  ;;  %v1119_v10 = vrot.slane %v2354_v6, 2 }
  0x3f   : > { %v977_v18 = vsel %vm924_vm4, %v967_v52, %v976_v14  ;;  %v1408_v21 = vshrl.u32 %v2246_v16, 16  ;;  %v1411_v22 = vshll.u32 %v2246_v16, 16  ;;  %v2353_v52 = vld [vmem:[%s2493_s26 + $0x14] sm:$0xff]  ;;  %v1263_v11 = vrot.slane %v2360_v7, 2  ;;  %v2672_v16 = vld [vmem:[%s2493_s26 + $0x20] sm:$0xff] }
  0x40   : > { %v1117_v57 = vrot.slane %v2353_v52, 2  ;;  %v1603_v52 = vrot.slane %v2376_v48, 3 }
  0x41   : > { %v1413_v29 = vrot.slane %v1411_v22, 3  ;;  %v2441_v22 = vmov 0  }
  0x42   : > { %v1118_v61 = vsel %vm1113_vm5, %v1115_v34, %v1117_v57  ;;  %v1120_v14 = vsel %vm1113_vm5, %v1117_v57, %v1119_v10  ;;  %2413 = vset.pattern.permute.xlu0 %v2441_v22  ;;  %2414 = vset.pattern.permute.xlu1 %v2441_v22  ;;  %v1719_v34 = vld [vmem:[%s3117_s2 + $0x8] sm:$0xff] }
  0x43   : > { %1730 = vperm.xlu0 %2413, %v1718_v20   ;;  %2415 = vset.pattern.permute.xlu2 %v2441_v22 }
  0x44   : > { %1740 = vperm.xlu1 %2414, %v1720_v54   ;;  %v1725_v54 = vld [vmem:[%s3117_s2 + $0x38] sm:$0xff] }
  0x49   : > { %2051 = vmatmul.msk.bf16.gmra.mxu1 %vm337_vm1, %v479_v24  ;;  %2087 = vmatmul.msk.bf16.gmra.mxu2 %vm337_vm1, %v636_v25  ;;  %v1419_v24 = vshll.u32 %v2366_v15, 16  ;;  %v630_v25 = vpack.c.b16 %v624_v17, %v624_v17  ;;  %v1264_v15 = vsel %vm1113_vm5, %v1261_v59, %v1263_v11 }
  0x4b   : > { %2162 = vmatmul.msk.bf16.gmra.mxu0 %vm337_vm1, %v959_v32  ;;  %v1421_v31 = vrot.slane %v1419_v24, 3  ;;  %v641_v32 = vrot.slane %v630_v25, 1  ;;  %v1443_v25 = vshrl.u32 %v2369_v19, 16  ;;  %1735 = vperm.xlu0 %2413, %v1719_v34  }
  0x4c   : > { %2125 = vmatmul.msk.bf16.gmra.mxu3 %vm337_vm1, %v784_v28  ;;  %v1410_v28 = vrot.slane %v1408_v21, 2  ;;  %v1601_v21 = vrot.slane %v2672_v16, 3 }
  0x4d   : > { %v1422_v36 = vor.u32 %v1421_v31, %v1418_v30  ;;  %v642_v39 = vsel %vm631_vm3, %v639_v1, %v641_v32  ;;  %v2368_v1 = vld [vmem:[%s2493_s26 + $0x20] sm:$0xff]  ;;  %v1445_v32 = vrot.slane %v1443_v25, 2 }
  0x4e   : > { %v1414_v35 = vor.u32 %v1413_v29, %v1410_v28  ;;  %v1434_v4 = vshrl.u32 %v2368_v1, 16  ;;  %v1437_v5 = vshll.u32 %v2368_v1, 16  ;;  %v1602_v23 = vsel %vm1595_vm7, %v1599_v2, %v1601_v21  ;;  %v2692_v28 = vld [vmem:[%s2493_s26 + $0x24] sm:$0xff] }
  0x4f   : > { %v2695_v29 = vld [vmem:[%s2493_s26 + $0x20] sm:$0xff] }
  0x50   : > { %v1423_v43 = vsel %vm1406_vm6, %v1414_v35, %v1422_v36  ;;  %v1372_v35 = vld [vmem:[%s2493_s26 + $0x30] sm:$0x7]  ;;  %v1265_v37 = vrot.slane %v2695_v29, 2 }
  0x59   : > { %2052 = vmatmul.msk.bf16.gmra.mxu1 %vm337_vm1, %v487_v45  ;;  %2088 = vmatmul.msk.bf16.gmra.mxu2 %vm337_vm1, %v638_v46  ;;  %v1597_v45 = vrot.slane %v2373_v41, 3  ;;  %v1596_v46 = vrot.slane %v2283_v42, 3  ;;  %v1399_v41 = vunpack.c.l.b16 %v1372_v35 }
  0x5b   : > { %2163 = vmatmul.msk.bf16.gmra.mxu0 %vm337_vm1, %v968_v55  ;;  %v1598_v49 = vsel %vm1595_vm7, %v1596_v46, %v1597_v45  ;;  %v1600_v3 = vsel %vm1595_vm7, %v1597_v45, %v1599_v2 }
  0x5c   : > { %2126 = vmatmul.msk.bf16.gmra.mxu3 %vm337_vm1, %v786_v50  ;;  %v1425_v50 = vshrl.u32 %v2367_v44, 16  ;;  %v1266_v44 = vsel %vm1113_vm5, %v1263_v11, %v1265_v37 }
  0x5e   : > { %v1427_v55 = vrot.slane %v1425_v50, 2  ;;  %v1405_v50 = vpack.c.b16 %v1399_v41, %v1399_v41 }
  0x60   : > { %v1431_v60 = vor.u32 %v1430_v56, %v1427_v55  ;;  %v1604_v55 = vsel %vm1595_vm7, %v1601_v21, %v1603_v52  ;;  %v1452_v58 = vshrl.u32 %v1405_v50, 16  ;;  %v1455_v59 = vshll.u32 %v1405_v50, 16 }
  0x62   : > { %v1432_v0 = vsel %vm1406_vm6, %v1422_v36, %v1431_v60  ;;  %v1121_v36 = vrot.slane %v2692_v28, 2  ;;  %v1454_v1 = vrot.slane %v1452_v58, 2  ;;  %v1457_v2 = vrot.slane %v1455_v59, 3 }
  0x69   : > { %2053 = vmatmul.msk.bf16.gmra.mxu1 %vm337_vm1, %v495_v8  ;;  %2089 = vmatmul.msk.bf16.gmra.mxu2 %vm337_vm1, %v640_v9  ;;  %v1436_v8 = vrot.slane %v1434_v4, 2  ;;  %v1439_v9 = vrot.slane %v1437_v5, 3  ;;  %v1721_v5 = vld [vmem:[%s3117_s2 + $0x18] sm:$0xff] }
  0x6a   : > { %1745 = vperm.xlu1 %2414, %v1721_v5  }
  0x6b   : > { %2164 = vmatmul.msk.bf16.gmra.mxu0 %vm337_vm1, %v977_v18  ;;  %v1440_v12 = vor.u32 %v1439_v9, %v1436_v8  ;;  %v1458_v8 = vor.u32 %v1457_v2, %v1454_v1  ;;  %v1561_v9 = vld [vmem:[%s2493_s26 + $0x30] sm:$0x7] }
  0x6c   : > { %2127 = vmatmul.msk.bf16.gmra.mxu3 %vm337_vm1, %v788_v13 }
  0x6d   : > { %v1441_v18 = vsel %vm1406_vm6, %v1431_v60, %v1440_v12 }
  0x72   : > { %1765 = vperm.xlu1 %2414, %v1725_v54  }
  0x79   : > { %2090 = vmatmul.msk.bf16.gmra.mxu2 %vm337_vm1, %v642_v39  ;;  %2197 = vmatmul.msk.bf16.vlgmr.msra.gmra.mxu1 %vm337_vm1, %v1116_v40  ;;  %v1449_v40 = vor.u32 %v1448_v33, %v1445_v32  ;;  %v1724_v33 = vld [vmem:[%s3117_s2 + $0x30] sm:$0xff] }
  0x7a   : > { %1760 = vperm.xlu0 %2413, %v1724_v33  }
  0x7b   : > { %2308 = vmatmul.msk.bf16.vlgmr.msra.gmra.mxu0 %vm337_vm1, %v1598_v49  ;;  %v1450_v49 = vsel %vm1406_vm6, %v1440_v12, %v1449_v40  ;;  %v1459_v19 = vsel %vm1406_vm6, %v1449_v40, %v1458_v8  ;;  %v1723_v8 = vld [vmem:[%s3117_s2 + $0x28] sm:$0xff] }
  0x7c   : > { %2271 = vmatmul.msk.bf16.vlgmr.msra.gmra.mxu3 %vm337_vm1, %v1423_v43  ;;  %v1122_v43 = vsel %vm1113_vm5, %v1119_v10, %v1121_v36  ;;  %v1588_v10 = vunpack.c.l.b16 %v1561_v9 }
  0x89   : > { %2198 = vmatmul.msk.bf16.gmra.mxu1 %vm337_vm1, %v1118_v61  ;;  %2234 = vmatmul.msk.bf16.vlgmr.msra.gmra.mxu2 %vm337_vm1, %v1262_v62  ;;  %v1112_v61 = vpack.c.b16 %v1106_v53, %v1106_v53  ;;  %v2362_v62 = vld [vmem:[%s2493_s26 + $0x28] sm:$0xff] }
  0x8a   : > { %v1267_v4 = vrot.slane %v2362_v62, 2 }
  0x8b   : > { %2309 = vmatmul.msk.bf16.gmra.mxu0 %vm337_vm1, %v1600_v3  ;;  %v1123_v3 = vrot.slane %v1112_v61, 2 }
  0x8c   : > { %2272 = vmatmul.msk.bf16.gmra.mxu3 %vm337_vm1, %v1432_v0 }
  0x96   : > { %v367_v13 = vpop.f32.mrf.mxu1 }
  0x97   : > { %389 = vst.msk [vmem:[%s2498_s29 + $0x10] sm:$0xff] %vm337_vm1, %v367_v13  ;;  %v1124_v13 = vsel %vm1113_vm5, %v1121_v36, %v1123_v3 }
  0x98   : > { %v362_v17 = vpop.f32.mrf.mxu0 }
  0x99   : > { %387 = vst.msk [vmem:[%s2498_s29] sm:$0xff] %vm337_vm1, %v362_v17  ;;  %2199 = vmatmul.msk.bf16.gmra.mxu1 %vm337_vm1, %v1120_v14  ;;  %2235 = vmatmul.msk.bf16.gmra.mxu2 %vm337_vm1, %v1264_v15  ;;  %v1268_v14 = vsel %vm1113_vm5, %v1265_v37, %v1267_v4  ;;  %v1226_v17 = vld [vmem:[%s2493_s26 + $0x30] sm:$0x3] }
  0x9a   : > { %v1253_v22 = vunpack.c.l.b16 %v1226_v17 }
  0x9b   : > { %2310 = vmatmul.msk.bf16.gmra.mxu0 %vm337_vm1, %v1602_v23 }
  0x9c   : > { %2273 = vmatmul.msk.bf16.gmra.mxu3 %vm337_vm1, %v1441_v18  ;;  %v372_v24 = vpop.f32.mrf.mxu2  ;;  %v1594_v18 = vpack.c.b16 %v1588_v10, %v1588_v10  ;;  %v1259_v29 = vpack.c.b16 %v1253_v22, %v1253_v22 }
  0x9d   : > { %391 = vst.msk [vmem:[%s2498_s29 + $0x20] sm:$0xff] %vm337_vm1, %v372_v24 }
  0x9e   : > { %v369_v27 = vpop.f32.mrf.mxu1  ;;  %v399_v11 = vld [vmem:[%s2498_s29 + $0x10] sm:$0xff]  ;;  %v1605_v20 = vrot.slane %v1594_v18, 3  ;;  %v1269_v32 = vrot.slane %v1259_v29, 2 }
  0x9f   : > { %v382_v30 = vpop.f32.mrf.mxu3  ;;  %390 = vst.msk [vmem:[%s2498_s29 + $0x18] sm:$0xff] %vm337_vm1, %v369_v27 }
  0xa0   : > { %v364_v31 = vpop.f32.mrf.mxu0  ;;  %395 = vst.msk [vmem:[%s2498_s29 + $0x40] sm:$0xff] %vm337_vm1, %v382_v30  ;;  %v397_v39 = vld [vmem:[%s2498_s29] sm:$0xff]  ;;  %v1606_v23 = vsel %vm1595_vm7, %v1603_v52, %v1605_v20  ;;  %v1270_v40 = vsel %vm1113_vm5, %v1267_v4, %v1269_v32 }
  0xa1   : > { %388 = vst.msk [vmem:[%s2498_s29 + $0x8] sm:$0xff] %vm337_vm1, %v364_v31 }
  0xa4   : > { %v374_v38 = vpop.f32.mrf.mxu2 }
  0xa5   : > { %392 = vst.msk [vmem:[%s2498_s29 + $0x28] sm:$0xff] %vm337_vm1, %v374_v38  ;;  %v401_v38 = vld [vmem:[%s2498_s29 + $0x20] sm:$0xff] }
  0xa6   : > { %v532_v42 = vpop.f32.mrf.mxu1  ;;  %v400_v27 = vld [vmem:[%s2498_s29 + $0x18] sm:$0xff] }
  0xa7   : > { %v384_v45 = vpop.f32.mrf.mxu3  ;;  %v557_v46 = vadd.f32 %v532_v42, %v397_v39 }
  0xa8   : > { %396 = vst.msk [vmem:[%s2498_s29 + $0x48] sm:$0xff] %vm337_vm1, %v384_v45  ;;  %v2723_v51 = vpop.f32.mrf.mxu0  ;;  %v398_v57 = vld [vmem:[%s2498_s29 + $0x8] sm:$0xff] }
  0xa9   : > { %567 = vst.msk [vmem:[%s2498_s29] sm:$0xff] %vm337_vm1, %v557_v46  ;;  %2200 = vmatmul.msk.bf16.gmra.mxu1 %vm337_vm1, %v1122_v43  ;;  %2236 = vmatmul.msk.bf16.gmra.mxu2 %vm337_vm1, %v1266_v44  ;;  %v1727_v45 = vld [vmem:[%s3117_s2 + $0x48] sm:$0xff] }
  0xaa   : > { %1775 = vperm.xlu0 %2413, %v1727_v45  }
  0xab   : > { %2311 = vmatmul.msk.bf16.gmra.mxu0 %vm337_vm1, %v1604_v55 }
  0xac   : > { %2274 = vmatmul.msk.bf16.gmra.mxu3 %vm337_vm1, %v1450_v49  ;;  %v377_v56 = vpop.f32.mrf.mxu2  ;;  %v402_v50 = vld [vmem:[%s2498_s29 + $0x28] sm:$0xff] }
  0xad   : > { %393 = vst.msk [vmem:[%s2498_s29 + $0x30] sm:$0xff] %vm337_vm1, %v377_v56 }
  0xae   : > { %v534_v60 = vpop.f32.mrf.mxu1 }
  0xaf   : > { %v825_v63 = vpop.f32.mrf.mxu3  ;;  %v558_v0 = vadd.f32 %v534_v60, %v398_v57  ;;  %v1722_v60 = vld [vmem:[%s3117_s2 + $0x20] sm:$0xff] }
  0xb0   : > { %v2740_v6 = vpop.f32.mrf.mxu0  ;;  %v577_v21 = vld [vmem:[%s2498_s29] sm:$0xff]  ;;  %1750 = vperm.xlu2 %2415, %v1722_v60  }
  0xb1   : > { %568 = vst.msk [vmem:[%s2498_s29 + $0x8] sm:$0xff] %vm337_vm1, %v558_v0 }
  0xb4   : > { %v379_v7 = vpop.f32.mrf.mxu2  ;;  %v403_v0 = vld [vmem:[%s2498_s29 + $0x30] sm:$0xff] }
  0xb5   : > { %394 = vst.msk [vmem:[%s2498_s29 + $0x38] sm:$0xff] %vm337_vm1, %v379_v7 }
  0xb6   : > { %v537_v12 = vpop.f32.mrf.mxu1 }
  0xb7   : > { %v827_v15 = vpop.f32.mrf.mxu3  ;;  %v559_v16 = vadd.f32 %v537_v12, %v399_v11 }
  0xb8   : > { %v2758_v26 = vpop.f32.mrf.mxu0  ;;  %v578_v34 = vld [vmem:[%s2498_s29 + $0x8] sm:$0xff]  ;;  %1755 = vperm.xlu2 %2415, %v1723_v8  }
  0xb9   : > { %569 = vst.msk [vmem:[%s2498_s29 + $0x10] sm:$0xff] %vm337_vm1, %v559_v16  ;;  %2201 = vmatmul.msk.bf16.gmra.mxu1 %vm337_vm1, %v1124_v13  ;;  %2237 = vmatmul.msk.bf16.gmra.mxu2 %vm337_vm1, %v1268_v14 }
  0xbb   : > { %2312 = vmatmul.msk.bf16.gmra.mxu0 %vm337_vm1, %v1606_v23 }
  0xbc   : > { %2275 = vmatmul.msk.bf16.gmra.mxu3 %vm337_vm1, %v1459_v19  ;;  %v679_v24 = vpop.f32.mrf.mxu2 }
  0xbd   : > { %v704_v25 = vadd.f32 %v679_v24, %v577_v21 }
  0xbe   : > { %v539_v28 = vpop.f32.mrf.mxu1 }
  0xbf   : > { %v830_v30 = vpop.f32.mrf.mxu3  ;;  %714 = vst.msk [vmem:[%s2498_s29] sm:$0xff] %vm337_vm1, %v704_v25  ;;  %v560_v31 = vadd.f32 %v539_v28, %v400_v27  ;;  %v405_v25 = vld [vmem:[%s2498_s29 + $0x40] sm:$0xff] }
  0xc0   : > { %v2774_v44 = vpop.f32.mrf.mxu0  ;;  %v579_v46 = vld [vmem:[%s2498_s29 + $0x10] sm:$0xff] }
  0xc1   : > { %570 = vst.msk [vmem:[%s2498_s29 + $0x18] sm:$0xff] %vm337_vm1, %v560_v31  ;;  %v1726_v31 = vld [vmem:[%s3117_s2 + $0x40] sm:$0xff] }
  0xc2   : > { %1770 = vperm.xlu2 %2415, %v1726_v31  }
  0xc4   : > { %v681_v35 = vpop.f32.mrf.mxu2 }
  0xc5   : > { %v705_v36 = vadd.f32 %v681_v35, %v578_v34 }
  0xc6   : > { %v724_v37 = vld [vmem:[%s2498_s29] sm:$0xff]  ;;  %v542_v39 = vpop.f32.mrf.mxu1 }
  0xc7   : > { %v832_v41 = vpop.f32.mrf.mxu3  ;;  %v850_v42 = vadd.f32 %v825_v63, %v724_v37  ;;  %715 = vst.msk [vmem:[%s2498_s29 + $0x8] sm:$0xff] %vm337_vm1, %v705_v36  ;;  %v561_v43 = vadd.f32 %v542_v39, %v401_v38  ;;  %v406_v37 = vld [vmem:[%s2498_s29 + $0x48] sm:$0xff] }
  0xc8   : > { %v2796_v59 = vpop.f32.mrf.mxu0  ;;  %v580_v61 = vld [vmem:[%s2498_s29 + $0x18] sm:$0xff] }
  0xc9   : > { %860 = vst.msk [vmem:[%s2498_s29] sm:$0xff] %vm337_vm1, %v850_v42  ;;  %2238 = vmatmul.msk.bf16.gmra.mxu2 %vm337_vm1, %v1270_v40 }
  0xca   : > { %571 = vst.msk [vmem:[%s2498_s29 + $0x20] sm:$0xff] %vm337_vm1, %v561_v43 }
  0xcc   : > { %v684_v47 = vpop.f32.mrf.mxu2 }
  0xcd   : > { %v706_v48 = vadd.f32 %v684_v47, %v579_v46 }
  0xce   : > { %v725_v49 = vld [vmem:[%s2498_s29 + $0x8] sm:$0xff]  ;;  %v544_v52 = vpop.f32.mrf.mxu1 }
  0xcf   : > { %v835_v53 = vpop.f32.mrf.mxu3  ;;  %v851_v55 = vadd.f32 %v827_v15, %v725_v49  ;;  %716 = vst.msk [vmem:[%s2498_s29 + $0x10] sm:$0xff] %vm337_vm1, %v706_v48  ;;  %v562_v56 = vadd.f32 %v544_v52, %v402_v50 }
  0xd0   : > { %v870_v57 = vld [vmem:[%s2498_s29] sm:$0xff]  ;;  %v1026_v9 = vpop.f32.mrf.mxu0 }
  0xd1   : > { %861 = vst.msk [vmem:[%s2498_s29 + $0x8] sm:$0xff] %vm337_vm1, %v851_v55  ;;  %v1039_v58 = vadd.f32 %v2723_v51, %v870_v57  ;;  %v581_v10 = vld [vmem:[%s2498_s29 + $0x20] sm:$0xff] }
  0xd2   : > { %572 = vst.msk [vmem:[%s2498_s29 + $0x28] sm:$0xff] %vm337_vm1, %v562_v56 }
  0xd3   : > { %1049 = vst.msk [vmem:[%s2498_s29] sm:$0xff] %vm337_vm1, %v1039_v58 }
  0xd4   : > { %v686_v62 = vpop.f32.mrf.mxu2 }
  0xd5   : > { %v707_v63 = vadd.f32 %v686_v62, %v580_v61 }
  0xd6   : > { %v726_v51 = vld [vmem:[%s2498_s29 + $0x10] sm:$0xff]  ;;  %v547_v1 = vpop.f32.mrf.mxu1 }
  0xd7   : > { %v837_v2 = vpop.f32.mrf.mxu3  ;;  %v852_v3 = vadd.f32 %v830_v30, %v726_v51  ;;  %717 = vst.msk [vmem:[%s2498_s29 + $0x18] sm:$0xff] %vm337_vm1, %v707_v63  ;;  %v563_v4 = vadd.f32 %v547_v1, %v403_v0 }
  0xd8   : > { %v871_v5 = vld [vmem:[%s2498_s29 + $0x8] sm:$0xff]  ;;  %v1029_v23 = vpop.f32.mrf.mxu0 }
  0xd9   : > { %862 = vst.msk [vmem:[%s2498_s29 + $0x10] sm:$0xff] %vm337_vm1, %v852_v3  ;;  %v1040_v7 = vadd.f32 %v2740_v6, %v871_v5  ;;  %v404_v6 = vld [vmem:[%s2498_s29 + $0x38] sm:$0xff]  ;;  %v582_v20 = vld [vmem:[%s2498_s29 + $0x28] sm:$0xff] }
  0xda   : > { %573 = vst.msk [vmem:[%s2498_s29 + $0x30] sm:$0xff] %vm337_vm1, %v563_v4  ;;  %v1059_v49 = vld [vmem:[%s2498_s29] sm:$0xff] }
  0xdb   : > { %1050 = vst.msk [vmem:[%s2498_s29 + $0x8] sm:$0xff] %vm337_vm1, %v1040_v7 }
  0xdc   : > { %v689_v11 = vpop.f32.mrf.mxu2 }
  0xdd   : > { %v708_v12 = vadd.f32 %v689_v11, %v581_v10 }
  0xde   : > { %v727_v13 = vld [vmem:[%s2498_s29 + $0x18] sm:$0xff]  ;;  %v549_v14 = vpop.f32.mrf.mxu1 }
  0xdf   : > { %v840_v15 = vpop.f32.mrf.mxu3  ;;  %v853_v16 = vadd.f32 %v832_v41, %v727_v13  ;;  %718 = vst.msk [vmem:[%s2498_s29 + $0x20] sm:$0xff] %vm337_vm1, %v708_v12  ;;  %v564_v17 = vadd.f32 %v549_v14, %v404_v6 }
  0xe0   : > { %v872_v18 = vld [vmem:[%s2498_s29 + $0x10] sm:$0xff]  ;;  %v1031_v41 = vpop.f32.mrf.mxu0 }
  0xe1   : > { %863 = vst.msk [vmem:[%s2498_s29 + $0x18] sm:$0xff] %vm337_vm1, %v853_v16  ;;  %v1041_v19 = vadd.f32 %v2758_v26, %v872_v18  ;;  %v583_v33 = vld [vmem:[%s2498_s29 + $0x30] sm:$0xff] }
  0xe2   : > { %574 = vst.msk [vmem:[%s2498_s29 + $0x38] sm:$0xff] %vm337_vm1, %v564_v17  ;;  %v1060_v62 = vld [vmem:[%s2498_s29 + $0x8] sm:$0xff] }
  0xe3   : > { %1051 = vst.msk [vmem:[%s2498_s29 + $0x10] sm:$0xff] %vm337_vm1, %v1041_v19 }
  0xe4   : > { %v691_v21 = vpop.f32.mrf.mxu2 }
  0xe5   : > { %v709_v22 = vadd.f32 %v691_v21, %v582_v20 }
  0xe6   : > { %v728_v24 = vld [vmem:[%s2498_s29 + $0x20] sm:$0xff]  ;;  %v552_v27 = vpop.f32.mrf.mxu1 }
  0xe7   : > { %v842_v28 = vpop.f32.mrf.mxu3  ;;  %v854_v29 = vadd.f32 %v835_v53, %v728_v24  ;;  %719 = vst.msk [vmem:[%s2498_s29 + $0x28] sm:$0xff] %vm337_vm1, %v709_v22  ;;  %v565_v26 = vadd.f32 %v552_v27, %v405_v25 }
  0xe8   : > { %v873_v30 = vld [vmem:[%s2498_s29 + $0x18] sm:$0xff]  ;;  %v1034_v56 = vpop.f32.mrf.mxu0 }
  0xe9   : > { %864 = vst.msk [vmem:[%s2498_s29 + $0x20] sm:$0xff] %vm337_vm1, %v854_v29  ;;  %v1042_v32 = vadd.f32 %v2774_v44, %v873_v30  ;;  %v584_v45 = vld [vmem:[%s2498_s29 + $0x38] sm:$0xff] }
  0xea   : > { %575 = vst.msk [vmem:[%s2498_s29 + $0x40] sm:$0xff] %vm337_vm1, %v565_v26  ;;  %v1061_v10 = vld [vmem:[%s2498_s29 + $0x10] sm:$0xff] }
  0xeb   : > { %1052 = vst.msk [vmem:[%s2498_s29 + $0x18] sm:$0xff] %vm337_vm1, %v1042_v32 }
  0xec   : > { %v694_v34 = vpop.f32.mrf.mxu2 }
  0xed   : > { %v710_v35 = vadd.f32 %v694_v34, %v583_v33 }
  0xee   : > { %v729_v36 = vld [vmem:[%s2498_s29 + $0x28] sm:$0xff]  ;;  %v554_v38 = vpop.f32.mrf.mxu1 }
  0xef   : > { %v855_v39 = vadd.f32 %v837_v2, %v729_v36  ;;  %720 = vst.msk [vmem:[%s2498_s29 + $0x30] sm:$0xff] %vm337_vm1, %v710_v35  ;;  %v566_v40 = vadd.f32 %v554_v38, %v406_v37  ;;  %v845_v43 = vpop.f32.mrf.mxu3 }
  0xf0   : > { %v874_v42 = vld [vmem:[%s2498_s29 + $0x20] sm:$0xff]  ;;  %v1036_v3 = vpop.f32.mrf.mxu0 }
  0xf1   : > { %865 = vst.msk [vmem:[%s2498_s29 + $0x28] sm:$0xff] %vm337_vm1, %v855_v39  ;;  %v1043_v44 = vadd.f32 %v2796_v59, %v874_v42  ;;  %v585_v58 = vld [vmem:[%s2498_s29 + $0x40] sm:$0xff] }
  0xf2   : > { %576 = vst.msk [vmem:[%s2498_s29 + $0x48] sm:$0xff] %vm337_vm1, %v566_v40  ;;  %v1062_v20 = vld [vmem:[%s2498_s29 + $0x18] sm:$0xff] }
  0xf3   : > { %1053 = vst.msk [vmem:[%s2498_s29 + $0x20] sm:$0xff] %vm337_vm1, %v1043_v44 }
  0xf4   : > { %v696_v46 = vpop.f32.mrf.mxu2 }
  0xf5   : > { %v711_v47 = vadd.f32 %v696_v46, %v584_v45 }
  0xf6   : > { %v730_v48 = vld [vmem:[%s2498_s29 + $0x30] sm:$0xff]  ;;  %v1161_v50 = vpop.f32.mrf.mxu1 }
  0xf7   : > { %v856_v52 = vadd.f32 %v840_v15, %v730_v48  ;;  %721 = vst.msk [vmem:[%s2498_s29 + $0x38] sm:$0xff] %vm337_vm1, %v711_v47  ;;  %v1186_v53 = vadd.f32 %v1161_v50, %v1059_v49  ;;  %v847_v57 = vpop.f32.mrf.mxu3 }
  0xf8   : > { %v875_v54 = vld [vmem:[%s2498_s29 + $0x28] sm:$0xff]  ;;  %v1643_v18 = vpop.f32.mrf.mxu0 }
  0xf9   : > { %866 = vst.msk [vmem:[%s2498_s29 + $0x30] sm:$0xff] %vm337_vm1, %v856_v52  ;;  %v1044_v55 = vadd.f32 %v1026_v9, %v875_v54  ;;  %v586_v4 = vld [vmem:[%s2498_s29 + $0x48] sm:$0xff] }
  0xfa   : > { %1196 = vst.msk [vmem:[%s2498_s29] sm:$0xff] %vm337_vm1, %v1186_v53  ;;  %v1063_v31 = vld [vmem:[%s2498_s29 + $0x20] sm:$0xff] }
  0xfb   : > { %1054 = vst.msk [vmem:[%s2498_s29 + $0x28] sm:$0xff] %vm337_vm1, %v1044_v55 }
  0xfc   : > { %v699_v59 = vpop.f32.mrf.mxu2 }
  0xfd   : > { %v712_v60 = vadd.f32 %v699_v59, %v585_v58 }
  0xfe   : > { %v731_v61 = vld [vmem:[%s2498_s29 + $0x38] sm:$0xff]  ;;  %v1163_v63 = vpop.f32.mrf.mxu1 }
  0xff   : > { %v857_v51 = vadd.f32 %v842_v28, %v731_v61  ;;  %722 = vst.msk [vmem:[%s2498_s29 + $0x40] sm:$0xff] %vm337_vm1, %v712_v60  ;;  %v1187_v0 = vadd.f32 %v1163_v63, %v1060_v62  ;;  %v1496_v7 = vpop.f32.mrf.mxu3 }
 0x100   : > { %v876_v1 = vld [vmem:[%s2498_s29 + $0x30] sm:$0xff]  ;;  %v1645_v35 = vpop.f32.mrf.mxu0 }
 0x101   : > { %867 = vst.msk [vmem:[%s2498_s29 + $0x38] sm:$0xff] %vm337_vm1, %v857_v51  ;;  %v1045_v2 = vadd.f32 %v1029_v23, %v876_v1  ;;  %v1206_v15 = vld [vmem:[%s2498_s29] sm:$0xff] }
 0x102   : > { %1197 = vst.msk [vmem:[%s2498_s29 + $0x8] sm:$0xff] %vm337_vm1, %v1187_v0 }
 0x103   : > { %1055 = vst.msk [vmem:[%s2498_s29 + $0x30] sm:$0xff] %vm337_vm1, %v1045_v2 }
 0x104   : > { %v701_v5 = vpop.f32.mrf.mxu2 }
 0x105   : > { %v713_v8 = vadd.f32 %v701_v5, %v586_v4 }
 0x106   : > { %v732_v9 = vld [vmem:[%s2498_s29 + $0x40] sm:$0xff]  ;;  %v1166_v11 = vpop.f32.mrf.mxu1 }
 0x107   : > { %v858_v12 = vadd.f32 %v845_v43, %v732_v9  ;;  %723 = vst.msk [vmem:[%s2498_s29 + $0x48] sm:$0xff] %vm337_vm1, %v713_v8  ;;  %v1188_v13 = vadd.f32 %v1166_v11, %v1061_v10  ;;  %v1498_v22 = vpop.f32.mrf.mxu3  ;;  %v1064_v43 = vld [vmem:[%s2498_s29 + $0x28] sm:$0xff] }
 0x108   : > { %v877_v6 = vld [vmem:[%s2498_s29 + $0x38] sm:$0xff]  ;;  %v1648_v49 = vpop.f32.mrf.mxu0 }
 0x109   : > { %868 = vst.msk [vmem:[%s2498_s29 + $0x40] sm:$0xff] %vm337_vm1, %v858_v12  ;;  %v1046_v14 = vadd.f32 %v1031_v41, %v877_v6  ;;  %v1207_v28 = vld [vmem:[%s2498_s29 + $0x8] sm:$0xff] }
 0x10a   : > { %1198 = vst.msk [vmem:[%s2498_s29 + $0x10] sm:$0xff] %vm337_vm1, %v1188_v13 }
 0x10b   : > { %1056 = vst.msk [vmem:[%s2498_s29 + $0x38] sm:$0xff] %vm337_vm1, %v1046_v14 }
 0x10c   : > { %v1307_v16 = vpop.f32.mrf.mxu2 }
 0x10d   : > { %v1332_v17 = vadd.f32 %v1307_v16, %v1206_v15 }
 0x10e   : > { %v733_v19 = vld [vmem:[%s2498_s29 + $0x48] sm:$0xff]  ;;  %v1168_v21 = vpop.f32.mrf.mxu1 }
 0x10f   : > { %v859_v23 = vadd.f32 %v847_v57, %v733_v19  ;;  %1342 = vst.msk [vmem:[%s2498_s29] sm:$0xff] %vm337_vm1, %v1332_v17  ;;  %v1189_v24 = vadd.f32 %v1168_v21, %v1062_v20  ;;  %v1501_v37 = vpop.f32.mrf.mxu3 }
 0x110   : > { %v878_v25 = vld [vmem:[%s2498_s29 + $0x40] sm:$0xff]  ;;  %v1650_v51 = vpop.f32.mrf.mxu0 }
 0x111   : > { %869 = vst.msk [vmem:[%s2498_s29 + $0x48] sm:$0xff] %vm337_vm1, %v859_v23  ;;  %v1047_v27 = vadd.f32 %v1034_v56, %v878_v25  ;;  %v1208_v39 = vld [vmem:[%s2498_s29 + $0x10] sm:$0xff] }
 0x112   : > { %1199 = vst.msk [vmem:[%s2498_s29 + $0x18] sm:$0xff] %vm337_vm1, %v1189_v24  ;;  %v1065_v56 = vld [vmem:[%s2498_s29 + $0x30] sm:$0xff]  ;;  %v1066_v5 = vld [vmem:[%s2498_s29 + $0x38] sm:$0xff] }
 0x113   : > { %1057 = vst.msk [vmem:[%s2498_s29 + $0x40] sm:$0xff] %vm337_vm1, %v1047_v27 }
 0x114   : > { %v1309_v29 = vpop.f32.mrf.mxu2 }
 0x115   : > { %v1333_v26 = vadd.f32 %v1309_v29, %v1207_v28 }
 0x116   : > { %v1352_v30 = vld [vmem:[%s2498_s29] sm:$0xff]  ;;  %v1171_v32 = vpop.f32.mrf.mxu1 }
 0x117   : > { %v1521_v33 = vadd.f32 %v1496_v7, %v1352_v30  ;;  %1343 = vst.msk [vmem:[%s2498_s29 + $0x8] sm:$0xff] %vm337_vm1, %v1333_v26  ;;  %v1190_v34 = vadd.f32 %v1171_v32, %v1063_v31  ;;  %v1503_v50 = vpop.f32.mrf.mxu3 }
 0x118   : > { %v879_v36 = vld [vmem:[%s2498_s29 + $0x48] sm:$0xff]  ;;  %v1653_v16 = vpop.f32.mrf.mxu0 }
 0x119   : > { %1531 = vst.msk [vmem:[%s2498_s29] sm:$0xff] %vm337_vm1, %v1521_v33  ;;  %v1048_v38 = vadd.f32 %v1036_v3, %v879_v36  ;;  %v1209_v52 = vld [vmem:[%s2498_s29 + $0x18] sm:$0xff] }
 0x11a   : > { %1200 = vst.msk [vmem:[%s2498_s29 + $0x20] sm:$0xff] %vm337_vm1, %v1190_v34 }
 0x11b   : > { %1058 = vst.msk [vmem:[%s2498_s29 + $0x48] sm:$0xff] %vm337_vm1, %v1048_v38 }
 0x11c   : > { %v1312_v40 = vpop.f32.mrf.mxu2 }
 0x11d   : > { %v1334_v41 = vadd.f32 %v1312_v40, %v1208_v39 }
 0x11e   : > { %v1353_v42 = vld [vmem:[%s2498_s29 + $0x8] sm:$0xff]  ;;  %v1173_v44 = vpop.f32.mrf.mxu1 }
 0x11f   : > { %v1522_v45 = vadd.f32 %v1498_v22, %v1353_v42  ;;  %1344 = vst.msk [vmem:[%s2498_s29 + $0x10] sm:$0xff] %vm337_vm1, %v1334_v41  ;;  %v1191_v46 = vadd.f32 %v1173_v44, %v1064_v43  ;;  %v1506_v2 = vpop.f32.mrf.mxu3 }
 0x120   : > { %v1541_v47 = vld [vmem:[%s2498_s29] sm:$0xff] }
 0x121   : > { %1532 = vst.msk [vmem:[%s2498_s29 + $0x8] sm:$0xff] %vm337_vm1, %v1522_v45  ;;  %v1668_v48 = vadd.f32 %v1643_v18, %v1541_v47  ;;  %v1210_v0 = vld [vmem:[%s2498_s29 + $0x20] sm:$0xff] }
 0x122   : > { %1201 = vst.msk [vmem:[%s2498_s29 + $0x28] sm:$0xff] %vm337_vm1, %v1191_v46  ;;  %v1067_v18 = vld [vmem:[%s2498_s29 + $0x40] sm:$0xff]  ;;  %v1068_v31 = vld [vmem:[%s2498_s29 + $0x48] sm:$0xff] }
 0x123   : > { %1678 = vst.msk [vmem:[%s2498_s29] sm:$0xff] %vm337_vm1, %v1668_v48 }
 0x124   : > { %v1314_v53 = vpop.f32.mrf.mxu2 }
 0x125   : > { %v1335_v54 = vadd.f32 %v1314_v53, %v1209_v52 }
 0x126   : > { %v1354_v55 = vld [vmem:[%s2498_s29 + $0x10] sm:$0xff]  ;;  %v1176_v57 = vpop.f32.mrf.mxu1 }
 0x127   : > { %v1523_v58 = vadd.f32 %v1501_v37, %v1354_v55  ;;  %1345 = vst.msk [vmem:[%s2498_s29 + $0x18] sm:$0xff] %vm337_vm1, %v1335_v54  ;;  %v1192_v59 = vadd.f32 %v1176_v57, %v1065_v56  ;;  %v1508_v20 = vpop.f32.mrf.mxu3 }
 0x128   : > { %v1542_v60 = vld [vmem:[%s2498_s29 + $0x8] sm:$0xff] }
 0x129   : > { %1533 = vst.msk [vmem:[%s2498_s29 + $0x10] sm:$0xff] %vm337_vm1, %v1523_v58  ;;  %v1669_v61 = vadd.f32 %v1645_v35, %v1542_v60  ;;  %v1211_v6 = vld [vmem:[%s2498_s29 + $0x28] sm:$0xff]  ;;  %v1655_v35 = vpop.f32.mrf.mxu0  ;;  %v1731_v60 = vpop.permute.xlu0 %1730 }
 0x12a   : > { %1202 = vst.msk [vmem:[%s2498_s29 + $0x30] sm:$0xff] %vm337_vm1, %v1192_v59  ;;  %v1688_v62 = vld [vmem:[%s2498_s29] sm:$0xff] }
 0x12b   : > { %1679 = vst.msk [vmem:[%s2498_s29 + $0x8] sm:$0xff] %vm337_vm1, %v1669_v61  ;;  %v2948_v63 = vmax.f32 %v1688_v62, 0.0 }
 0x12c   : > { %v1317_v1 = vpop.f32.mrf.mxu2 }
 0x12d   : > { %1708 = vst.msk [vmem:[%s2498_s29] sm:$0xff] %vm337_vm1, %v2948_v63  ;;  %v1336_v3 = vadd.f32 %v1317_v1, %v1210_v0 }
 0x12e   : > { %v1355_v4 = vld [vmem:[%s2498_s29 + $0x18] sm:$0xff]  ;;  %v1178_v7 = vpop.f32.mrf.mxu1 }
 0x12f   : > { %v1524_v8 = vadd.f32 %v1503_v50, %v1355_v4  ;;  %1346 = vst.msk [vmem:[%s2498_s29 + $0x20] sm:$0xff] %vm337_vm1, %v1336_v3  ;;  %v1193_v9 = vadd.f32 %v1178_v7, %v1066_v5  ;;  %v1511_v37 = vpop.f32.mrf.mxu3  ;;  %v1741_v3 = vpop.permute.xlu1 %1740 }
 0x130   : > { %v1543_v10 = vld [vmem:[%s2498_s29 + $0x10] sm:$0xff] }
 0x131   : > { %1534 = vst.msk [vmem:[%s2498_s29 + $0x18] sm:$0xff] %vm337_vm1, %v1524_v8  ;;  %v1670_v11 = vadd.f32 %v1648_v49, %v1543_v10  ;;  %v1212_v28 = vld [vmem:[%s2498_s29 + $0x30] sm:$0xff]  ;;  %v1658_v48 = vpop.f32.mrf.mxu0  ;;  %v1751_v10 = vpop.permute.xlu2 %1750 }
 0x132   : > { %1203 = vst.msk [vmem:[%s2498_s29 + $0x38] sm:$0xff] %vm337_vm1, %v1193_v9  ;;  %v1689_v12 = vld [vmem:[%s2498_s29 + $0x8] sm:$0xff] }
 0x133   : > { %1680 = vst.msk [vmem:[%s2498_s29 + $0x10] sm:$0xff] %vm337_vm1, %v1670_v11  ;;  %v2966_v13 = vmax.f32 %v1689_v12, 0.0 }
 0x134   : > { %v1319_v14 = vpop.f32.mrf.mxu2 }
 0x135   : > { %1709 = vst.msk [vmem:[%s2498_s29 + $0x8] sm:$0xff] %vm337_vm1, %v2966_v13  ;;  %v1337_v15 = vadd.f32 %v1319_v14, %v1211_v6  ;;  %v1736_v6 = vpop.permute.xlu0 %1735 }
 0x136   : > { %v1356_v17 = vld [vmem:[%s2498_s29 + $0x20] sm:$0xff]  ;;  %v1181_v19 = vpop.f32.mrf.mxu1 }
 0x137   : > { %v1525_v21 = vadd.f32 %v1506_v2, %v1356_v17  ;;  %1347 = vst.msk [vmem:[%s2498_s29 + $0x28] sm:$0xff] %vm337_vm1, %v1337_v15  ;;  %v1194_v22 = vadd.f32 %v1181_v19, %v1067_v18  ;;  %v1513_v49 = vpop.f32.mrf.mxu3  ;;  %v1779_v17 = vmul.f32 %v1736_v6, %v2966_v13  ;;  %v1746_v18 = vpop.permute.xlu1 %1745 }
 0x138   : > { %v1544_v23 = vld [vmem:[%s2498_s29 + $0x18] sm:$0xff] }
 0x139   : > { %1535 = vst.msk [vmem:[%s2498_s29 + $0x20] sm:$0xff] %vm337_vm1, %v1525_v21  ;;  %v1671_v24 = vadd.f32 %v1650_v51, %v1544_v23  ;;  %v1213_v41 = vld [vmem:[%s2498_s29 + $0x38] sm:$0xff]  ;;  %v1660_v62 = vpop.f32.mrf.mxu0 }
 0x13a   : > { %1204 = vst.msk [vmem:[%s2498_s29 + $0x40] sm:$0xff] %vm337_vm1, %v1194_v22  ;;  %v1690_v25 = vld [vmem:[%s2498_s29 + $0x10] sm:$0xff] }
 0x13b   : > { %1681 = vst.msk [vmem:[%s2498_s29 + $0x18] sm:$0xff] %vm337_vm1, %v1671_v24  ;;  %v2984_v27 = vmax.f32 %v1690_v25, 0.0 }
 0x13c   : > { %v1322_v29 = vpop.f32.mrf.mxu2 }
 0x13d   : > { %1710 = vst.msk [vmem:[%s2498_s29 + $0x10] sm:$0xff] %vm337_vm1, %v2984_v27  ;;  %v1338_v26 = vadd.f32 %v1322_v29, %v1212_v28  ;;  %v1780_v21 = vmul.f32 %v1741_v3, %v2984_v27  ;;  %v1819_v28 = vmul.f32 %v1779_v17, %v2966_v13 }
 0x13e   : > { %v1357_v30 = vld [vmem:[%s2498_s29 + $0x28] sm:$0xff]  ;;  %v1183_v32 = vpop.f32.mrf.mxu1 }
 0x13f   : > { %v1526_v33 = vadd.f32 %v1508_v20, %v1357_v30  ;;  %1348 = vst.msk [vmem:[%s2498_s29 + $0x30] sm:$0xff] %vm337_vm1, %v1338_v26  ;;  %v1195_v34 = vadd.f32 %v1183_v32, %v1068_v31  ;;  %v1516_v0 = vpop.f32.mrf.mxu3  ;;  %v1778_v20 = vmul.f32 %v1731_v60, %v2948_v63  ;;  %v1820_v30 = vmul.f32 %v1780_v21, %v2984_v27  ;;  %v1756_v31 = vpop.permute.xlu2 %1755 }
 0x140   : > { %v1545_v36 = vld [vmem:[%s2498_s29 + $0x20] sm:$0xff]  ;;  %v1790_v32 = vsel %vm337_vm1, %v1779_v17, 0.0  ;;  %v1829_v13 = vsel %vm337_vm1, %v1819_v28, 0.0 }
 0x141   : > { %1536 = vst.msk [vmem:[%s2498_s29 + $0x28] sm:$0xff] %vm337_vm1, %v1526_v33  ;;  %v1672_v38 = vadd.f32 %v1653_v16, %v1545_v36  ;;  %v1214_v53 = vld [vmem:[%s2498_s29 + $0x40] sm:$0xff]  ;;  %v1663_v16 = vpop.f32.mrf.mxu0  ;;  %v1818_v26 = vmul.f32 %v1778_v20, %v2948_v63  ;;  %v1792_v36 = vsel %vm337_vm1, %v1780_v21, 0.0 }
 0x142   : > { %1205 = vst.msk [vmem:[%s2498_s29 + $0x48] sm:$0xff] %vm337_vm1, %v1195_v34  ;;  %v1691_v39 = vld [vmem:[%s2498_s29 + $0x18] sm:$0xff] }
 0x143   : > { %1682 = vst.msk [vmem:[%s2498_s29 + $0x20] sm:$0xff] %vm337_vm1, %v1672_v38  ;;  %v3002_v40 = vmax.f32 %v1691_v39, 0.0  ;;  %v1828_v63 = vsel %vm337_vm1, %v1818_v26, 0.0  ;;  %v1831_v38 = vsel %vm337_vm1, %v1820_v30, 0.0  ;;  %v1761_v39 = vpop.permute.xlu0 %1760 }
 0x144   : > { %v1324_v42 = vpop.f32.mrf.mxu2 }
 0x145   : > { %1711 = vst.msk [vmem:[%s2498_s29 + $0x18] sm:$0xff] %vm337_vm1, %v3002_v40  ;;  %v1339_v43 = vadd.f32 %v1324_v42, %v1213_v41  ;;  %v1781_v24 = vmul.f32 %v1746_v18, %v3002_v40 }
 0x146   : > { %v1358_v44 = vld [vmem:[%s2498_s29 + $0x30] sm:$0xff] }
 0x147   : > { %v1527_v45 = vadd.f32 %v1511_v37, %v1358_v44  ;;  %1349 = vst.msk [vmem:[%s2498_s29 + $0x38] sm:$0xff] %vm337_vm1, %v1339_v43  ;;  %v1518_v15 = vpop.f32.mrf.mxu3  ;;  %v1821_v34 = vmul.f32 %v1781_v24, %v3002_v40  ;;  %v1794_v43 = vsel %vm337_vm1, %v1781_v24, 0.0 }
 0x148   : > { %v1546_v46 = vld [vmem:[%s2498_s29 + $0x28] sm:$0xff] }
 0x149   : > { %1537 = vst.msk [vmem:[%s2498_s29 + $0x30] sm:$0xff] %vm337_vm1, %v1527_v45  ;;  %v1673_v47 = vadd.f32 %v1655_v35, %v1546_v46  ;;  %v1215_v1 = vld [vmem:[%s2498_s29 + $0x48] sm:$0xff]  ;;  %v1789_v35 = vsel %vm337_vm1, %v1778_v20, 0.0  ;;  %v1665_v42 = vpop.f32.mrf.mxu0  ;;  %v1830_v46 = vadd.f32 %v1829_v13, %v1828_v63  ;;  %v1788_v63 = vld [vmem:[%s3119_s4] sm:$0x1] }
 0x14a   : > { %v1692_v50 = vld [vmem:[%s2498_s29 + $0x20] sm:$0xff]  ;;  %v1791_v27 = vadd.f32 %v1790_v32, %v1789_v35 }
 0x14b   : > { %1683 = vst.msk [vmem:[%s2498_s29 + $0x28] sm:$0xff] %vm337_vm1, %v1673_v47  ;;  %v3017_v52 = vmax.f32 %v1692_v50, 0.0  ;;  %v1776_v17 = vpop.permute.xlu0 %1775 }
 0x14c   : > { %v1327_v54 = vpop.f32.mrf.mxu2  ;;  %v1793_v47 = vadd.f32 %v1792_v36, %v1791_v27 }
 0x14d   : > { %1712 = vst.msk [vmem:[%s2498_s29 + $0x20] sm:$0xff] %vm337_vm1, %v3017_v52  ;;  %v1340_v55 = vadd.f32 %v1327_v54, %v1214_v53  ;;  %v1782_v33 = vmul.f32 %v1751_v10, %v3017_v52 }
 0x14e   : > { %v1359_v56 = vld [vmem:[%s2498_s29 + $0x38] sm:$0xff] }
 0x14f   : > { %v1528_v57 = vadd.f32 %v1513_v49, %v1359_v56  ;;  %1350 = vst.msk [vmem:[%s2498_s29 + $0x40] sm:$0xff] %vm337_vm1, %v1340_v55  ;;  %v1822_v40 = vmul.f32 %v1782_v33, %v3017_v52  ;;  %v1766_v49 = vpop.permute.xlu1 %1765  ;;  %v1796_v53 = vsel %vm337_vm1, %v1782_v33, 0.0 }
 0x150   : > { %v1547_v58 = vld [vmem:[%s2498_s29 + $0x30] sm:$0xff] }
 0x151   : > { %1538 = vst.msk [vmem:[%s2498_s29 + $0x38] sm:$0xff] %vm337_vm1, %v1528_v57  ;;  %v1674_v59 = vadd.f32 %v1658_v48, %v1547_v58  ;;  %v1833_v48 = vsel %vm337_vm1, %v1821_v34, 0.0  ;;  %v1832_v57 = vadd.f32 %v1831_v38, %v1830_v46  ;;  %v1795_v58 = vadd.f32 %v1794_v43, %v1793_v47 }
 0x152   : > { %v1693_v61 = vld [vmem:[%s2498_s29 + $0x28] sm:$0xff]  ;;  %v1835_v52 = vsel %vm337_vm1, %v1822_v40, 0.0 }
 0x153   : > { %1684 = vst.msk [vmem:[%s2498_s29 + $0x30] sm:$0xff] %vm337_vm1, %v1674_v59  ;;  %v1703_v51 = vmax.f32 %v1693_v61, 0.0  ;;  %v1771_v59 = vpop.permute.xlu2 %1770 }
 0x154   : > { %v1329_v2 = vpop.f32.mrf.mxu2 }
 0x155   : > { %1713 = vst.msk [vmem:[%s2498_s29 + $0x28] sm:$0xff] %vm337_vm1, %v1703_v51  ;;  %v1341_v4 = vadd.f32 %v1329_v2, %v1215_v1  ;;  %v1783_v37 = vmul.f32 %v1756_v31, %v1703_v51  ;;  %v1797_v1 = vadd.f32 %v1796_v53, %v1795_v58 }
 0x156   : > { %v1360_v5 = vld [vmem:[%s2498_s29 + $0x40] sm:$0xff] }
 0x157   : > { %v1529_v7 = vadd.f32 %v1516_v0, %v1360_v5  ;;  %1351 = vst.msk [vmem:[%s2498_s29 + $0x48] sm:$0xff] %vm337_vm1, %v1341_v4  ;;  %v1823_v54 = vmul.f32 %v1783_v37, %v1703_v51  ;;  %v1798_v60 = vsel %vm337_vm1, %v1783_v37, 0.0  ;;  %v1834_v0 = vadd.f32 %v1833_v48, %v1832_v57 }
 0x158   : > { %v1548_v8 = vld [vmem:[%s2498_s29 + $0x38] sm:$0xff]  ;;  %v1799_v5 = vadd.f32 %v1798_v60, %v1797_v1 }
 0x159   : > { %1539 = vst.msk [vmem:[%s2498_s29 + $0x40] sm:$0xff] %vm337_vm1, %v1529_v7  ;;  %v1675_v9 = vadd.f32 %v1660_v62, %v1548_v8  ;;  %v1837_v51 = vsel %vm337_vm1, %v1823_v54, 0.0  ;;  %v1836_v4 = vadd.f32 %v1835_v52, %v1834_v0 }
 0x15a   : > { %v1694_v11 = vld [vmem:[%s2498_s29 + $0x30] sm:$0xff] }
 0x15b   : > { %1685 = vst.msk [vmem:[%s2498_s29 + $0x38] sm:$0xff] %vm337_vm1, %v1675_v9  ;;  %v1704_v12 = vmax.f32 %v1694_v11, 0.0  ;;  %v1838_v10 = vadd.f32 %v1837_v51, %v1836_v4 }
 0x15d   : > { %1714 = vst.msk [vmem:[%s2498_s29 + $0x30] sm:$0xff] %vm337_vm1, %v1704_v12  ;;  %v1784_v44 = vmul.f32 %v1761_v39, %v1704_v12  ;;  %v1817_v39 = vld [vmem:[%s3120_s5] sm:$0x1] }
 0x15e   : > { %v1361_v14 = vld [vmem:[%s2498_s29 + $0x48] sm:$0xff] }
 0x15f   : > { %v1530_v19 = vadd.f32 %v1518_v15, %v1361_v14  ;;  %v1824_v61 = vmul.f32 %v1784_v44, %v1704_v12  ;;  %v1800_v2 = vsel %vm337_vm1, %v1784_v44, 0.0 }
 0x160   : > { %v1549_v22 = vld [vmem:[%s2498_s29 + $0x40] sm:$0xff]  ;;  %v1801_v11 = vadd.f32 %v1800_v2, %v1799_v5 }
 0x161   : > { %1540 = vst.msk [vmem:[%s2498_s29 + $0x48] sm:$0xff] %vm337_vm1, %v1530_v19  ;;  %v1676_v23 = vadd.f32 %v1663_v16, %v1549_v22  ;;  %v1839_v7 = vsel %vm337_vm1, %v1824_v61, 0.0 }
 0x162   : > { %v1695_v25 = vld [vmem:[%s2498_s29 + $0x38] sm:$0xff]  ;;  %v1840_v16 = vadd.f32 %v1839_v7, %v1838_v10 }
 0x163   : > { %1686 = vst.msk [vmem:[%s2498_s29 + $0x40] sm:$0xff] %vm337_vm1, %v1676_v23  ;;  %v1705_v29 = vmax.f32 %v1695_v25, 0.0 }
 0x165   : > { %1715 = vst.msk [vmem:[%s2498_s29 + $0x38] sm:$0xff] %vm337_vm1, %v1705_v29  ;;  %v1785_v55 = vmul.f32 %v1766_v49, %v1705_v29 }
 0x167   : > { %v1825_v3 = vmul.f32 %v1785_v55, %v1705_v29  ;;  %v1802_v8 = vsel %vm337_vm1, %v1785_v55, 0.0 }
 0x168   : > { %v1550_v41 = vld [vmem:[%s2498_s29 + $0x48] sm:$0xff]  ;;  %v1803_v18 = vadd.f32 %v1802_v8, %v1801_v11 }
 0x169   : > { %v1677_v45 = vadd.f32 %v1665_v42, %v1550_v41  ;;  %v1841_v6 = vsel %vm337_vm1, %v1825_v3, 0.0 }
 0x16a   : > { %v1696_v50 = vld [vmem:[%s2498_s29 + $0x40] sm:$0xff]  ;;  %v1842_v21 = vadd.f32 %v1841_v6, %v1840_v16 }
 0x16b   : > { %1687 = vst.msk [vmem:[%s2498_s29 + $0x48] sm:$0xff] %vm337_vm1, %v1677_v45  ;;  %v1706_v56 = vmax.f32 %v1696_v50, 0.0 }
 0x16d   : > { %1716 = vst.msk [vmem:[%s2498_s29 + $0x40] sm:$0xff] %vm337_vm1, %v1706_v56  ;;  %v1786_v62 = vmul.f32 %v1771_v59, %v1706_v56 }
 0x16f   : > { %v1826_v9 = vmul.f32 %v1786_v62, %v1706_v56  ;;  %v1804_v15 = vsel %vm337_vm1, %v1786_v62, 0.0 }
 0x170   : > { %v1805_v22 = vadd.f32 %v1804_v15, %v1803_v18 }
 0x171   : > { %v1843_v20 = vsel %vm337_vm1, %v1826_v9, 0.0 }
 0x172   : > { %v1697_v12 = vld [vmem:[%s2498_s29 + $0x48] sm:$0xff]  ;;  %v1844_v28 = vadd.f32 %v1843_v20, %v1842_v21 }
 0x173   : > { %v1707_v14 = vmax.f32 %v1697_v12, 0.0 }
 0x175   : > { %1717 = vst.msk [vmem:[%s2498_s29 + $0x48] sm:$0xff] %vm337_vm1, %v1707_v14  ;;  %v1787_v19 = vmul.f32 %v1776_v17, %v1707_v14 }
 0x177   : > { %v1806_v23 = vsel %vm337_vm1, %v1787_v19, 0.0  ;;  %v1827_v24 = vmul.f32 %v1787_v19, %v1707_v14 }
 0x178   : > { %v1807_v25 = vadd.f32 %v1806_v23, %v1805_v22 }
 0x179   : > { %v1845_v29 = vsel %vm337_vm1, %v1827_v24, 0.0 }
 0x17a   : > { %v1808_v26 = vrot.slane %v1807_v25, 4  ;;  %v1846_v30 = vadd.f32 %v1845_v29, %v1844_v28 }
 0x17c   : > { %v1809_v31 = vadd.f32 %v1808_v26, %v1807_v25  ;;  %v1847_v32 = vrot.slane %v1846_v30, 4 }
 0x17e   : > { %v1810_v33 = vrot.slane %v1809_v31, 2  ;;  %v1848_v34 = vadd.f32 %v1847_v32, %v1846_v30 }
 0x180   : > { %v1811_v35 = vadd.f32 %v1810_v33, %v1809_v31  ;;  %v1849_v13 = vrot.slane %v1848_v34, 2 }
 0x182   : > { %v1812_v36 = vrot.slane %v1811_v35, 1  ;;  %v1850_v37 = vadd.f32 %v1849_v13, %v1848_v34 }
 0x184   : > { %v1813_v27 = vadd.f32 %v1812_v36, %v1811_v35  ;;  %v1851_v38 = vrot.slane %v1850_v37, 1 }
 0x186   : > { %v1814_v41 = vadd.f32 %v1813_v27, %v1788_v63  ;;  %v1852_v42 = vadd.f32 %v1851_v38, %v1850_v37 }
 0x188   : > { %1816 = vst.msk [vmem:[%s3119_s4] sm:$0x1] %vm1815_vm8, %v1814_v41  ;;  %v1853_v43 = vadd.f32 %v1852_v42, %v1817_v39 }
 0x18a   : > { %1854 = vst.msk [vmem:[%s3120_s5] sm:$0x1] %vm1815_vm8, %v1853_v43 }
 0x18b PF: > { %s16_s20 = sadd.s32 1, %s2438_s20   ;;  %s3121_s18 = smov %s2434_s19 }
 0x18c   : > { %p13_p6 = scmp.ge.s32.totalorder %s16_s20, 4   ;;  %s3122_s19 = smov %s3124_s21 }
 0x18e   :  { %15 = sbr.rel (!%p13_p6) target bundleno = 2 (0x2), region = 93 }

</bundles_post_ra>
